<compile_context>
chip_gen: v7x
topology: tpu7x:2x2x1
jax: 0.10.0
libtpu: 0.0.40
codegen_flags: <defaults>
</compile_context>

<pallas_src>
import jax
import jax.numpy as jnp
import numpy as np
from jax.experimental import pallas as pl
from jax.experimental.pallas import tpu as pltpu


# ---------------------------------------------------------------------------
# Small helpers
# ---------------------------------------------------------------------------

def _pick_tile(n, cap, align):
    """Largest divisor of n that is <= cap and a multiple of `align`.

    Falls back to n itself (single full block) which is always legal since a
    block dim equal to the full array dim needs no (8, 128) alignment.
    """
    if n <= cap:
        return n
    for d in range(cap, 0, -1):
        if n % d == 0 and d % align == 0:
            return d
    return n


def _vmem_limit_bytes():
    """Explicit scoped-VMEM limit per generation (review item)."""
    try:
        cap = pltpu.get_tpu_info().vmem_capacity_bytes
    except Exception:
        return 48 * 1024 * 1024          # safe on every generation (incl. v7x)
    # <= 48 MiB on v7x (64 MiB VMEM), ~96 MiB on v5e/v6e (128 MiB VMEM).
    return int(min(0.75 * cap, 100 * 1024 * 1024))


def _tensorcores_per_chip():
    """2 TensorCores per chip on v4/v5p/v7x; 1 on v2/v3/v5e/v6e."""
    try:
        kind = jax.devices()[0].device_kind.lower()
    except Exception:
        return 1
    if "lite" in kind or "v5e" in kind or "v6e" in kind or "v2" in kind or "v3" in kind:
        return 1
    if "v4" in kind or "v5p" in kind or "v5" in kind or "7" in kind:
        return 2
    return 1


# ---------------------------------------------------------------------------
# Kernel A: LSTM recurrence with fused input GEMM
# ---------------------------------------------------------------------------

def _lstm_recurrence_kernel(x_ref, h0_ref, c0_ref, wih_ref, whh_ref, b_ref,
                            hs_ref, hT_ref, cT_ref, h_sc, c_sc):
    t_blk = pl.program_id(1)
    TB = x_ref.shape[1]                      # time steps in this block (static)
    BB, H = h_sc.shape

    # New batch tile (first time block): (re)load the initial state.
    @pl.when(t_blk == 0)
    def _():
        h_sc[...] = h0_ref[...].astype(jnp.float32)
        c_sc[...] = c0_ref[...].astype(jnp.float32)

    w_ih = wih_ref[...]                      # (E, 4H) bf16, VMEM resident
    w_hh = whh_ref[...]                      # (H, 4H) bf16, VMEM resident
    bias = b_ref[...]                        # (1, 4H) f32

    def step(x_t, h_prev, c_prev):
        # x_t @ W_ih is independent of the serial chain, so the scheduler can
        # overlap its MXU work with the previous step's EUP/VPU gate math.
        gates = (jnp.dot(x_t, w_ih, preferred_element_type=jnp.float32)
                 + jnp.dot(h_prev.astype(jnp.bfloat16), w_hh,
                           preferred_element_type=jnp.float32)
                 + bias)                                        # (rows, 4H) f32
        # PyTorch LSTM gate order: input, forget, cell (g), output.
        # One gate slice is produced/consumed at a time to bound live vregs.
        # NOTE: keep H a multiple of 128 in production for lane-dense slices.
        g_i = jax.nn.sigmoid(gates[:, 0 * H:1 * H])
        g_g = jnp.tanh(gates[:, 2 * H:3 * H])
        c_new = g_i * g_g
        g_f = jax.nn.sigmoid(gates[:, 1 * H:2 * H])
        c_new = c_new + g_f * c_prev
        g_o = jax.nn.sigmoid(gates[:, 3 * H:4 * H])
        h_new = g_o * jnp.tanh(c_new)
        return h_new, c_new

    # Two independent batch sub-tiles -> two serial chains the LLO scheduler
    # can interleave (MXU of one overlaps EUP/VPU of the other).  Only split
    # when the tile is big enough to keep bf16 stores sublane-dense.
    n_sub = 2 if (BB >= 16 and BB % 16 == 0) else 1
    sb = BB // n_sub

    for s in range(n_sub):
        rows = slice(s * sb, (s + 1) * sb)
        h = h_sc[rows, :]
        c = c_sc[rows, :]
        for i in range(TB):                   # static unroll (TB is constant)
            h, c = step(x_ref[rows, i, :], h, c)
            hs_ref[rows, i, :] = h.astype(hs_ref.dtype)
        h_sc[rows, :] = h
        c_sc[rows, :] = c

    # Emit final (h, c) for this batch tile after the last time block.
    @pl.when(t_blk == pl.num_programs(1) - 1)
    def _():
        hT_ref[...] = h_sc[...].astype(hT_ref.dtype)
        cT_ref[...] = c_sc[...].astype(cT_ref.dtype)


# ---------------------------------------------------------------------------
# Kernel B: logits = H_all @ W_out + b_out
# ---------------------------------------------------------------------------

def _out_proj_kernel(h_ref, w_ref, b_ref, o_ref):
    o_ref[...] = (
        jnp.dot(h_ref[...], w_ref[...], preferred_element_type=jnp.float32)
        + b_ref[...]).astype(o_ref.dtype)


# ---------------------------------------------------------------------------
# Wrapper
# ---------------------------------------------------------------------------

def decoder_forward(params, x_tokens, h, c, logits_dtype=jnp.bfloat16):
    """x_tokens: (B, T) int32; h, c: (1, B, H).  Returns (logits[B,T,V], h, c)."""
    emb, w_ih, w_hh, b, w_out, b_out = (params["emb"], params["w_ih"],
                                        params["w_hh"], params["b"],
                                        params["w_out"], params["b_out"])
    B, T = x_tokens.shape
    E = emb.shape[1]
    H = w_hh.shape[0]
    G = 4 * H
    V = w_out.shape[1]
    M = B * T

    vmem_limit = _vmem_limit_bytes()

    # bf16 weights/activations -> 2x MXU throughput, half the weight DMA; all
    # matmuls accumulate in f32.
    w_ih_bf = w_ih.astype(jnp.bfloat16)
    w_hh_bf = w_hh.astype(jnp.bfloat16)
    w_out_bf = w_out.astype(jnp.bfloat16)

    # Embedding lookup stays as XLA glue (gather).
    # TODO(synk): fuse the gather into the recurrence via scalar-prefetched
    # token ids (pl.Element row-gather / manual DMA) to remove the x_emb
    # HBM write+read when E is large.
    x_emb = emb[x_tokens].astype(jnp.bfloat16)             # (B, T, E)

    # ---- Tile choices -------------------------------------------------------
    tb = _pick_tile(T, 64, 16)          # time steps per grid step (16-aligned)
    tm = _pick_tile(M, 512, 16)         # row tile for the projection GEMM
    tv = _pick_tile(V, 1024, 128)       # vocab tile
    # Split the batch tile only on 2-TensorCore parts (v4/v5p/v7x).
    if _tensorcores_per_chip() == 2 and B % 16 == 0:
        bb = B // 2
    else:
        bb = B

    # ---- Kernel A: recurrence (input GEMM fused, gates never hit HBM) ------
    def run_recurrence(single_buffer_weights):
        def wspec(shape):
            kw = {}
            if single_buffer_weights:
                # Constant-index blocks: no point double-buffering them.
                kw["pipeline_mode"] = pl.Buffered(1)
            return pl.BlockSpec(shape, lambda bi, ti: (0, 0), **kw)

        return pl.pallas_call(
            _lstm_recurrence_kernel,
            out_shape=(
                jax.ShapeDtypeStruct((B, T, H), jnp.bfloat16),  # all hidden states
                jax.ShapeDtypeStruct((B, H), jnp.float32),      # final h
                jax.ShapeDtypeStruct((B, H), jnp.float32),      # final c
            ),
            grid_spec=pltpu.PrefetchScalarGridSpec(
                num_scalar_prefetch=0,
                grid=(B // bb, T // tb),
                in_specs=[
                    pl.BlockSpec((bb, tb, E), lambda bi, ti: (bi, ti, 0)),
                    pl.BlockSpec((bb, H), lambda bi, ti: (bi, 0)),
                    pl.BlockSpec((bb, H), lambda bi, ti: (bi, 0)),
                    wspec((E, G)),
                    wspec((H, G)),
                    wspec((1, G)),
                ],
                out_specs=[
                    pl.BlockSpec((bb, tb, H), lambda bi, ti: (bi, ti, 0)),
                    pl.BlockSpec((bb, H), lambda bi, ti: (bi, 0)),
                    pl.BlockSpec((bb, H), lambda bi, ti: (bi, 0)),
                ],
                scratch_shapes=[
                    pltpu.VMEM((bb, H), jnp.float32),           # h carry
                    pltpu.VMEM((bb, H), jnp.float32),           # c carry
                ],
            ),
            compiler_params=pltpu.CompilerParams(
                dimension_semantics=("parallel", "arbitrary"),
                vmem_limit_bytes=vmem_limit),
        )(x_emb, h[0], c[0], w_ih_bf, w_hh_bf, b)

    try:
        hs, h_fin, c_fin = run_recurrence(True)
    except Exception:
        # pl.Buffered(1) not accepted by this jax build -> default buffering.
        hs, h_fin, c_fin = run_recurrence(False)

    # ---- Kernel B: projection GEMM -----------------------------------------
    hs2d = hs.reshape(M, H)                                 # free row-major view
    if V >= M:
        # W_out is the larger operand: vocab outer so each W_out tile is
        # fetched from HBM exactly once (hs tiles are re-read V/tv times).
        grid = (V // tv, M // tm)
        in_specs = [pl.BlockSpec((tm, H), lambda j, i: (i, 0)),
                    pl.BlockSpec((H, tv), lambda j, i: (0, j)),
                    pl.BlockSpec((1, tv), lambda j, i: (0, j))]
        out_spec = pl.BlockSpec((tm, tv), lambda j, i: (i, j))
    else:
        # hs (M*H) is larger (training-shaped M): M outer so hs is read once.
        grid = (M // tm, V // tv)
        in_specs = [pl.BlockSpec((tm, H), lambda i, j: (i, 0)),
                    pl.BlockSpec((H, tv), lambda i, j: (0, j)),
                    pl.BlockSpec((1, tv), lambda i, j: (0, j))]
        out_spec = pl.BlockSpec((tm, tv), lambda i, j: (i, j))

    logits2d = pl.pallas_call(
        _out_proj_kernel,
        out_shape=jax.ShapeDtypeStruct((M, V), logits_dtype),
        grid_spec=pltpu.PrefetchScalarGridSpec(
            num_scalar_prefetch=0,
            grid=grid,
            in_specs=in_specs,
            out_specs=out_spec,
        ),
        compiler_params=pltpu.CompilerParams(
            dimension_semantics=("parallel", "parallel"),
            vmem_limit_bytes=vmem_limit),
    )(hs2d, w_out_bf, b_out)
    logits = logits2d.reshape(B, T, V)

    return logits, h_fin[None], c_fin[None]


# ---------------------------------------------------------------------------
# Pure-JAX reference (matches torch.nn.LSTM / nn.Linear semantics, f32)
# ---------------------------------------------------------------------------

def decoder_reference(params, x_tokens, h, c):
    emb, w_ih, w_hh, b, w_out, b_out = (params["emb"], params["w_ih"],
                                        params["w_hh"], params["b"],
                                        params["w_out"], params["b_out"])
    H = w_hh.shape[0]
    x_emb = emb[x_tokens]                                   # (B, T, E)

    def step(carry, x_t):
        h_p, c_p = carry
        gates = x_t @ w_ih + h_p @ w_hh + b[0]
        i_g = jax.nn.sigmoid(gates[:, 0 * H:1 * H])
        f_g = jax.nn.sigmoid(gates[:, 1 * H:2 * H])
        g_g = jnp.tanh(gates[:, 2 * H:3 * H])
        o_g = jax.nn.sigmoid(gates[:, 3 * H:4 * H])
        c_n = f_g * c_p + i_g * g_g
        h_n = o_g * jnp.tanh(c_n)
        return (h_n, c_n), h_n

    (h_f, c_f), hs = jax.lax.scan(step, (h[0], c[0]),
                                  jnp.transpose(x_emb, (1, 0, 2)))
    logits = jnp.transpose(hs, (1, 0, 2)) @ w_out + b_out[0]
    return logits, h_f[None], c_f[None]


def init_params(key, vocab_size, emb_size, hidden_size):
    ks = jax.random.split(key, 6)
    scale = 0.1
    return {
        "emb":   scale * jax.random.normal(ks[0], (vocab_size, emb_size), jnp.float32),
        "w_ih":  scale * jax.random.normal(ks[1], (emb_size, 4 * hidden_size), jnp.float32),
        "w_hh":  scale * jax.random.normal(ks[2], (hidden_size, 4 * hidden_size), jnp.float32),
        "b":     scale * jax.random.normal(ks[3], (1, 4 * hidden_size), jnp.float32),
        "w_out": scale * jax.random.normal(ks[4], (hidden_size, vocab_size), jnp.float32),
        "b_out": scale * jax.random.normal(ks[5], (1, vocab_size), jnp.float32),
    }


if __name__ == "__main__":
    VOCAB, EMB, HIDDEN = 128, 32, 32
    B, T = 8, 8

    key = jax.random.PRNGKey(0)
    k_p, k_x, k_h, k_c = jax.random.split(key, 4)
    params = init_params(k_p, VOCAB, EMB, HIDDEN)

    x = jax.random.randint(k_x, (B, T), 0, VOCAB, dtype=jnp.int32)
    h0 = 0.1 * jax.random.normal(k_h, (1, B, HIDDEN), jnp.float32)
    c0 = 0.1 * jax.random.normal(k_c, (1, B, HIDDEN), jnp.float32)

    logits, h_out, c_out = decoder_forward(params, x, h0, c0)
    jax.block_until_ready((logits, h_out, c_out))

    ref_logits, ref_h, ref_c = decoder_reference(params, x, h0, c0)
    assert logits.shape == (B, T, VOCAB)
    assert h_out.shape == (1, B, HIDDEN) and c_out.shape == (1, B, HIDDEN)

    # bf16 weights/activations (and bf16 logits) inside the kernels -> relaxed
    # tolerance vs the pure-f32 reference.
    logits_f32 = np.asarray(logits.astype(jnp.float32))
    assert np.allclose(logits_f32, np.asarray(ref_logits), rtol=2e-2, atol=1e-2)
    assert np.allclose(np.asarray(h_out), np.asarray(ref_h), rtol=2e-2, atol=5e-3)
    assert np.allclose(np.asarray(c_out), np.asarray(ref_c), rtol=2e-2, atol=5e-3)

    print("KERNEL_OK")
</pallas_src>

<mosaic_0001>
module attributes {stable_mosaic.version = 11 : i64} {
  func.func @_lstm_recurrence_kernel(%arg0: i32, %arg1: i32, %arg2: memref<8x8x32xbf16, #tpu.memory_space<vmem>>, %arg3: memref<8x32xf32, #tpu.memory_space<vmem>>, %arg4: memref<8x32xf32, #tpu.memory_space<vmem>>, %arg5: memref<32x128xbf16, #tpu.memory_space<vmem>>, %arg6: memref<32x128xbf16, #tpu.memory_space<vmem>>, %arg7: memref<1x128xf32, #tpu.memory_space<vmem>>, %arg8: memref<8x8x32xbf16, #tpu.memory_space<vmem>>, %arg9: memref<8x32xf32, #tpu.memory_space<vmem>>, %arg10: memref<8x32xf32, #tpu.memory_space<vmem>>, %arg11: memref<8x32xf32, #tpu.memory_space<vmem>>, %arg12: memref<8x32xf32, #tpu.memory_space<vmem>>) attributes {dimension_semantics = [#tpu.dimension_semantics<parallel>, #tpu.dimension_semantics<arbitrary>], iteration_bounds = array<i64: 1, 1>, scalar_prefetch = 0 : i64, scratch_operands = 2 : i64, tpu.core_type = #tpu.core_type<tc>, window_params = [{transform_indices = @transform_0, window_bounds = array<i64: 8, 8, 32>}, {transform_indices = @transform_1, window_bounds = array<i64: 8, 32>}, {transform_indices = @transform_2, window_bounds = array<i64: 8, 32>}, {pipeline_mode = #tpu.pipeline_mode<synchronous>, transform_indices = @transform_3, window_bounds = array<i64: 32, 128>}, {pipeline_mode = #tpu.pipeline_mode<synchronous>, transform_indices = @transform_4, window_bounds = array<i64: 32, 128>}, {pipeline_mode = #tpu.pipeline_mode<synchronous>, transform_indices = @transform_5, window_bounds = array<i64: 1, 128>}, {transform_indices = @transform_6, window_bounds = array<i64: 8, 8, 32>}, {transform_indices = @transform_7, window_bounds = array<i64: 8, 32>}, {transform_indices = @transform_8, window_bounds = array<i64: 8, 32>}]} {
    %c0_i32 = arith.constant 0 : i32
    %0 = arith.cmpi eq, %arg1, %c0_i32 : i32
    %1 = arith.extui %0 : i1 to i32
    %c0_i32_0 = arith.constant 0 : i32
    %2 = arith.cmpi ne, %1, %c0_i32_0 : i32
    scf.if %2 {
      %c0_96 = arith.constant 0 : index
      %c0_97 = arith.constant 0 : index
      %309 = vector.load %arg3[%c0_96, %c0_97] : memref<8x32xf32, #tpu.memory_space<vmem>>, vector<8x32xf32>
      %c0_98 = arith.constant 0 : index
      %c0_99 = arith.constant 0 : index
      %310 = vector.load %arg11[%c0_98, %c0_99] : memref<8x32xf32, #tpu.memory_space<vmem>>, vector<8x32xf32>
      tpu.vector_store %arg11[%c0_98, %c0_99], %309 {strides = array<i32>} : memref<8x32xf32, #tpu.memory_space<vmem>>, vector<8x32xf32>,
      %c0_100 = arith.constant 0 : index
      %c0_101 = arith.constant 0 : index
      %311 = vector.load %arg4[%c0_100, %c0_101] : memref<8x32xf32, #tpu.memory_space<vmem>>, vector<8x32xf32>
      %c0_102 = arith.constant 0 : index
      %c0_103 = arith.constant 0 : index
      %312 = vector.load %arg12[%c0_102, %c0_103] : memref<8x32xf32, #tpu.memory_space<vmem>>, vector<8x32xf32>
      tpu.vector_store %arg12[%c0_102, %c0_103], %311 {strides = array<i32>} : memref<8x32xf32, #tpu.memory_space<vmem>>, vector<8x32xf32>,
    } else {
    }
    %c0 = arith.constant 0 : index
    %c0_1 = arith.constant 0 : index
    %3 = vector.load %arg5[%c0, %c0_1] : memref<32x128xbf16, #tpu.memory_space<vmem>>, vector<32x128xbf16>
    %c0_2 = arith.constant 0 : index
    %c0_3 = arith.constant 0 : index
    %4 = vector.load %arg6[%c0_2, %c0_3] : memref<32x128xbf16, #tpu.memory_space<vmem>>, vector<32x128xbf16>
    %c0_4 = arith.constant 0 : index
    %c0_5 = arith.constant 0 : index
    %5 = vector.load %arg7[%c0_4, %c0_5] : memref<1x128xf32, #tpu.memory_space<vmem>>, vector<1x128xf32>
    %c0_6 = arith.constant 0 : index
    %c0_7 = arith.constant 0 : index
    %6 = vector.load %arg11[%c0_6, %c0_7] : memref<8x32xf32, #tpu.memory_space<vmem>>, vector<8x32xf32>
    %c0_8 = arith.constant 0 : index
    %c0_9 = arith.constant 0 : index
    %7 = vector.load %arg12[%c0_8, %c0_9] : memref<8x32xf32, #tpu.memory_space<vmem>>, vector<8x32xf32>
    %c0_10 = arith.constant 0 : index
    %c0_11 = arith.constant 0 : index
    %c0_12 = arith.constant 0 : index
    %8 = vector.load %arg2[%c0_10, %c0_11, %c0_12] : memref<8x8x32xbf16, #tpu.memory_space<vmem>>, vector<8x1x32xbf16>
    %9 = vector.shape_cast %8 : vector<8x1x32xbf16> to vector<8x32xbf16>
    %cst = arith.constant dense<0.000000e+00> : vector<8x128xf32>
    %10 = tpu.matmul %9, %3, %cst {dimension_numbers = #tpu.dot_dimension_numbers<[1], [0], [0], [1], [0, 0, 1, 1], [], []>} : vector<8x32xbf16>, vector<32x128xbf16>, vector<8x128xf32> -> vector<8x128xf32>
    %11 = arith.truncf %6 : vector<8x32xf32> to vector<8x32xbf16>
    %cst_13 = arith.constant dense<0.000000e+00> : vector<8x128xf32>
    %12 = tpu.matmul %11, %4, %cst_13 {dimension_numbers = #tpu.dot_dimension_numbers<[1], [0], [0], [1], [0, 0, 1, 1], [], []>} : vector<8x32xbf16>, vector<32x128xbf16>, vector<8x128xf32> -> vector<8x128xf32>
    %13 = arith.addf %10, %12 : vector<8x128xf32>
    %14 = vector.broadcast %5 : vector<1x128xf32> to vector<8x128xf32>
    %15 = arith.addf %13, %14 : vector<8x128xf32>
    %16 = vector.extract_strided_slice %15 {offsets = [0, 0], sizes = [8, 32], strides = [1, 1]} : vector<8x128xf32> to vector<8x32xf32>
    %17 = arith.negf %16 : vector<8x32xf32>
    %18 = math.exp %17 : vector<8x32xf32>
    %cst_14 = arith.constant 1.000000e+00 : f32
    %19 = vector.broadcast %cst_14 : f32 to vector<8x32xf32>
    %20 = arith.addf %19, %18 : vector<8x32xf32>
    %21 = arith.divf %19, %20 : vector<8x32xf32>
    %22 = vector.extract_strided_slice %15 {offsets = [0, 64], sizes = [8, 32], strides = [1, 1]} : vector<8x128xf32> to vector<8x32xf32>
    %23 = math.tanh %22 : vector<8x32xf32>
    %24 = arith.mulf %21, %23 : vector<8x32xf32>
    %25 = vector.extract_strided_slice %15 {offsets = [0, 32], sizes = [8, 32], strides = [1, 1]} : vector<8x128xf32> to vector<8x32xf32>
    %26 = arith.negf %25 : vector<8x32xf32>
    %27 = math.exp %26 : vector<8x32xf32>
    %cst_15 = arith.constant 1.000000e+00 : f32
    %28 = vector.broadcast %cst_15 : f32 to vector<8x32xf32>
    %29 = arith.addf %28, %27 : vector<8x32xf32>
    %30 = arith.divf %28, %29 : vector<8x32xf32>
    %31 = arith.mulf %30, %7 : vector<8x32xf32>
    %32 = arith.addf %24, %31 : vector<8x32xf32>
    %33 = vector.extract_strided_slice %15 {offsets = [0, 96], sizes = [8, 32], strides = [1, 1]} : vector<8x128xf32> to vector<8x32xf32>
    %34 = arith.negf %33 : vector<8x32xf32>
    %35 = math.exp %34 : vector<8x32xf32>
    %cst_16 = arith.constant 1.000000e+00 : f32
    %36 = vector.broadcast %cst_16 : f32 to vector<8x32xf32>
    %37 = arith.addf %36, %35 : vector<8x32xf32>
    %38 = arith.divf %36, %37 : vector<8x32xf32>
    %39 = math.tanh %32 : vector<8x32xf32>
    %40 = arith.mulf %38, %39 : vector<8x32xf32>
    %41 = arith.truncf %40 : vector<8x32xf32> to vector<8x32xbf16>
    %c0_17 = arith.constant 0 : index
    %c0_18 = arith.constant 0 : index
    %c0_19 = arith.constant 0 : index
    %42 = vector.load %arg8[%c0_17, %c0_18, %c0_19] : memref<8x8x32xbf16, #tpu.memory_space<vmem>>, vector<8x1x32xbf16>
    %43 = vector.shape_cast %42 : vector<8x1x32xbf16> to vector<8x32xbf16>
    %44 = vector.shape_cast %41 : vector<8x32xbf16> to vector<8x1x32xbf16>
    tpu.vector_store %arg8[%c0_17, %c0_18, %c0_19], %44 {strides = array<i32>} : memref<8x8x32xbf16, #tpu.memory_space<vmem>>, vector<8x1x32xbf16>,
    %c0_20 = arith.constant 0 : index
    %c1 = arith.constant 1 : index
    %c0_21 = arith.constant 0 : index
    %45 = vector.load %arg2[%c0_20, %c1, %c0_21] : memref<8x8x32xbf16, #tpu.memory_space<vmem>>, vector<8x1x32xbf16>
    %46 = vector.shape_cast %45 : vector<8x1x32xbf16> to vector<8x32xbf16>
    %cst_22 = arith.constant dense<0.000000e+00> : vector<8x128xf32>
    %47 = tpu.matmul %46, %3, %cst_22 {dimension_numbers = #tpu.dot_dimension_numbers<[1], [0], [0], [1], [0, 0, 1, 1], [], []>} : vector<8x32xbf16>, vector<32x128xbf16>, vector<8x128xf32> -> vector<8x128xf32>
    %48 = arith.truncf %40 : vector<8x32xf32> to vector<8x32xbf16>
    %cst_23 = arith.constant dense<0.000000e+00> : vector<8x128xf32>
    %49 = tpu.matmul %48, %4, %cst_23 {dimension_numbers = #tpu.dot_dimension_numbers<[1], [0], [0], [1], [0, 0, 1, 1], [], []>} : vector<8x32xbf16>, vector<32x128xbf16>, vector<8x128xf32> -> vector<8x128xf32>
    %50 = arith.addf %47, %49 : vector<8x128xf32>
    %51 = vector.broadcast %5 : vector<1x128xf32> to vector<8x128xf32>
    %52 = arith.addf %50, %51 : vector<8x128xf32>
    %53 = vector.extract_strided_slice %52 {offsets = [0, 0], sizes = [8, 32], strides = [1, 1]} : vector<8x128xf32> to vector<8x32xf32>
    %54 = arith.negf %53 : vector<8x32xf32>
    %55 = math.exp %54 : vector<8x32xf32>
    %cst_24 = arith.constant 1.000000e+00 : f32
    %56 = vector.broadcast %cst_24 : f32 to vector<8x32xf32>
    %57 = arith.addf %56, %55 : vector<8x32xf32>
    %58 = arith.divf %56, %57 : vector<8x32xf32>
    %59 = vector.extract_strided_slice %52 {offsets = [0, 64], sizes = [8, 32], strides = [1, 1]} : vector<8x128xf32> to vector<8x32xf32>
    %60 = math.tanh %59 : vector<8x32xf32>
    %61 = arith.mulf %58, %60 : vector<8x32xf32>
    %62 = vector.extract_strided_slice %52 {offsets = [0, 32], sizes = [8, 32], strides = [1, 1]} : vector<8x128xf32> to vector<8x32xf32>
    %63 = arith.negf %62 : vector<8x32xf32>
    %64 = math.exp %63 : vector<8x32xf32>
    %cst_25 = arith.constant 1.000000e+00 : f32
    %65 = vector.broadcast %cst_25 : f32 to vector<8x32xf32>
    %66 = arith.addf %65, %64 : vector<8x32xf32>
    %67 = arith.divf %65, %66 : vector<8x32xf32>
    %68 = arith.mulf %67, %32 : vector<8x32xf32>
    %69 = arith.addf %61, %68 : vector<8x32xf32>
    %70 = vector.extract_strided_slice %52 {offsets = [0, 96], sizes = [8, 32], strides = [1, 1]} : vector<8x128xf32> to vector<8x32xf32>
    %71 = arith.negf %70 : vector<8x32xf32>
    %72 = math.exp %71 : vector<8x32xf32>
    %cst_26 = arith.constant 1.000000e+00 : f32
    %73 = vector.broadcast %cst_26 : f32 to vector<8x32xf32>
    %74 = arith.addf %73, %72 : vector<8x32xf32>
    %75 = arith.divf %73, %74 : vector<8x32xf32>
    %76 = math.tanh %69 : vector<8x32xf32>
    %77 = arith.mulf %75, %76 : vector<8x32xf32>
    %78 = arith.truncf %77 : vector<8x32xf32> to vector<8x32xbf16>
    %c0_27 = arith.constant 0 : index
    %c1_28 = arith.constant 1 : index
    %c0_29 = arith.constant 0 : index
    %79 = vector.load %arg8[%c0_27, %c1_28, %c0_29] : memref<8x8x32xbf16, #tpu.memory_space<vmem>>, vector<8x1x32xbf16>
    %80 = vector.shape_cast %79 : vector<8x1x32xbf16> to vector<8x32xbf16>
    %81 = vector.shape_cast %78 : vector<8x32xbf16> to vector<8x1x32xbf16>
    tpu.vector_store %arg8[%c0_27, %c1_28, %c0_29], %81 {strides = array<i32>} : memref<8x8x32xbf16, #tpu.memory_space<vmem>>, vector<8x1x32xbf16>,
    %c0_30 = arith.constant 0 : index
    %c2 = arith.constant 2 : index
    %c0_31 = arith.constant 0 : index
    %82 = vector.load %arg2[%c0_30, %c2, %c0_31] : memref<8x8x32xbf16, #tpu.memory_space<vmem>>, vector<8x1x32xbf16>
    %83 = vector.shape_cast %82 : vector<8x1x32xbf16> to vector<8x32xbf16>
    %cst_32 = arith.constant dense<0.000000e+00> : vector<8x128xf32>
    %84 = tpu.matmul %83, %3, %cst_32 {dimension_numbers = #tpu.dot_dimension_numbers<[1], [0], [0], [1], [0, 0, 1, 1], [], []>} : vector<8x32xbf16>, vector<32x128xbf16>, vector<8x128xf32> -> vector<8x128xf32>
    %85 = arith.truncf %77 : vector<8x32xf32> to vector<8x32xbf16>
    %cst_33 = arith.constant dense<0.000000e+00> : vector<8x128xf32>
    %86 = tpu.matmul %85, %4, %cst_33 {dimension_numbers = #tpu.dot_dimension_numbers<[1], [0], [0], [1], [0, 0, 1, 1], [], []>} : vector<8x32xbf16>, vector<32x128xbf16>, vector<8x128xf32> -> vector<8x128xf32>
    %87 = arith.addf %84, %86 : vector<8x128xf32>
    %88 = vector.broadcast %5 : vector<1x128xf32> to vector<8x128xf32>
    %89 = arith.addf %87, %88 : vector<8x128xf32>
    %90 = vector.extract_strided_slice %89 {offsets = [0, 0], sizes = [8, 32], strides = [1, 1]} : vector<8x128xf32> to vector<8x32xf32>
    %91 = arith.negf %90 : vector<8x32xf32>
    %92 = math.exp %91 : vector<8x32xf32>
    %cst_34 = arith.constant 1.000000e+00 : f32
    %93 = vector.broadcast %cst_34 : f32 to vector<8x32xf32>
    %94 = arith.addf %93, %92 : vector<8x32xf32>
    %95 = arith.divf %93, %94 : vector<8x32xf32>
    %96 = vector.extract_strided_slice %89 {offsets = [0, 64], sizes = [8, 32], strides = [1, 1]} : vector<8x128xf32> to vector<8x32xf32>
    %97 = math.tanh %96 : vector<8x32xf32>
    %98 = arith.mulf %95, %97 : vector<8x32xf32>
    %99 = vector.extract_strided_slice %89 {offsets = [0, 32], sizes = [8, 32], strides = [1, 1]} : vector<8x128xf32> to vector<8x32xf32>
    %100 = arith.negf %99 : vector<8x32xf32>
    %101 = math.exp %100 : vector<8x32xf32>
    %cst_35 = arith.constant 1.000000e+00 : f32
    %102 = vector.broadcast %cst_35 : f32 to vector<8x32xf32>
    %103 = arith.addf %102, %101 : vector<8x32xf32>
    %104 = arith.divf %102, %103 : vector<8x32xf32>
    %105 = arith.mulf %104, %69 : vector<8x32xf32>
    %106 = arith.addf %98, %105 : vector<8x32xf32>
    %107 = vector.extract_strided_slice %89 {offsets = [0, 96], sizes = [8, 32], strides = [1, 1]} : vector<8x128xf32> to vector<8x32xf32>
    %108 = arith.negf %107 : vector<8x32xf32>
    %109 = math.exp %108 : vector<8x32xf32>
    %cst_36 = arith.constant 1.000000e+00 : f32
    %110 = vector.broadcast %cst_36 : f32 to vector<8x32xf32>
    %111 = arith.addf %110, %109 : vector<8x32xf32>
    %112 = arith.divf %110, %111 : vector<8x32xf32>
    %113 = math.tanh %106 : vector<8x32xf32>
    %114 = arith.mulf %112, %113 : vector<8x32xf32>
    %115 = arith.truncf %114 : vector<8x32xf32> to vector<8x32xbf16>
    %c0_37 = arith.constant 0 : index
    %c2_38 = arith.constant 2 : index
    %c0_39 = arith.constant 0 : index
    %116 = vector.load %arg8[%c0_37, %c2_38, %c0_39] : memref<8x8x32xbf16, #tpu.memory_space<vmem>>, vector<8x1x32xbf16>
    %117 = vector.shape_cast %116 : vector<8x1x32xbf16> to vector<8x32xbf16>
    %118 = vector.shape_cast %115 : vector<8x32xbf16> to vector<8x1x32xbf16>
    tpu.vector_store %arg8[%c0_37, %c2_38, %c0_39], %118 {strides = array<i32>} : memref<8x8x32xbf16, #tpu.memory_space<vmem>>, vector<8x1x32xbf16>,
    %c0_40 = arith.constant 0 : index
    %c3 = arith.constant 3 : index
    %c0_41 = arith.constant 0 : index
    %119 = vector.load %arg2[%c0_40, %c3, %c0_41] : memref<8x8x32xbf16, #tpu.memory_space<vmem>>, vector<8x1x32xbf16>
    %120 = vector.shape_cast %119 : vector<8x1x32xbf16> to vector<8x32xbf16>
    %cst_42 = arith.constant dense<0.000000e+00> : vector<8x128xf32>
    %121 = tpu.matmul %120, %3, %cst_42 {dimension_numbers = #tpu.dot_dimension_numbers<[1], [0], [0], [1], [0, 0, 1, 1], [], []>} : vector<8x32xbf16>, vector<32x128xbf16>, vector<8x128xf32> -> vector<8x128xf32>
    %122 = arith.truncf %114 : vector<8x32xf32> to vector<8x32xbf16>
    %cst_43 = arith.constant dense<0.000000e+00> : vector<8x128xf32>
    %123 = tpu.matmul %122, %4, %cst_43 {dimension_numbers = #tpu.dot_dimension_numbers<[1], [0], [0], [1], [0, 0, 1, 1], [], []>} : vector<8x32xbf16>, vector<32x128xbf16>, vector<8x128xf32> -> vector<8x128xf32>
    %124 = arith.addf %121, %123 : vector<8x128xf32>
    %125 = vector.broadcast %5 : vector<1x128xf32> to vector<8x128xf32>
    %126 = arith.addf %124, %125 : vector<8x128xf32>
    %127 = vector.extract_strided_slice %126 {offsets = [0, 0], sizes = [8, 32], strides = [1, 1]} : vector<8x128xf32> to vector<8x32xf32>
    %128 = arith.negf %127 : vector<8x32xf32>
    %129 = math.exp %128 : vector<8x32xf32>
    %cst_44 = arith.constant 1.000000e+00 : f32
    %130 = vector.broadcast %cst_44 : f32 to vector<8x32xf32>
    %131 = arith.addf %130, %129 : vector<8x32xf32>
    %132 = arith.divf %130, %131 : vector<8x32xf32>
    %133 = vector.extract_strided_slice %126 {offsets = [0, 64], sizes = [8, 32], strides = [1, 1]} : vector<8x128xf32> to vector<8x32xf32>
    %134 = math.tanh %133 : vector<8x32xf32>
    %135 = arith.mulf %132, %134 : vector<8x32xf32>
    %136 = vector.extract_strided_slice %126 {offsets = [0, 32], sizes = [8, 32], strides = [1, 1]} : vector<8x128xf32> to vector<8x32xf32>
    %137 = arith.negf %136 : vector<8x32xf32>
    %138 = math.exp %137 : vector<8x32xf32>
    %cst_45 = arith.constant 1.000000e+00 : f32
    %139 = vector.broadcast %cst_45 : f32 to vector<8x32xf32>
    %140 = arith.addf %139, %138 : vector<8x32xf32>
    %141 = arith.divf %139, %140 : vector<8x32xf32>
    %142 = arith.mulf %141, %106 : vector<8x32xf32>
    %143 = arith.addf %135, %142 : vector<8x32xf32>
    %144 = vector.extract_strided_slice %126 {offsets = [0, 96], sizes = [8, 32], strides = [1, 1]} : vector<8x128xf32> to vector<8x32xf32>
    %145 = arith.negf %144 : vector<8x32xf32>
    %146 = math.exp %145 : vector<8x32xf32>
    %cst_46 = arith.constant 1.000000e+00 : f32
    %147 = vector.broadcast %cst_46 : f32 to vector<8x32xf32>
    %148 = arith.addf %147, %146 : vector<8x32xf32>
    %149 = arith.divf %147, %148 : vector<8x32xf32>
    %150 = math.tanh %143 : vector<8x32xf32>
    %151 = arith.mulf %149, %150 : vector<8x32xf32>
    %152 = arith.truncf %151 : vector<8x32xf32> to vector<8x32xbf16>
    %c0_47 = arith.constant 0 : index
    %c3_48 = arith.constant 3 : index
    %c0_49 = arith.constant 0 : index
    %153 = vector.load %arg8[%c0_47, %c3_48, %c0_49] : memref<8x8x32xbf16, #tpu.memory_space<vmem>>, vector<8x1x32xbf16>
    %154 = vector.shape_cast %153 : vector<8x1x32xbf16> to vector<8x32xbf16>
    %155 = vector.shape_cast %152 : vector<8x32xbf16> to vector<8x1x32xbf16>
    tpu.vector_store %arg8[%c0_47, %c3_48, %c0_49], %155 {strides = array<i32>} : memref<8x8x32xbf16, #tpu.memory_space<vmem>>, vector<8x1x32xbf16>,
    %c0_50 = arith.constant 0 : index
    %c4 = arith.constant 4 : index
    %c0_51 = arith.constant 0 : index
    %156 = vector.load %arg2[%c0_50, %c4, %c0_51] : memref<8x8x32xbf16, #tpu.memory_space<vmem>>, vector<8x1x32xbf16>
    %157 = vector.shape_cast %156 : vector<8x1x32xbf16> to vector<8x32xbf16>
    %cst_52 = arith.constant dense<0.000000e+00> : vector<8x128xf32>
    %158 = tpu.matmul %157, %3, %cst_52 {dimension_numbers = #tpu.dot_dimension_numbers<[1], [0], [0], [1], [0, 0, 1, 1], [], []>} : vector<8x32xbf16>, vector<32x128xbf16>, vector<8x128xf32> -> vector<8x128xf32>
    %159 = arith.truncf %151 : vector<8x32xf32> to vector<8x32xbf16>
    %cst_53 = arith.constant dense<0.000000e+00> : vector<8x128xf32>
    %160 = tpu.matmul %159, %4, %cst_53 {dimension_numbers = #tpu.dot_dimension_numbers<[1], [0], [0], [1], [0, 0, 1, 1], [], []>} : vector<8x32xbf16>, vector<32x128xbf16>, vector<8x128xf32> -> vector<8x128xf32>
    %161 = arith.addf %158, %160 : vector<8x128xf32>
    %162 = vector.broadcast %5 : vector<1x128xf32> to vector<8x128xf32>
    %163 = arith.addf %161, %162 : vector<8x128xf32>
    %164 = vector.extract_strided_slice %163 {offsets = [0, 0], sizes = [8, 32], strides = [1, 1]} : vector<8x128xf32> to vector<8x32xf32>
    %165 = arith.negf %164 : vector<8x32xf32>
    %166 = math.exp %165 : vector<8x32xf32>
    %cst_54 = arith.constant 1.000000e+00 : f32
    %167 = vector.broadcast %cst_54 : f32 to vector<8x32xf32>
    %168 = arith.addf %167, %166 : vector<8x32xf32>
    %169 = arith.divf %167, %168 : vector<8x32xf32>
    %170 = vector.extract_strided_slice %163 {offsets = [0, 64], sizes = [8, 32], strides = [1, 1]} : vector<8x128xf32> to vector<8x32xf32>
    %171 = math.tanh %170 : vector<8x32xf32>
    %172 = arith.mulf %169, %171 : vector<8x32xf32>
    %173 = vector.extract_strided_slice %163 {offsets = [0, 32], sizes = [8, 32], strides = [1, 1]} : vector<8x128xf32> to vector<8x32xf32>
    %174 = arith.negf %173 : vector<8x32xf32>
    %175 = math.exp %174 : vector<8x32xf32>
    %cst_55 = arith.constant 1.000000e+00 : f32
    %176 = vector.broadcast %cst_55 : f32 to vector<8x32xf32>
    %177 = arith.addf %176, %175 : vector<8x32xf32>
    %178 = arith.divf %176, %177 : vector<8x32xf32>
    %179 = arith.mulf %178, %143 : vector<8x32xf32>
    %180 = arith.addf %172, %179 : vector<8x32xf32>
    %181 = vector.extract_strided_slice %163 {offsets = [0, 96], sizes = [8, 32], strides = [1, 1]} : vector<8x128xf32> to vector<8x32xf32>
    %182 = arith.negf %181 : vector<8x32xf32>
    %183 = math.exp %182 : vector<8x32xf32>
    %cst_56 = arith.constant 1.000000e+00 : f32
    %184 = vector.broadcast %cst_56 : f32 to vector<8x32xf32>
    %185 = arith.addf %184, %183 : vector<8x32xf32>
    %186 = arith.divf %184, %185 : vector<8x32xf32>
    %187 = math.tanh %180 : vector<8x32xf32>
    %188 = arith.mulf %186, %187 : vector<8x32xf32>
    %189 = arith.truncf %188 : vector<8x32xf32> to vector<8x32xbf16>
    %c0_57 = arith.constant 0 : index
    %c4_58 = arith.constant 4 : index
    %c0_59 = arith.constant 0 : index
    %190 = vector.load %arg8[%c0_57, %c4_58, %c0_59] : memref<8x8x32xbf16, #tpu.memory_space<vmem>>, vector<8x1x32xbf16>
    %191 = vector.shape_cast %190 : vector<8x1x32xbf16> to vector<8x32xbf16>
    %192 = vector.shape_cast %189 : vector<8x32xbf16> to vector<8x1x32xbf16>
    tpu.vector_store %arg8[%c0_57, %c4_58, %c0_59], %192 {strides = array<i32>} : memref<8x8x32xbf16, #tpu.memory_space<vmem>>, vector<8x1x32xbf16>,
    %c0_60 = arith.constant 0 : index
    %c5 = arith.constant 5 : index
    %c0_61 = arith.constant 0 : index
    %193 = vector.load %arg2[%c0_60, %c5, %c0_61] : memref<8x8x32xbf16, #tpu.memory_space<vmem>>, vector<8x1x32xbf16>
    %194 = vector.shape_cast %193 : vector<8x1x32xbf16> to vector<8x32xbf16>
    %cst_62 = arith.constant dense<0.000000e+00> : vector<8x128xf32>
    %195 = tpu.matmul %194, %3, %cst_62 {dimension_numbers = #tpu.dot_dimension_numbers<[1], [0], [0], [1], [0, 0, 1, 1], [], []>} : vector<8x32xbf16>, vector<32x128xbf16>, vector<8x128xf32> -> vector<8x128xf32>
    %196 = arith.truncf %188 : vector<8x32xf32> to vector<8x32xbf16>
    %cst_63 = arith.constant dense<0.000000e+00> : vector<8x128xf32>
    %197 = tpu.matmul %196, %4, %cst_63 {dimension_numbers = #tpu.dot_dimension_numbers<[1], [0], [0], [1], [0, 0, 1, 1], [], []>} : vector<8x32xbf16>, vector<32x128xbf16>, vector<8x128xf32> -> vector<8x128xf32>
    %198 = arith.addf %195, %197 : vector<8x128xf32>
    %199 = vector.broadcast %5 : vector<1x128xf32> to vector<8x128xf32>
    %200 = arith.addf %198, %199 : vector<8x128xf32>
    %201 = vector.extract_strided_slice %200 {offsets = [0, 0], sizes = [8, 32], strides = [1, 1]} : vector<8x128xf32> to vector<8x32xf32>
    %202 = arith.negf %201 : vector<8x32xf32>
    %203 = math.exp %202 : vector<8x32xf32>
    %cst_64 = arith.constant 1.000000e+00 : f32
    %204 = vector.broadcast %cst_64 : f32 to vector<8x32xf32>
    %205 = arith.addf %204, %203 : vector<8x32xf32>
    %206 = arith.divf %204, %205 : vector<8x32xf32>
    %207 = vector.extract_strided_slice %200 {offsets = [0, 64], sizes = [8, 32], strides = [1, 1]} : vector<8x128xf32> to vector<8x32xf32>
    %208 = math.tanh %207 : vector<8x32xf32>
    %209 = arith.mulf %206, %208 : vector<8x32xf32>
    %210 = vector.extract_strided_slice %200 {offsets = [0, 32], sizes = [8, 32], strides = [1, 1]} : vector<8x128xf32> to vector<8x32xf32>
    %211 = arith.negf %210 : vector<8x32xf32>
    %212 = math.exp %211 : vector<8x32xf32>
    %cst_65 = arith.constant 1.000000e+00 : f32
    %213 = vector.broadcast %cst_65 : f32 to vector<8x32xf32>
    %214 = arith.addf %213, %212 : vector<8x32xf32>
    %215 = arith.divf %213, %214 : vector<8x32xf32>
    %216 = arith.mulf %215, %180 : vector<8x32xf32>
    %217 = arith.addf %209, %216 : vector<8x32xf32>
    %218 = vector.extract_strided_slice %200 {offsets = [0, 96], sizes = [8, 32], strides = [1, 1]} : vector<8x128xf32> to vector<8x32xf32>
    %219 = arith.negf %218 : vector<8x32xf32>
    %220 = math.exp %219 : vector<8x32xf32>
    %cst_66 = arith.constant 1.000000e+00 : f32
    %221 = vector.broadcast %cst_66 : f32 to vector<8x32xf32>
    %222 = arith.addf %221, %220 : vector<8x32xf32>
    %223 = arith.divf %221, %222 : vector<8x32xf32>
    %224 = math.tanh %217 : vector<8x32xf32>
    %225 = arith.mulf %223, %224 : vector<8x32xf32>
    %226 = arith.truncf %225 : vector<8x32xf32> to vector<8x32xbf16>
    %c0_67 = arith.constant 0 : index
    %c5_68 = arith.constant 5 : index
    %c0_69 = arith.constant 0 : index
    %227 = vector.load %arg8[%c0_67, %c5_68, %c0_69] : memref<8x8x32xbf16, #tpu.memory_space<vmem>>, vector<8x1x32xbf16>
    %228 = vector.shape_cast %227 : vector<8x1x32xbf16> to vector<8x32xbf16>
    %229 = vector.shape_cast %226 : vector<8x32xbf16> to vector<8x1x32xbf16>
    tpu.vector_store %arg8[%c0_67, %c5_68, %c0_69], %229 {strides = array<i32>} : memref<8x8x32xbf16, #tpu.memory_space<vmem>>, vector<8x1x32xbf16>,
    %c0_70 = arith.constant 0 : index
    %c6 = arith.constant 6 : index
    %c0_71 = arith.constant 0 : index
    %230 = vector.load %arg2[%c0_70, %c6, %c0_71] : memref<8x8x32xbf16, #tpu.memory_space<vmem>>, vector<8x1x32xbf16>
    %231 = vector.shape_cast %230 : vector<8x1x32xbf16> to vector<8x32xbf16>
    %cst_72 = arith.constant dense<0.000000e+00> : vector<8x128xf32>
    %232 = tpu.matmul %231, %3, %cst_72 {dimension_numbers = #tpu.dot_dimension_numbers<[1], [0], [0], [1], [0, 0, 1, 1], [], []>} : vector<8x32xbf16>, vector<32x128xbf16>, vector<8x128xf32> -> vector<8x128xf32>
    %233 = arith.truncf %225 : vector<8x32xf32> to vector<8x32xbf16>
    %cst_73 = arith.constant dense<0.000000e+00> : vector<8x128xf32>
    %234 = tpu.matmul %233, %4, %cst_73 {dimension_numbers = #tpu.dot_dimension_numbers<[1], [0], [0], [1], [0, 0, 1, 1], [], []>} : vector<8x32xbf16>, vector<32x128xbf16>, vector<8x128xf32> -> vector<8x128xf32>
    %235 = arith.addf %232, %234 : vector<8x128xf32>
    %236 = vector.broadcast %5 : vector<1x128xf32> to vector<8x128xf32>
    %237 = arith.addf %235, %236 : vector<8x128xf32>
    %238 = vector.extract_strided_slice %237 {offsets = [0, 0], sizes = [8, 32], strides = [1, 1]} : vector<8x128xf32> to vector<8x32xf32>
    %239 = arith.negf %238 : vector<8x32xf32>
    %240 = math.exp %239 : vector<8x32xf32>
    %cst_74 = arith.constant 1.000000e+00 : f32
    %241 = vector.broadcast %cst_74 : f32 to vector<8x32xf32>
    %242 = arith.addf %241, %240 : vector<8x32xf32>
    %243 = arith.divf %241, %242 : vector<8x32xf32>
    %244 = vector.extract_strided_slice %237 {offsets = [0, 64], sizes = [8, 32], strides = [1, 1]} : vector<8x128xf32> to vector<8x32xf32>
    %245 = math.tanh %244 : vector<8x32xf32>
    %246 = arith.mulf %243, %245 : vector<8x32xf32>
    %247 = vector.extract_strided_slice %237 {offsets = [0, 32], sizes = [8, 32], strides = [1, 1]} : vector<8x128xf32> to vector<8x32xf32>
    %248 = arith.negf %247 : vector<8x32xf32>
    %249 = math.exp %248 : vector<8x32xf32>
    %cst_75 = arith.constant 1.000000e+00 : f32
    %250 = vector.broadcast %cst_75 : f32 to vector<8x32xf32>
    %251 = arith.addf %250, %249 : vector<8x32xf32>
    %252 = arith.divf %250, %251 : vector<8x32xf32>
    %253 = arith.mulf %252, %217 : vector<8x32xf32>
    %254 = arith.addf %246, %253 : vector<8x32xf32>
    %255 = vector.extract_strided_slice %237 {offsets = [0, 96], sizes = [8, 32], strides = [1, 1]} : vector<8x128xf32> to vector<8x32xf32>
    %256 = arith.negf %255 : vector<8x32xf32>
    %257 = math.exp %256 : vector<8x32xf32>
    %cst_76 = arith.constant 1.000000e+00 : f32
    %258 = vector.broadcast %cst_76 : f32 to vector<8x32xf32>
    %259 = arith.addf %258, %257 : vector<8x32xf32>
    %260 = arith.divf %258, %259 : vector<8x32xf32>
    %261 = math.tanh %254 : vector<8x32xf32>
    %262 = arith.mulf %260, %261 : vector<8x32xf32>
    %263 = arith.truncf %262 : vector<8x32xf32> to vector<8x32xbf16>
    %c0_77 = arith.constant 0 : index
    %c6_78 = arith.constant 6 : index
    %c0_79 = arith.constant 0 : index
    %264 = vector.load %arg8[%c0_77, %c6_78, %c0_79] : memref<8x8x32xbf16, #tpu.memory_space<vmem>>, vector<8x1x32xbf16>
    %265 = vector.shape_cast %264 : vector<8x1x32xbf16> to vector<8x32xbf16>
    %266 = vector.shape_cast %263 : vector<8x32xbf16> to vector<8x1x32xbf16>
    tpu.vector_store %arg8[%c0_77, %c6_78, %c0_79], %266 {strides = array<i32>} : memref<8x8x32xbf16, #tpu.memory_space<vmem>>, vector<8x1x32xbf16>,
    %c0_80 = arith.constant 0 : index
    %c7 = arith.constant 7 : index
    %c0_81 = arith.constant 0 : index
    %267 = vector.load %arg2[%c0_80, %c7, %c0_81] : memref<8x8x32xbf16, #tpu.memory_space<vmem>>, vector<8x1x32xbf16>
    %268 = vector.shape_cast %267 : vector<8x1x32xbf16> to vector<8x32xbf16>
    %cst_82 = arith.constant dense<0.000000e+00> : vector<8x128xf32>
    %269 = tpu.matmul %268, %3, %cst_82 {dimension_numbers = #tpu.dot_dimension_numbers<[1], [0], [0], [1], [0, 0, 1, 1], [], []>} : vector<8x32xbf16>, vector<32x128xbf16>, vector<8x128xf32> -> vector<8x128xf32>
    %270 = arith.truncf %262 : vector<8x32xf32> to vector<8x32xbf16>
    %cst_83 = arith.constant dense<0.000000e+00> : vector<8x128xf32>
    %271 = tpu.matmul %270, %4, %cst_83 {dimension_numbers = #tpu.dot_dimension_numbers<[1], [0], [0], [1], [0, 0, 1, 1], [], []>} : vector<8x32xbf16>, vector<32x128xbf16>, vector<8x128xf32> -> vector<8x128xf32>
    %272 = arith.addf %269, %271 : vector<8x128xf32>
    %273 = vector.broadcast %5 : vector<1x128xf32> to vector<8x128xf32>
    %274 = arith.addf %272, %273 : vector<8x128xf32>
    %275 = vector.extract_strided_slice %274 {offsets = [0, 0], sizes = [8, 32], strides = [1, 1]} : vector<8x128xf32> to vector<8x32xf32>
    %276 = arith.negf %275 : vector<8x32xf32>
    %277 = math.exp %276 : vector<8x32xf32>
    %cst_84 = arith.constant 1.000000e+00 : f32
    %278 = vector.broadcast %cst_84 : f32 to vector<8x32xf32>
    %279 = arith.addf %278, %277 : vector<8x32xf32>
    %280 = arith.divf %278, %279 : vector<8x32xf32>
    %281 = vector.extract_strided_slice %274 {offsets = [0, 64], sizes = [8, 32], strides = [1, 1]} : vector<8x128xf32> to vector<8x32xf32>
    %282 = math.tanh %281 : vector<8x32xf32>
    %283 = arith.mulf %280, %282 : vector<8x32xf32>
    %284 = vector.extract_strided_slice %274 {offsets = [0, 32], sizes = [8, 32], strides = [1, 1]} : vector<8x128xf32> to vector<8x32xf32>
    %285 = arith.negf %284 : vector<8x32xf32>
    %286 = math.exp %285 : vector<8x32xf32>
    %cst_85 = arith.constant 1.000000e+00 : f32
    %287 = vector.broadcast %cst_85 : f32 to vector<8x32xf32>
    %288 = arith.addf %287, %286 : vector<8x32xf32>
    %289 = arith.divf %287, %288 : vector<8x32xf32>
    %290 = arith.mulf %289, %254 : vector<8x32xf32>
    %291 = arith.addf %283, %290 : vector<8x32xf32>
    %292 = vector.extract_strided_slice %274 {offsets = [0, 96], sizes = [8, 32], strides = [1, 1]} : vector<8x128xf32> to vector<8x32xf32>
    %293 = arith.negf %292 : vector<8x32xf32>
    %294 = math.exp %293 : vector<8x32xf32>
    %cst_86 = arith.constant 1.000000e+00 : f32
    %295 = vector.broadcast %cst_86 : f32 to vector<8x32xf32>
    %296 = arith.addf %295, %294 : vector<8x32xf32>
    %297 = arith.divf %295, %296 : vector<8x32xf32>
    %298 = math.tanh %291 : vector<8x32xf32>
    %299 = arith.mulf %297, %298 : vector<8x32xf32>
    %300 = arith.truncf %299 : vector<8x32xf32> to vector<8x32xbf16>
    %c0_87 = arith.constant 0 : index
    %c7_88 = arith.constant 7 : index
    %c0_89 = arith.constant 0 : index
    %301 = vector.load %arg8[%c0_87, %c7_88, %c0_89] : memref<8x8x32xbf16, #tpu.memory_space<vmem>>, vector<8x1x32xbf16>
    %302 = vector.shape_cast %301 : vector<8x1x32xbf16> to vector<8x32xbf16>
    %303 = vector.shape_cast %300 : vector<8x32xbf16> to vector<8x1x32xbf16>
    tpu.vector_store %arg8[%c0_87, %c7_88, %c0_89], %303 {strides = array<i32>} : memref<8x8x32xbf16, #tpu.memory_space<vmem>>, vector<8x1x32xbf16>,
    %c0_90 = arith.constant 0 : index
    %c0_91 = arith.constant 0 : index
    %304 = vector.load %arg11[%c0_90, %c0_91] : memref<8x32xf32, #tpu.memory_space<vmem>>, vector<8x32xf32>
    tpu.vector_store %arg11[%c0_90, %c0_91], %299 {strides = array<i32>} : memref<8x32xf32, #tpu.memory_space<vmem>>, vector<8x32xf32>,
    %c0_92 = arith.constant 0 : index
    %c0_93 = arith.constant 0 : index
    %305 = vector.load %arg12[%c0_92, %c0_93] : memref<8x32xf32, #tpu.memory_space<vmem>>, vector<8x32xf32>
    tpu.vector_store %arg12[%c0_92, %c0_93], %291 {strides = array<i32>} : memref<8x32xf32, #tpu.memory_space<vmem>>, vector<8x32xf32>,
    %c0_i32_94 = arith.constant 0 : i32
    %306 = arith.cmpi eq, %arg1, %c0_i32_94 : i32
    %307 = arith.extui %306 : i1 to i32
    %c0_i32_95 = arith.constant 0 : i32
    %308 = arith.cmpi ne, %307, %c0_i32_95 : i32
    scf.if %308 {
      %c0_96 = arith.constant 0 : index
      %c0_97 = arith.constant 0 : index
      %309 = vector.load %arg11[%c0_96, %c0_97] : memref<8x32xf32, #tpu.memory_space<vmem>>, vector<8x32xf32>
      %c0_98 = arith.constant 0 : index
      %c0_99 = arith.constant 0 : index
      %310 = vector.load %arg9[%c0_98, %c0_99] : memref<8x32xf32, #tpu.memory_space<vmem>>, vector<8x32xf32>
      tpu.vector_store %arg9[%c0_98, %c0_99], %309 {strides = array<i32>} : memref<8x32xf32, #tpu.memory_space<vmem>>, vector<8x32xf32>,
      %c0_100 = arith.constant 0 : index
      %c0_101 = arith.constant 0 : index
      %311 = vector.load %arg12[%c0_100, %c0_101] : memref<8x32xf32, #tpu.memory_space<vmem>>, vector<8x32xf32>
      %c0_102 = arith.constant 0 : index
      %c0_103 = arith.constant 0 : index
      %312 = vector.load %arg10[%c0_102, %c0_103] : memref<8x32xf32, #tpu.memory_space<vmem>>, vector<8x32xf32>
      tpu.vector_store %arg10[%c0_102, %c0_103], %311 {strides = array<i32>} : memref<8x32xf32, #tpu.memory_space<vmem>>, vector<8x32xf32>,
    } else {
    }
    return
  }
  func.func @transform_0(%arg0: i32, %arg1: i32) -> (i32, i32, i32) {
    %c0_i32 = arith.constant 0 : i32
    %c0_i32_0 = arith.constant 0 : i32
    return %arg0, %arg1, %c0_i32 : i32, i32, i32
  }
  func.func @transform_1(%arg0: i32, %arg1: i32) -> (i32, i32) {
    %c0_i32 = arith.constant 0 : i32
    %c0_i32_0 = arith.constant 0 : i32
    return %arg0, %c0_i32 : i32, i32
  }
  func.func @transform_2(%arg0: i32, %arg1: i32) -> (i32, i32) {
    %c0_i32 = arith.constant 0 : i32
    %c0_i32_0 = arith.constant 0 : i32
    return %arg0, %c0_i32 : i32, i32
  }
  func.func @transform_3(%arg0: i32, %arg1: i32) -> (i32, i32) {
    %c0_i32 = arith.constant 0 : i32
    %c0_i32_0 = arith.constant 0 : i32
    %c0_i32_1 = arith.constant 0 : i32
    return %c0_i32, %c0_i32_0 : i32, i32
  }
  func.func @transform_4(%arg0: i32, %arg1: i32) -> (i32, i32) {
    %c0_i32 = arith.constant 0 : i32
    %c0_i32_0 = arith.constant 0 : i32
    %c0_i32_1 = arith.constant 0 : i32
    return %c0_i32, %c0_i32_0 : i32, i32
  }
  func.func @transform_5(%arg0: i32, %arg1: i32) -> (i32, i32) {
    %c0_i32 = arith.constant 0 : i32
    %c0_i32_0 = arith.constant 0 : i32
    %c0_i32_1 = arith.constant 0 : i32
    return %c0_i32, %c0_i32_0 : i32, i32
  }
  func.func @transform_6(%arg0: i32, %arg1: i32) -> (i32, i32, i32) {
    %c0_i32 = arith.constant 0 : i32
    %c0_i32_0 = arith.constant 0 : i32
    return %arg0, %arg1, %c0_i32 : i32, i32, i32
  }
  func.func @transform_7(%arg0: i32, %arg1: i32) -> (i32, i32) {
    %c0_i32 = arith.constant 0 : i32
    %c0_i32_0 = arith.constant 0 : i32
    return %arg0, %c0_i32 : i32, i32
  }
  func.func @transform_8(%arg0: i32, %arg1: i32) -> (i32, i32) {
    %c0_i32 = arith.constant 0 : i32
    %c0_i32_0 = arith.constant 0 : i32
    return %arg0, %c0_i32 : i32, i32
  }
}

module attributes {stable_mosaic.version = 11 : i64} {
  func.func @_lstm_recurrence_kernel(%arg0: i32, %arg1: i32, %arg2: memref<8x8x32xbf16, #tpu.memory_space<vmem>>, %arg3: memref<8x32xf32, #tpu.memory_space<vmem>>, %arg4: memref<8x32xf32, #tpu.memory_space<vmem>>, %arg5: memref<32x128xbf16, #tpu.memory_space<vmem>>, %arg6: memref<32x128xbf16, #tpu.memory_space<vmem>>, %arg7: memref<1x128xf32, #tpu.memory_space<vmem>>, %arg8: memref<8x8x32xbf16, #tpu.memory_space<vmem>>, %arg9: memref<8x32xf32, #tpu.memory_space<vmem>>, %arg10: memref<8x32xf32, #tpu.memory_space<vmem>>, %arg11: memref<8x32xf32, #tpu.memory_space<vmem>>, %arg12: memref<8x32xf32, #tpu.memory_space<vmem>>) attributes {dimension_semantics = [#tpu.dimension_semantics<parallel>, #tpu.dimension_semantics<arbitrary>], iteration_bounds = array<i64: 1, 1>, scalar_prefetch = 0 : i64, scratch_operands = 2 : i64, tpu.core_type = #tpu.core_type<tc>, window_params = [{transform_indices = @transform_0, window_bounds = array<i64: 8, 8, 32>}, {transform_indices = @transform_1, window_bounds = array<i64: 8, 32>}, {transform_indices = @transform_2, window_bounds = array<i64: 8, 32>}, {pipeline_mode = #tpu.pipeline_mode<synchronous>, transform_indices = @transform_3, window_bounds = array<i64: 32, 128>}, {pipeline_mode = #tpu.pipeline_mode<synchronous>, transform_indices = @transform_4, window_bounds = array<i64: 32, 128>}, {pipeline_mode = #tpu.pipeline_mode<synchronous>, transform_indices = @transform_5, window_bounds = array<i64: 1, 128>}, {transform_indices = @transform_6, window_bounds = array<i64: 8, 8, 32>}, {transform_indices = @transform_7, window_bounds = array<i64: 8, 32>}, {transform_indices = @transform_8, window_bounds = array<i64: 8, 32>}]} {
    %c0_i32 = arith.constant 0 : i32
    %0 = arith.cmpi eq, %arg1, %c0_i32 : i32
    %1 = arith.extui %0 : i1 to i32
    %c0_i32_0 = arith.constant 0 : i32
    %2 = arith.cmpi ne, %1, %c0_i32_0 : i32
    scf.if %2 {
      %c0_96 = arith.constant 0 : index
      %c0_97 = arith.constant 0 : index
      %309 = vector.load %arg3[%c0_96, %c0_97] : memref<8x32xf32, #tpu.memory_space<vmem>>, vector<8x32xf32>
      %c0_98 = arith.constant 0 : index
      %c0_99 = arith.constant 0 : index
      %310 = vector.load %arg11[%c0_98, %c0_99] : memref<8x32xf32, #tpu.memory_space<vmem>>, vector<8x32xf32>
      tpu.vector_store %arg11[%c0_98, %c0_99], %309 {strides = array<i32>} : memref<8x32xf32, #tpu.memory_space<vmem>>, vector<8x32xf32>,
      %c0_100 = arith.constant 0 : index
      %c0_101 = arith.constant 0 : index
      %311 = vector.load %arg4[%c0_100, %c0_101] : memref<8x32xf32, #tpu.memory_space<vmem>>, vector<8x32xf32>
      %c0_102 = arith.constant 0 : index
      %c0_103 = arith.constant 0 : index
      %312 = vector.load %arg12[%c0_102, %c0_103] : memref<8x32xf32, #tpu.memory_space<vmem>>, vector<8x32xf32>
      tpu.vector_store %arg12[%c0_102, %c0_103], %311 {strides = array<i32>} : memref<8x32xf32, #tpu.memory_space<vmem>>, vector<8x32xf32>,
    } else {
    }
    %c0 = arith.constant 0 : index
    %c0_1 = arith.constant 0 : index
    %3 = vector.load %arg5[%c0, %c0_1] : memref<32x128xbf16, #tpu.memory_space<vmem>>, vector<32x128xbf16>
    %c0_2 = arith.constant 0 : index
    %c0_3 = arith.constant 0 : index
    %4 = vector.load %arg6[%c0_2, %c0_3] : memref<32x128xbf16, #tpu.memory_space<vmem>>, vector<32x128xbf16>
    %c0_4 = arith.constant 0 : index
    %c0_5 = arith.constant 0 : index
    %5 = vector.load %arg7[%c0_4, %c0_5] : memref<1x128xf32, #tpu.memory_space<vmem>>, vector<1x128xf32>
    %c0_6 = arith.constant 0 : index
    %c0_7 = arith.constant 0 : index
    %6 = vector.load %arg11[%c0_6, %c0_7] : memref<8x32xf32, #tpu.memory_space<vmem>>, vector<8x32xf32>
    %c0_8 = arith.constant 0 : index
    %c0_9 = arith.constant 0 : index
    %7 = vector.load %arg12[%c0_8, %c0_9] : memref<8x32xf32, #tpu.memory_space<vmem>>, vector<8x32xf32>
    %c0_10 = arith.constant 0 : index
    %c0_11 = arith.constant 0 : index
    %c0_12 = arith.constant 0 : index
    %8 = vector.load %arg2[%c0_10, %c0_11, %c0_12] : memref<8x8x32xbf16, #tpu.memory_space<vmem>>, vector<8x1x32xbf16>
    %9 = vector.shape_cast %8 : vector<8x1x32xbf16> to vector<8x32xbf16>
    %cst = arith.constant dense<0.000000e+00> : vector<8x128xf32>
    %10 = tpu.matmul %9, %3, %cst {dimension_numbers = #tpu.dot_dimension_numbers<[1], [0], [0], [1], [0, 0, 1, 1], [], []>} : vector<8x32xbf16>, vector<32x128xbf16>, vector<8x128xf32> -> vector<8x128xf32>
    %11 = arith.truncf %6 : vector<8x32xf32> to vector<8x32xbf16>
    %cst_13 = arith.constant dense<0.000000e+00> : vector<8x128xf32>
    %12 = tpu.matmul %11, %4, %cst_13 {dimension_numbers = #tpu.dot_dimension_numbers<[1], [0], [0], [1], [0, 0, 1, 1], [], []>} : vector<8x32xbf16>, vector<32x128xbf16>, vector<8x128xf32> -> vector<8x128xf32>
    %13 = arith.addf %10, %12 : vector<8x128xf32>
    %14 = vector.broadcast %5 : vector<1x128xf32> to vector<8x128xf32>
    %15 = arith.addf %13, %14 : vector<8x128xf32>
    %16 = vector.extract_strided_slice %15 {offsets = [0, 0], sizes = [8, 32], strides = [1, 1]} : vector<8x128xf32> to vector<8x32xf32>
    %17 = arith.negf %16 : vector<8x32xf32>
    %18 = math.exp %17 : vector<8x32xf32>
    %cst_14 = arith.constant 1.000000e+00 : f32
    %19 = vector.broadcast %cst_14 : f32 to vector<8x32xf32>
    %20 = arith.addf %19, %18 : vector<8x32xf32>
    %21 = arith.divf %19, %20 : vector<8x32xf32>
    %22 = vector.extract_strided_slice %15 {offsets = [0, 64], sizes = [8, 32], strides = [1, 1]} : vector<8x128xf32> to vector<8x32xf32>
    %23 = math.tanh %22 : vector<8x32xf32>
    %24 = arith.mulf %21, %23 : vector<8x32xf32>
    %25 = vector.extract_strided_slice %15 {offsets = [0, 32], sizes = [8, 32], strides = [1, 1]} : vector<8x128xf32> to vector<8x32xf32>
    %26 = arith.negf %25 : vector<8x32xf32>
    %27 = math.exp %26 : vector<8x32xf32>
    %cst_15 = arith.constant 1.000000e+00 : f32
    %28 = vector.broadcast %cst_15 : f32 to vector<8x32xf32>
    %29 = arith.addf %28, %27 : vector<8x32xf32>
    %30 = arith.divf %28, %29 : vector<8x32xf32>
    %31 = arith.mulf %30, %7 : vector<8x32xf32>
    %32 = arith.addf %24, %31 : vector<8x32xf32>
    %33 = vector.extract_strided_slice %15 {offsets = [0, 96], sizes = [8, 32], strides = [1, 1]} : vector<8x128xf32> to vector<8x32xf32>
    %34 = arith.negf %33 : vector<8x32xf32>
    %35 = math.exp %34 : vector<8x32xf32>
    %cst_16 = arith.constant 1.000000e+00 : f32
    %36 = vector.broadcast %cst_16 : f32 to vector<8x32xf32>
    %37 = arith.addf %36, %35 : vector<8x32xf32>
    %38 = arith.divf %36, %37 : vector<8x32xf32>
    %39 = math.tanh %32 : vector<8x32xf32>
    %40 = arith.mulf %38, %39 : vector<8x32xf32>
    %41 = arith.truncf %40 : vector<8x32xf32> to vector<8x32xbf16>
    %c0_17 = arith.constant 0 : index
    %c0_18 = arith.constant 0 : index
    %c0_19 = arith.constant 0 : index
    %42 = vector.load %arg8[%c0_17, %c0_18, %c0_19] : memref<8x8x32xbf16, #tpu.memory_space<vmem>>, vector<8x1x32xbf16>
    %43 = vector.shape_cast %42 : vector<8x1x32xbf16> to vector<8x32xbf16>
    %44 = vector.shape_cast %41 : vector<8x32xbf16> to vector<8x1x32xbf16>
    tpu.vector_store %arg8[%c0_17, %c0_18, %c0_19], %44 {strides = array<i32>} : memref<8x8x32xbf16, #tpu.memory_space<vmem>>, vector<8x1x32xbf16>,
    %c0_20 = arith.constant 0 : index
    %c1 = arith.constant 1 : index
    %c0_21 = arith.constant 0 : index
    %45 = vector.load %arg2[%c0_20, %c1, %c0_21] : memref<8x8x32xbf16, #tpu.memory_space<vmem>>, vector<8x1x32xbf16>
    %46 = vector.shape_cast %45 : vector<8x1x32xbf16> to vector<8x32xbf16>
    %cst_22 = arith.constant dense<0.000000e+00> : vector<8x128xf32>
    %47 = tpu.matmul %46, %3, %cst_22 {dimension_numbers = #tpu.dot_dimension_numbers<[1], [0], [0], [1], [0, 0, 1, 1], [], []>} : vector<8x32xbf16>, vector<32x128xbf16>, vector<8x128xf32> -> vector<8x128xf32>
    %48 = arith.truncf %40 : vector<8x32xf32> to vector<8x32xbf16>
    %cst_23 = arith.constant dense<0.000000e+00> : vector<8x128xf32>
    %49 = tpu.matmul %48, %4, %cst_23 {dimension_numbers = #tpu.dot_dimension_numbers<[1], [0], [0], [1], [0, 0, 1, 1], [], []>} : vector<8x32xbf16>, vector<32x128xbf16>, vector<8x128xf32> -> vector<8x128xf32>
    %50 = arith.addf %47, %49 : vector<8x128xf32>
    %51 = vector.broadcast %5 : vector<1x128xf32> to vector<8x128xf32>
    %52 = arith.addf %50, %51 : vector<8x128xf32>
    %53 = vector.extract_strided_slice %52 {offsets = [0, 0], sizes = [8, 32], strides = [1, 1]} : vector<8x128xf32> to vector<8x32xf32>
    %54 = arith.negf %53 : vector<8x32xf32>
    %55 = math.exp %54 : vector<8x32xf32>
    %cst_24 = arith.constant 1.000000e+00 : f32
    %56 = vector.broadcast %cst_24 : f32 to vector<8x32xf32>
    %57 = arith.addf %56, %55 : vector<8x32xf32>
    %58 = arith.divf %56, %57 : vector<8x32xf32>
    %59 = vector.extract_strided_slice %52 {offsets = [0, 64], sizes = [8, 32], strides = [1, 1]} : vector<8x128xf32> to vector<8x32xf32>
    %60 = math.tanh %59 : vector<8x32xf32>
    %61 = arith.mulf %58, %60 : vector<8x32xf32>
    %62 = vector.extract_strided_slice %52 {offsets = [0, 32], sizes = [8, 32], strides = [1, 1]} : vector<8x128xf32> to vector<8x32xf32>
    %63 = arith.negf %62 : vector<8x32xf32>
    %64 = math.exp %63 : vector<8x32xf32>
    %cst_25 = arith.constant 1.000000e+00 : f32
    %65 = vector.broadcast %cst_25 : f32 to vector<8x32xf32>
    %66 = arith.addf %65, %64 : vector<8x32xf32>
    %67 = arith.divf %65, %66 : vector<8x32xf32>
    %68 = arith.mulf %67, %32 : vector<8x32xf32>
    %69 = arith.addf %61, %68 : vector<8x32xf32>
    %70 = vector.extract_strided_slice %52 {offsets = [0, 96], sizes = [8, 32], strides = [1, 1]} : vector<8x128xf32> to vector<8x32xf32>
    %71 = arith.negf %70 : vector<8x32xf32>
    %72 = math.exp %71 : vector<8x32xf32>
    %cst_26 = arith.constant 1.000000e+00 : f32
    %73 = vector.broadcast %cst_26 : f32 to vector<8x32xf32>
    %74 = arith.addf %73, %72 : vector<8x32xf32>
    %75 = arith.divf %73, %74 : vector<8x32xf32>
    %76 = math.tanh %69 : vector<8x32xf32>
    %77 = arith.mulf %75, %76 : vector<8x32xf32>
    %78 = arith.truncf %77 : vector<8x32xf32> to vector<8x32xbf16>
    %c0_27 = arith.constant 0 : index
    %c1_28 = arith.constant 1 : index
    %c0_29 = arith.constant 0 : index
    %79 = vector.load %arg8[%c0_27, %c1_28, %c0_29] : memref<8x8x32xbf16, #tpu.memory_space<vmem>>, vector<8x1x32xbf16>
    %80 = vector.shape_cast %79 : vector<8x1x32xbf16> to vector<8x32xbf16>
    %81 = vector.shape_cast %78 : vector<8x32xbf16> to vector<8x1x32xbf16>
    tpu.vector_store %arg8[%c0_27, %c1_28, %c0_29], %81 {strides = array<i32>} : memref<8x8x32xbf16, #tpu.memory_space<vmem>>, vector<8x1x32xbf16>,
    %c0_30 = arith.constant 0 : index
    %c2 = arith.constant 2 : index
    %c0_31 = arith.constant 0 : index
    %82 = vector.load %arg2[%c0_30, %c2, %c0_31] : memref<8x8x32xbf16, #tpu.memory_space<vmem>>, vector<8x1x32xbf16>
    %83 = vector.shape_cast %82 : vector<8x1x32xbf16> to vector<8x32xbf16>
    %cst_32 = arith.constant dense<0.000000e+00> : vector<8x128xf32>
    %84 = tpu.matmul %83, %3, %cst_32 {dimension_numbers = #tpu.dot_dimension_numbers<[1], [0], [0], [1], [0, 0, 1, 1], [], []>} : vector<8x32xbf16>, vector<32x128xbf16>, vector<8x128xf32> -> vector<8x128xf32>
    %85 = arith.truncf %77 : vector<8x32xf32> to vector<8x32xbf16>
    %cst_33 = arith.constant dense<0.000000e+00> : vector<8x128xf32>
    %86 = tpu.matmul %85, %4, %cst_33 {dimension_numbers = #tpu.dot_dimension_numbers<[1], [0], [0], [1], [0, 0, 1, 1], [], []>} : vector<8x32xbf16>, vector<32x128xbf16>, vector<8x128xf32> -> vector<8x128xf32>
    %87 = arith.addf %84, %86 : vector<8x128xf32>
    %88 = vector.broadcast %5 : vector<1x128xf32> to vector<8x128xf32>
    %89 = arith.addf %87, %88 : vector<8x128xf32>
    %90 = vector.extract_strided_slice %89 {offsets = [0, 0], sizes = [8, 32], strides = [1, 1]} : vector<8x128xf32> to vector<8x32xf32>
    %91 = arith.negf %90 : vector<8x32xf32>
    %92 = math.exp %91 : vector<8x32xf32>
    %cst_34 = arith.constant 1.000000e+00 : f32
    %93 = vector.broadcast %cst_34 : f32 to vector<8x32xf32>
    %94 = arith.addf %93, %92 : vector<8x32xf32>
    %95 = arith.divf %93, %94 : vector<8x32xf32>
    %96 = vector.extract_strided_slice %89 {offsets = [0, 64], sizes = [8, 32], strides = [1, 1]} : vector<8x128xf32> to vector<8x32xf32>
    %97 = math.tanh %96 : vector<8x32xf32>
    %98 = arith.mulf %95, %97 : vector<8x32xf32>
    %99 = vector.extract_strided_slice %89 {offsets = [0, 32], sizes = [8, 32], strides = [1, 1]} : vector<8x128xf32> to vector<8x32xf32>
    %100 = arith.negf %99 : vector<8x32xf32>
    %101 = math.exp %100 : vector<8x32xf32>
    %cst_35 = arith.constant 1.000000e+00 : f32
    %102 = vector.broadcast %cst_35 : f32 to vector<8x32xf32>
    %103 = arith.addf %102, %101 : vector<8x32xf32>
    %104 = arith.divf %102, %103 : vector<8x32xf32>
    %105 = arith.mulf %104, %69 : vector<8x32xf32>
    %106 = arith.addf %98, %105 : vector<8x32xf32>
    %107 = vector.extract_strided_slice %89 {offsets = [0, 96], sizes = [8, 32], strides = [1, 1]} : vector<8x128xf32> to vector<8x32xf32>
    %108 = arith.negf %107 : vector<8x32xf32>
    %109 = math.exp %108 : vector<8x32xf32>
    %cst_36 = arith.constant 1.000000e+00 : f32
    %110 = vector.broadcast %cst_36 : f32 to vector<8x32xf32>
    %111 = arith.addf %110, %109 : vector<8x32xf32>
    %112 = arith.divf %110, %111 : vector<8x32xf32>
    %113 = math.tanh %106 : vector<8x32xf32>
    %114 = arith.mulf %112, %113 : vector<8x32xf32>
    %115 = arith.truncf %114 : vector<8x32xf32> to vector<8x32xbf16>
    %c0_37 = arith.constant 0 : index
    %c2_38 = arith.constant 2 : index
    %c0_39 = arith.constant 0 : index
    %116 = vector.load %arg8[%c0_37, %c2_38, %c0_39] : memref<8x8x32xbf16, #tpu.memory_space<vmem>>, vector<8x1x32xbf16>
    %117 = vector.shape_cast %116 : vector<8x1x32xbf16> to vector<8x32xbf16>
    %118 = vector.shape_cast %115 : vector<8x32xbf16> to vector<8x1x32xbf16>
    tpu.vector_store %arg8[%c0_37, %c2_38, %c0_39], %118 {strides = array<i32>} : memref<8x8x32xbf16, #tpu.memory_space<vmem>>, vector<8x1x32xbf16>,
    %c0_40 = arith.constant 0 : index
    %c3 = arith.constant 3 : index
    %c0_41 = arith.constant 0 : index
    %119 = vector.load %arg2[%c0_40, %c3, %c0_41] : memref<8x8x32xbf16, #tpu.memory_space<vmem>>, vector<8x1x32xbf16>
    %120 = vector.shape_cast %119 : vector<8x1x32xbf16> to vector<8x32xbf16>
    %cst_42 = arith.constant dense<0.000000e+00> : vector<8x128xf32>
    %121 = tpu.matmul %120, %3, %cst_42 {dimension_numbers = #tpu.dot_dimension_numbers<[1], [0], [0], [1], [0, 0, 1, 1], [], []>} : vector<8x32xbf16>, vector<32x128xbf16>, vector<8x128xf32> -> vector<8x128xf32>
    %122 = arith.truncf %114 : vector<8x32xf32> to vector<8x32xbf16>
    %cst_43 = arith.constant dense<0.000000e+00> : vector<8x128xf32>
    %123 = tpu.matmul %122, %4, %cst_43 {dimension_numbers = #tpu.dot_dimension_numbers<[1], [0], [0], [1], [0, 0, 1, 1], [], []>} : vector<8x32xbf16>, vector<32x128xbf16>, vector<8x128xf32> -> vector<8x128xf32>
    %124 = arith.addf %121, %123 : vector<8x128xf32>
    %125 = vector.broadcast %5 : vector<1x128xf32> to vector<8x128xf32>
    %126 = arith.addf %124, %125 : vector<8x128xf32>
    %127 = vector.extract_strided_slice %126 {offsets = [0, 0], sizes = [8, 32], strides = [1, 1]} : vector<8x128xf32> to vector<8x32xf32>
    %128 = arith.negf %127 : vector<8x32xf32>
    %129 = math.exp %128 : vector<8x32xf32>
    %cst_44 = arith.constant 1.000000e+00 : f32
    %130 = vector.broadcast %cst_44 : f32 to vector<8x32xf32>
    %131 = arith.addf %130, %129 : vector<8x32xf32>
    %132 = arith.divf %130, %131 : vector<8x32xf32>
    %133 = vector.extract_strided_slice %126 {offsets = [0, 64], sizes = [8, 32], strides = [1, 1]} : vector<8x128xf32> to vector<8x32xf32>
    %134 = math.tanh %133 : vector<8x32xf32>
    %135 = arith.mulf %132, %134 : vector<8x32xf32>
    %136 = vector.extract_strided_slice %126 {offsets = [0, 32], sizes = [8, 32], strides = [1, 1]} : vector<8x128xf32> to vector<8x32xf32>
    %137 = arith.negf %136 : vector<8x32xf32>
    %138 = math.exp %137 : vector<8x32xf32>
    %cst_45 = arith.constant 1.000000e+00 : f32
    %139 = vector.broadcast %cst_45 : f32 to vector<8x32xf32>
    %140 = arith.addf %139, %138 : vector<8x32xf32>
    %141 = arith.divf %139, %140 : vector<8x32xf32>
    %142 = arith.mulf %141, %106 : vector<8x32xf32>
    %143 = arith.addf %135, %142 : vector<8x32xf32>
    %144 = vector.extract_strided_slice %126 {offsets = [0, 96], sizes = [8, 32], strides = [1, 1]} : vector<8x128xf32> to vector<8x32xf32>
    %145 = arith.negf %144 : vector<8x32xf32>
    %146 = math.exp %145 : vector<8x32xf32>
    %cst_46 = arith.constant 1.000000e+00 : f32
    %147 = vector.broadcast %cst_46 : f32 to vector<8x32xf32>
    %148 = arith.addf %147, %146 : vector<8x32xf32>
    %149 = arith.divf %147, %148 : vector<8x32xf32>
    %150 = math.tanh %143 : vector<8x32xf32>
    %151 = arith.mulf %149, %150 : vector<8x32xf32>
    %152 = arith.truncf %151 : vector<8x32xf32> to vector<8x32xbf16>
    %c0_47 = arith.constant 0 : index
    %c3_48 = arith.constant 3 : index
    %c0_49 = arith.constant 0 : index
    %153 = vector.load %arg8[%c0_47, %c3_48, %c0_49] : memref<8x8x32xbf16, #tpu.memory_space<vmem>>, vector<8x1x32xbf16>
    %154 = vector.shape_cast %153 : vector<8x1x32xbf16> to vector<8x32xbf16>
    %155 = vector.shape_cast %152 : vector<8x32xbf16> to vector<8x1x32xbf16>
    tpu.vector_store %arg8[%c0_47, %c3_48, %c0_49], %155 {strides = array<i32>} : memref<8x8x32xbf16, #tpu.memory_space<vmem>>, vector<8x1x32xbf16>,
    %c0_50 = arith.constant 0 : index
    %c4 = arith.constant 4 : index
    %c0_51 = arith.constant 0 : index
    %156 = vector.load %arg2[%c0_50, %c4, %c0_51] : memref<8x8x32xbf16, #tpu.memory_space<vmem>>, vector<8x1x32xbf16>
    %157 = vector.shape_cast %156 : vector<8x1x32xbf16> to vector<8x32xbf16>
    %cst_52 = arith.constant dense<0.000000e+00> : vector<8x128xf32>
    %158 = tpu.matmul %157, %3, %cst_52 {dimension_numbers = #tpu.dot_dimension_numbers<[1], [0], [0], [1], [0, 0, 1, 1], [], []>} : vector<8x32xbf16>, vector<32x128xbf16>, vector<8x128xf32> -> vector<8x128xf32>
    %159 = arith.truncf %151 : vector<8x32xf32> to vector<8x32xbf16>
    %cst_53 = arith.constant dense<0.000000e+00> : vector<8x128xf32>
    %160 = tpu.matmul %159, %4, %cst_53 {dimension_numbers = #tpu.dot_dimension_numbers<[1], [0], [0], [1], [0, 0, 1, 1], [], []>} : vector<8x32xbf16>, vector<32x128xbf16>, vector<8x128xf32> -> vector<8x128xf32>
    %161 = arith.addf %158, %160 : vector<8x128xf32>
    %162 = vector.broadcast %5 : vector<1x128xf32> to vector<8x128xf32>
    %163 = arith.addf %161, %162 : vector<8x128xf32>
    %164 = vector.extract_strided_slice %163 {offsets = [0, 0], sizes = [8, 32], strides = [1, 1]} : vector<8x128xf32> to vector<8x32xf32>
    %165 = arith.negf %164 : vector<8x32xf32>
    %166 = math.exp %165 : vector<8x32xf32>
    %cst_54 = arith.constant 1.000000e+00 : f32
    %167 = vector.broadcast %cst_54 : f32 to vector<8x32xf32>
    %168 = arith.addf %167, %166 : vector<8x32xf32>
    %169 = arith.divf %167, %168 : vector<8x32xf32>
    %170 = vector.extract_strided_slice %163 {offsets = [0, 64], sizes = [8, 32], strides = [1, 1]} : vector<8x128xf32> to vector<8x32xf32>
    %171 = math.tanh %170 : vector<8x32xf32>
    %172 = arith.mulf %169, %171 : vector<8x32xf32>
    %173 = vector.extract_strided_slice %163 {offsets = [0, 32], sizes = [8, 32], strides = [1, 1]} : vector<8x128xf32> to vector<8x32xf32>
    %174 = arith.negf %173 : vector<8x32xf32>
    %175 = math.exp %174 : vector<8x32xf32>
    %cst_55 = arith.constant 1.000000e+00 : f32
    %176 = vector.broadcast %cst_55 : f32 to vector<8x32xf32>
    %177 = arith.addf %176, %175 : vector<8x32xf32>
    %178 = arith.divf %176, %177 : vector<8x32xf32>
    %179 = arith.mulf %178, %143 : vector<8x32xf32>
    %180 = arith.addf %172, %179 : vector<8x32xf32>
    %181 = vector.extract_strided_slice %163 {offsets = [0, 96], sizes = [8, 32], strides = [1, 1]} : vector<8x128xf32> to vector<8x32xf32>
    %182 = arith.negf %181 : vector<8x32xf32>
    %183 = math.exp %182 : vector<8x32xf32>
    %cst_56 = arith.constant 1.000000e+00 : f32
    %184 = vector.broadcast %cst_56 : f32 to vector<8x32xf32>
    %185 = arith.addf %184, %183 : vector<8x32xf32>
    %186 = arith.divf %184, %185 : vector<8x32xf32>
    %187 = math.tanh %180 : vector<8x32xf32>
    %188 = arith.mulf %186, %187 : vector<8x32xf32>
    %189 = arith.truncf %188 : vector<8x32xf32> to vector<8x32xbf16>
    %c0_57 = arith.constant 0 : index
    %c4_58 = arith.constant 4 : index
    %c0_59 = arith.constant 0 : index
    %190 = vector.load %arg8[%c0_57, %c4_58, %c0_59] : memref<8x8x32xbf16, #tpu.memory_space<vmem>>, vector<8x1x32xbf16>
    %191 = vector.shape_cast %190 : vector<8x1x32xbf16> to vector<8x32xbf16>
    %192 = vector.shape_cast %189 : vector<8x32xbf16> to vector<8x1x32xbf16>
    tpu.vector_store %arg8[%c0_57, %c4_58, %c0_59], %192 {strides = array<i32>} : memref<8x8x32xbf16, #tpu.memory_space<vmem>>, vector<8x1x32xbf16>,
    %c0_60 = arith.constant 0 : index
    %c5 = arith.constant 5 : index
    %c0_61 = arith.constant 0 : index
    %193 = vector.load %arg2[%c0_60, %c5, %c0_61] : memref<8x8x32xbf16, #tpu.memory_space<vmem>>, vector<8x1x32xbf16>
    %194 = vector.shape_cast %193 : vector<8x1x32xbf16> to vector<8x32xbf16>
    %cst_62 = arith.constant dense<0.000000e+00> : vector<8x128xf32>
    %195 = tpu.matmul %194, %3, %cst_62 {dimension_numbers = #tpu.dot_dimension_numbers<[1], [0], [0], [1], [0, 0, 1, 1], [], []>} : vector<8x32xbf16>, vector<32x128xbf16>, vector<8x128xf32> -> vector<8x128xf32>
    %196 = arith.truncf %188 : vector<8x32xf32> to vector<8x32xbf16>
    %cst_63 = arith.constant dense<0.000000e+00> : vector<8x128xf32>
    %197 = tpu.matmul %196, %4, %cst_63 {dimension_numbers = #tpu.dot_dimension_numbers<[1], [0], [0], [1], [0, 0, 1, 1], [], []>} : vector<8x32xbf16>, vector<32x128xbf16>, vector<8x128xf32> -> vector<8x128xf32>
    %198 = arith.addf %195, %197 : vector<8x128xf32>
    %199 = vector.broadcast %5 : vector<1x128xf32> to vector<8x128xf32>
    %200 = arith.addf %198, %199 : vector<8x128xf32>
    %201 = vector.extract_strided_slice %200 {offsets = [0, 0], sizes = [8, 32], strides = [1, 1]} : vector<8x128xf32> to vector<8x32xf32>
    %202 = arith.negf %201 : vector<8x32xf32>
    %203 = math.exp %202 : vector<8x32xf32>
    %cst_64 = arith.constant 1.000000e+00 : f32
    %204 = vector.broadcast %cst_64 : f32 to vector<8x32xf32>
    %205 = arith.addf %204, %203 : vector<8x32xf32>
    %206 = arith.divf %204, %205 : vector<8x32xf32>
    %207 = vector.extract_strided_slice %200 {offsets = [0, 64], sizes = [8, 32], strides = [1, 1]} : vector<8x128xf32> to vector<8x32xf32>
    %208 = math.tanh %207 : vector<8x32xf32>
    %209 = arith.mulf %206, %208 : vector<8x32xf32>
    %210 = vector.extract_strided_slice %200 {offsets = [0, 32], sizes = [8, 32], strides = [1, 1]} : vector<8x128xf32> to vector<8x32xf32>
    %211 = arith.negf %210 : vector<8x32xf32>
    %212 = math.exp %211 : vector<8x32xf32>
    %cst_65 = arith.constant 1.000000e+00 : f32
    %213 = vector.broadcast %cst_65 : f32 to vector<8x32xf32>
    %214 = arith.addf %213, %212 : vector<8x32xf32>
    %215 = arith.divf %213, %214 : vector<8x32xf32>
    %216 = arith.mulf %215, %180 : vector<8x32xf32>
    %217 = arith.addf %209, %216 : vector<8x32xf32>
    %218 = vector.extract_strided_slice %200 {offsets = [0, 96], sizes = [8, 32], strides = [1, 1]} : vector<8x128xf32> to vector<8x32xf32>
    %219 = arith.negf %218 : vector<8x32xf32>
    %220 = math.exp %219 : vector<8x32xf32>
    %cst_66 = arith.constant 1.000000e+00 : f32
    %221 = vector.broadcast %cst_66 : f32 to vector<8x32xf32>
    %222 = arith.addf %221, %220 : vector<8x32xf32>
    %223 = arith.divf %221, %222 : vector<8x32xf32>
    %224 = math.tanh %217 : vector<8x32xf32>
    %225 = arith.mulf %223, %224 : vector<8x32xf32>
    %226 = arith.truncf %225 : vector<8x32xf32> to vector<8x32xbf16>
    %c0_67 = arith.constant 0 : index
    %c5_68 = arith.constant 5 : index
    %c0_69 = arith.constant 0 : index
    %227 = vector.load %arg8[%c0_67, %c5_68, %c0_69] : memref<8x8x32xbf16, #tpu.memory_space<vmem>>, vector<8x1x32xbf16>
    %228 = vector.shape_cast %227 : vector<8x1x32xbf16> to vector<8x32xbf16>
    %229 = vector.shape_cast %226 : vector<8x32xbf16> to vector<8x1x32xbf16>
    tpu.vector_store %arg8[%c0_67, %c5_68, %c0_69], %229 {strides = array<i32>} : memref<8x8x32xbf16, #tpu.memory_space<vmem>>, vector<8x1x32xbf16>,
    %c0_70 = arith.constant 0 : index
    %c6 = arith.constant 6 : index
    %c0_71 = arith.constant 0 : index
    %230 = vector.load %arg2[%c0_70, %c6, %c0_71] : memref<8x8x32xbf16, #tpu.memory_space<vmem>>, vector<8x1x32xbf16>
    %231 = vector.shape_cast %230 : vector<8x1x32xbf16> to vector<8x32xbf16>
    %cst_72 = arith.constant dense<0.000000e+00> : vector<8x128xf32>
    %232 = tpu.matmul %231, %3, %cst_72 {dimension_numbers = #tpu.dot_dimension_numbers<[1], [0], [0], [1], [0, 0, 1, 1], [], []>} : vector<8x32xbf16>, vector<32x128xbf16>, vector<8x128xf32> -> vector<8x128xf32>
    %233 = arith.truncf %225 : vector<8x32xf32> to vector<8x32xbf16>
    %cst_73 = arith.constant dense<0.000000e+00> : vector<8x128xf32>
    %234 = tpu.matmul %233, %4, %cst_73 {dimension_numbers = #tpu.dot_dimension_numbers<[1], [0], [0], [1], [0, 0, 1, 1], [], []>} : vector<8x32xbf16>, vector<32x128xbf16>, vector<8x128xf32> -> vector<8x128xf32>
    %235 = arith.addf %232, %234 : vector<8x128xf32>
    %236 = vector.broadcast %5 : vector<1x128xf32> to vector<8x128xf32>
    %237 = arith.addf %235, %236 : vector<8x128xf32>
    %238 = vector.extract_strided_slice %237 {offsets = [0, 0], sizes = [8, 32], strides = [1, 1]} : vector<8x128xf32> to vector<8x32xf32>
    %239 = arith.negf %238 : vector<8x32xf32>
    %240 = math.exp %239 : vector<8x32xf32>
    %cst_74 = arith.constant 1.000000e+00 : f32
    %241 = vector.broadcast %cst_74 : f32 to vector<8x32xf32>
    %242 = arith.addf %241, %240 : vector<8x32xf32>
    %243 = arith.divf %241, %242 : vector<8x32xf32>
    %244 = vector.extract_strided_slice %237 {offsets = [0, 64], sizes = [8, 32], strides = [1, 1]} : vector<8x128xf32> to vector<8x32xf32>
    %245 = math.tanh %244 : vector<8x32xf32>
    %246 = arith.mulf %243, %245 : vector<8x32xf32>
    %247 = vector.extract_strided_slice %237 {offsets = [0, 32], sizes = [8, 32], strides = [1, 1]} : vector<8x128xf32> to vector<8x32xf32>
    %248 = arith.negf %247 : vector<8x32xf32>
    %249 = math.exp %248 : vector<8x32xf32>
    %cst_75 = arith.constant 1.000000e+00 : f32
    %250 = vector.broadcast %cst_75 : f32 to vector<8x32xf32>
    %251 = arith.addf %250, %249 : vector<8x32xf32>
    %252 = arith.divf %250, %251 : vector<8x32xf32>
    %253 = arith.mulf %252, %217 : vector<8x32xf32>
    %254 = arith.addf %246, %253 : vector<8x32xf32>
    %255 = vector.extract_strided_slice %237 {offsets = [0, 96], sizes = [8, 32], strides = [1, 1]} : vector<8x128xf32> to vector<8x32xf32>
    %256 = arith.negf %255 : vector<8x32xf32>
    %257 = math.exp %256 : vector<8x32xf32>
    %cst_76 = arith.constant 1.000000e+00 : f32
    %258 = vector.broadcast %cst_76 : f32 to vector<8x32xf32>
    %259 = arith.addf %258, %257 : vector<8x32xf32>
    %260 = arith.divf %258, %259 : vector<8x32xf32>
    %261 = math.tanh %254 : vector<8x32xf32>
    %262 = arith.mulf %260, %261 : vector<8x32xf32>
    %263 = arith.truncf %262 : vector<8x32xf32> to vector<8x32xbf16>
    %c0_77 = arith.constant 0 : index
    %c6_78 = arith.constant 6 : index
    %c0_79 = arith.constant 0 : index
    %264 = vector.load %arg8[%c0_77, %c6_78, %c0_79] : memref<8x8x32xbf16, #tpu.memory_space<vmem>>, vector<8x1x32xbf16>
    %265 = vector.shape_cast %264 : vector<8x1x32xbf16> to vector<8x32xbf16>
    %266 = vector.shape_cast %263 : vector<8x32xbf16> to vector<8x1x32xbf16>
    tpu.vector_store %arg8[%c0_77, %c6_78, %c0_79], %266 {strides = array<i32>} : memref<8x8x32xbf16, #tpu.memory_space<vmem>>, vector<8x1x32xbf16>,
    %c0_80 = arith.constant 0 : index
    %c7 = arith.constant 7 : index
    %c0_81 = arith.constant 0 : index
    %267 = vector.load %arg2[%c0_80, %c7, %c0_81] : memref<8x8x32xbf16, #tpu.memory_space<vmem>>, vector<8x1x32xbf16>
    %268 = vector.shape_cast %267 : vector<8x1x32xbf16> to vector<8x32xbf16>
    %cst_82 = arith.constant dense<0.000000e+00> : vector<8x128xf32>
    %269 = tpu.matmul %268, %3, %cst_82 {dimension_numbers = #tpu.dot_dimension_numbers<[1], [0], [0], [1], [0, 0, 1, 1], [], []>} : vector<8x32xbf16>, vector<32x128xbf16>, vector<8x128xf32> -> vector<8x128xf32>
    %270 = arith.truncf %262 : vector<8x32xf32> to vector<8x32xbf16>
    %cst_83 = arith.constant dense<0.000000e+00> : vector<8x128xf32>
    %271 = tpu.matmul %270, %4, %cst_83 {dimension_numbers = #tpu.dot_dimension_numbers<[1], [0], [0], [1], [0, 0, 1, 1], [], []>} : vector<8x32xbf16>, vector<32x128xbf16>, vector<8x128xf32> -> vector<8x128xf32>
    %272 = arith.addf %269, %271 : vector<8x128xf32>
    %273 = vector.broadcast %5 : vector<1x128xf32> to vector<8x128xf32>
    %274 = arith.addf %272, %273 : vector<8x128xf32>
    %275 = vector.extract_strided_slice %274 {offsets = [0, 0], sizes = [8, 32], strides = [1, 1]} : vector<8x128xf32> to vector<8x32xf32>
    %276 = arith.negf %275 : vector<8x32xf32>
    %277 = math.exp %276 : vector<8x32xf32>
    %cst_84 = arith.constant 1.000000e+00 : f32
    %278 = vector.broadcast %cst_84 : f32 to vector<8x32xf32>
    %279 = arith.addf %278, %277 : vector<8x32xf32>
    %280 = arith.divf %278, %279 : vector<8x32xf32>
    %281 = vector.extract_strided_slice %274 {offsets = [0, 64], sizes = [8, 32], strides = [1, 1]} : vector<8x128xf32> to vector<8x32xf32>
    %282 = math.tanh %281 : vector<8x32xf32>
    %283 = arith.mulf %280, %282 : vector<8x32xf32>
    %284 = vector.extract_strided_slice %274 {offsets = [0, 32], sizes = [8, 32], strides = [1, 1]} : vector<8x128xf32> to vector<8x32xf32>
    %285 = arith.negf %284 : vector<8x32xf32>
    %286 = math.exp %285 : vector<8x32xf32>
    %cst_85 = arith.constant 1.000000e+00 : f32
    %287 = vector.broadcast %cst_85 : f32 to vector<8x32xf32>
    %288 = arith.addf %287, %286 : vector<8x32xf32>
    %289 = arith.divf %287, %288 : vector<8x32xf32>
    %290 = arith.mulf %289, %254 : vector<8x32xf32>
    %291 = arith.addf %283, %290 : vector<8x32xf32>
    %292 = vector.extract_strided_slice %274 {offsets = [0, 96], sizes = [8, 32], strides = [1, 1]} : vector<8x128xf32> to vector<8x32xf32>
    %293 = arith.negf %292 : vector<8x32xf32>
    %294 = math.exp %293 : vector<8x32xf32>
    %cst_86 = arith.constant 1.000000e+00 : f32
    %295 = vector.broadcast %cst_86 : f32 to vector<8x32xf32>
    %296 = arith.addf %295, %294 : vector<8x32xf32>
    %297 = arith.divf %295, %296 : vector<8x32xf32>
    %298 = math.tanh %291 : vector<8x32xf32>
    %299 = arith.mulf %297, %298 : vector<8x32xf32>
    %300 = arith.truncf %299 : vector<8x32xf32> to vector<8x32xbf16>
    %c0_87 = arith.constant 0 : index
    %c7_88 = arith.constant 7 : index
    %c0_89 = arith.constant 0 : index
    %301 = vector.load %arg8[%c0_87, %c7_88, %c0_89] : memref<8x8x32xbf16, #tpu.memory_space<vmem>>, vector<8x1x32xbf16>
    %302 = vector.shape_cast %301 : vector<8x1x32xbf16> to vector<8x32xbf16>
    %303 = vector.shape_cast %300 : vector<8x32xbf16> to vector<8x1x32xbf16>
    tpu.vector_store %arg8[%c0_87, %c7_88, %c0_89], %303 {strides = array<i32>} : memref<8x8x32xbf16, #tpu.memory_space<vmem>>, vector<8x1x32xbf16>,
    %c0_90 = arith.constant 0 : index
    %c0_91 = arith.constant 0 : index
    %304 = vector.load %arg11[%c0_90, %c0_91] : memref<8x32xf32, #tpu.memory_space<vmem>>, vector<8x32xf32>
    tpu.vector_store %arg11[%c0_90, %c0_91], %299 {strides = array<i32>} : memref<8x32xf32, #tpu.memory_space<vmem>>, vector<8x32xf32>,
    %c0_92 = arith.constant 0 : index
    %c0_93 = arith.constant 0 : index
    %305 = vector.load %arg12[%c0_92, %c0_93] : memref<8x32xf32, #tpu.memory_space<vmem>>, vector<8x32xf32>
    tpu.vector_store %arg12[%c0_92, %c0_93], %291 {strides = array<i32>} : memref<8x32xf32, #tpu.memory_space<vmem>>, vector<8x32xf32>,
    %c0_i32_94 = arith.constant 0 : i32
    %306 = arith.cmpi eq, %arg1, %c0_i32_94 : i32
    %307 = arith.extui %306 : i1 to i32
    %c0_i32_95 = arith.constant 0 : i32
    %308 = arith.cmpi ne, %307, %c0_i32_95 : i32
    scf.if %308 {
      %c0_96 = arith.constant 0 : index
      %c0_97 = arith.constant 0 : index
      %309 = vector.load %arg11[%c0_96, %c0_97] : memref<8x32xf32, #tpu.memory_space<vmem>>, vector<8x32xf32>
      %c0_98 = arith.constant 0 : index
      %c0_99 = arith.constant 0 : index
      %310 = vector.load %arg9[%c0_98, %c0_99] : memref<8x32xf32, #tpu.memory_space<vmem>>, vector<8x32xf32>
      tpu.vector_store %arg9[%c0_98, %c0_99], %309 {strides = array<i32>} : memref<8x32xf32, #tpu.memory_space<vmem>>, vector<8x32xf32>,
      %c0_100 = arith.constant 0 : index
      %c0_101 = arith.constant 0 : index
      %311 = vector.load %arg12[%c0_100, %c0_101] : memref<8x32xf32, #tpu.memory_space<vmem>>, vector<8x32xf32>
      %c0_102 = arith.constant 0 : index
      %c0_103 = arith.constant 0 : index
      %312 = vector.load %arg10[%c0_102, %c0_103] : memref<8x32xf32, #tpu.memory_space<vmem>>, vector<8x32xf32>
      tpu.vector_store %arg10[%c0_102, %c0_103], %311 {strides = array<i32>} : memref<8x32xf32, #tpu.memory_space<vmem>>, vector<8x32xf32>,
    } else {
    }
    return
  }
  func.func @transform_0(%arg0: i32, %arg1: i32) -> (i32, i32, i32) {
    %c0_i32 = arith.constant 0 : i32
    %c0_i32_0 = arith.constant 0 : i32
    return %arg0, %arg1, %c0_i32 : i32, i32, i32
  }
  func.func @transform_1(%arg0: i32, %arg1: i32) -> (i32, i32) {
    %c0_i32 = arith.constant 0 : i32
    %c0_i32_0 = arith.constant 0 : i32
    return %arg0, %c0_i32 : i32, i32
  }
  func.func @transform_2(%arg0: i32, %arg1: i32) -> (i32, i32) {
    %c0_i32 = arith.constant 0 : i32
    %c0_i32_0 = arith.constant 0 : i32
    return %arg0, %c0_i32 : i32, i32
  }
  func.func @transform_3(%arg0: i32, %arg1: i32) -> (i32, i32) {
    %c0_i32 = arith.constant 0 : i32
    %c0_i32_0 = arith.constant 0 : i32
    %c0_i32_1 = arith.constant 0 : i32
    return %c0_i32, %c0_i32_0 : i32, i32
  }
  func.func @transform_4(%arg0: i32, %arg1: i32) -> (i32, i32) {
    %c0_i32 = arith.constant 0 : i32
    %c0_i32_0 = arith.constant 0 : i32
    %c0_i32_1 = arith.constant 0 : i32
    return %c0_i32, %c0_i32_0 : i32, i32
  }
  func.func @transform_5(%arg0: i32, %arg1: i32) -> (i32, i32) {
    %c0_i32 = arith.constant 0 : i32
    %c0_i32_0 = arith.constant 0 : i32
    %c0_i32_1 = arith.constant 0 : i32
    return %c0_i32, %c0_i32_0 : i32, i32
  }
  func.func @transform_6(%arg0: i32, %arg1: i32) -> (i32, i32, i32) {
    %c0_i32 = arith.constant 0 : i32
    %c0_i32_0 = arith.constant 0 : i32
    return %arg0, %arg1, %c0_i32 : i32, i32, i32
  }
  func.func @transform_7(%arg0: i32, %arg1: i32) -> (i32, i32) {
    %c0_i32 = arith.constant 0 : i32
    %c0_i32_0 = arith.constant 0 : i32
    return %arg0, %c0_i32 : i32, i32
  }
  func.func @transform_8(%arg0: i32, %arg1: i32) -> (i32, i32) {
    %c0_i32 = arith.constant 0 : i32
    %c0_i32_0 = arith.constant 0 : i32
    return %arg0, %c0_i32 : i32, i32
  }
}

</mosaic_0001>

<bundles_post_ra>
// kernel: tpu_custom_call.1
= control target key start
LH: loop header
LB: loop body
LE: loop exit
PB: predicated region body
PF: predicated region fallthrough
CT: control target
= control target key end

     0   :  { %14 = vsyncpa [#allocation5], 0  ;;  %s4284_s0 = inlined_call_operand.hbm [shape: bf16[8,8,32], index: 0, kind: input, shape index: {}]   ;;  %s4285_s1 = inlined_call_operand.hbm [shape: f32[8,32], index: 1, kind: input, shape index: {}]   ;;  %s4286_s2 = inlined_call_operand.hbm [shape: f32[8,32], index: 2, kind: input, shape index: {}]   ;;  %s4287_s3 = inlined_call_operand.hbm [shape: bf16[32,128], index: 3, kind: input, shape index: {}]   ;;  %s4288_s4 = inlined_call_operand.hbm [shape: bf16[32,128], index: 4, kind: input, shape index: {}]   ;;  %s4289_s5 = inlined_call_operand.vmem [shape: f32[1,128], index: 5, kind: input, shape index: {}]   ;;  %s4290_s6 = inlined_call_operand.hbm [shape: bf16[8,8,32], index: 6, kind: output, shape index: {0}]   ;;  %s4291_s7 = inlined_call_operand.hbm [shape: f32[8,32], index: 7, kind: output, shape index: {1}]   ;;  %s4292_s8 = inlined_call_operand.hbm [shape: f32[8,32], index: 8, kind: output, shape index: {2}]  }
   0x1   :  { %15 = vsyncpa [#allocation8], 0 }
   0x2   :  { %16 = vsyncpa [#allocation11], 0 }
   0x3   :  { %17 = vsyncpa [#allocation6], 0 }
   0x4   :  { %18 = vsyncpa [#allocation15], 0  ;;  %s3413_s27 = smov [#allocation7]   ;;  %s3227_s9 = scalar_lea.hbm %s4285_s1, 128 }
   0x5   :  { %s37_s28 = sshll.u32 %s3413_s27, 4  ;;  %p3228_p0 = scmp.ne.s32.totalorder %s4285_s1, %s3227_s9  ;;  %s38_s28 = int_to_ptr.vmem [resolvable:$true] %s37_s28 }
   0x6   :  { %p3231_p1 = scmp.lt.u32.totalorder %s3227_s9, %s4285_s1 }
   0x8   :  { %p3233_p2 = pnand %p3231_p1, %p3228_p0 }
   0xa   :  { %3236 = shalt.err (!%p3233_p2)
}
   0xb   :  { %s3237_s14 = scalar_lea.vmem %s38_s28, 128  ;;  %p3242_p4 = scmp.lt.s32.totalorder %s38_s28, %s38_s28 }
   0xc   :  { %p3238_p3 = scmp.ne.s32.totalorder %s38_s28, %s3237_s14  ;;  %p3243_p5 = scmp.lt.s32.totalorder %s3237_s14, %s3237_s14 }
   0xe   :  { %p3244_p6 = por %p3243_p5, %p3242_p4 }
  0x10   :  { %p3245_p7 = pnand %p3244_p6, %p3238_p3 }
  0x12   :  { %3248 = shalt.err (!%p3245_p7)
}
  0x13   :  { %40 = dma.hbm_to_vmem [thread:$0]  %s4285_s1, 128, %s38_s28, [#allocation8]  }
  0x14   :  { %s3414_s17 = smov [#allocation10]   ;;  %s3415_s19 = smov [#allocation4]  }
  0x15   :  { %s56_s18 = sshll.u32 %s3414_s17, 4  ;;  %s24_s20 = sshll.u32 %s3415_s19, 4  ;;  %s57_s18 = int_to_ptr.vmem [resolvable:$true] %s56_s18  ;;  %s25_s20 = int_to_ptr.vmem [resolvable:$true] %s24_s20 }
  0x16   :  { %s3249_s23 = scalar_lea.hbm %s4287_s3, 256 }
  0x17   :  { %p3250_p8 = scmp.ne.s32.totalorder %s4287_s3, %s3249_s23  ;;  %p3253_p9 = scmp.lt.u32.totalorder %s3249_s23, %s4287_s3 }
  0x19   :  { %p3255_p10 = pnand %p3253_p9, %p3250_p8 }
  0x1b   :  { %3258 = shalt.err (!%p3255_p10)
}
  0x1c   :  { %s3259_s1 = scalar_lea.vmem %s57_s18, 256  ;;  %p3264_p12 = scmp.lt.s32.totalorder %s57_s18, %s57_s18 }
  0x1d   :  { %p3260_p11 = scmp.ne.s32.totalorder %s57_s18, %s3259_s1  ;;  %p3265_p13 = scmp.lt.s32.totalorder %s3259_s1, %s3259_s1 }
  0x1f   :  { %p3266_p0 = por %p3265_p13, %p3264_p12 }
  0x21   :  { %p3267_p1 = pnand %p3266_p0, %p3260_p11 }
  0x23   :  { %3270 = shalt.err (!%p3267_p1)
}
  0x24   :  { %s3416_s28 = smov 64   ;;  %s3417_s29 = smov 4  }
  0x25   :  { %62 = dma.hbm_to_vmem [thread:$0]  %s4287_s3, 256, %s57_s18, [#allocation11], %s3416_s28, %s3416_s28, %s3417_s29  }
  0x26   :  { %s3271_s12 = scalar_lea.hbm %s4284_s0, 512 }
  0x27   :  { %p3272_p2 = scmp.ne.s32.totalorder %s4284_s0, %s3271_s12  ;;  %p3275_p3 = scmp.lt.u32.totalorder %s3271_s12, %s4284_s0 }
  0x29   :  { %p3277_p4 = pnand %p3275_p3, %p3272_p2 }
  0x2b   :  { %3280 = shalt.err (!%p3277_p4)
}
  0x2c   :  { %s3281_s17 = scalar_lea.vmem %s25_s20, 512  ;;  %p3286_p6 = scmp.lt.s32.totalorder %s25_s20, %s25_s20 }
  0x2d   :  { %p3282_p5 = scmp.ne.s32.totalorder %s25_s20, %s3281_s17  ;;  %p3287_p7 = scmp.lt.s32.totalorder %s3281_s17, %s3281_s17 }
  0x2f   :  { %p3288_p8 = por %p3287_p7, %p3286_p6 }
  0x31   :  { %p3289_p9 = pnand %p3288_p8, %p3282_p5 }
  0x33   :  { %3292 = shalt.err (!%p3289_p9)
}
  0x34   :  { %30 = dma.hbm_to_vmem [thread:$0]  %s4284_s0, 512, %s25_s20, [#allocation5], %s3416_s28, %s3416_s28, %s3417_s29  }
  0x35   :  { %s3418_s19 = smov [#allocation9]   ;;  %s3419_s22 = smov [#allocation12]  }
  0x36   :  { %s47_s21 = sshll.u32 %s3418_s19, 4  ;;  %s68_s23 = sshll.u32 %s3419_s22, 4  ;;  %s48_s21 = int_to_ptr.vmem [resolvable:$true] %s47_s21  ;;  %s69_s23 = int_to_ptr.vmem [resolvable:$true] %s68_s23 }
  0x37   :  { %s3293_s26 = scalar_lea.hbm %s4286_s2, 128 }
  0x38   :  { %p3294_p10 = scmp.ne.s32.totalorder %s4286_s2, %s3293_s26  ;;  %p3297_p11 = scmp.lt.u32.totalorder %s3293_s26, %s4286_s2 }
  0x3a   :  { %p3299_p12 = pnand %p3297_p11, %p3294_p10 }
  0x3c   :  { %3302 = shalt.err (!%p3299_p12)
}
  0x3d   :  { %s3303_s0 = scalar_lea.vmem %s48_s21, 128  ;;  %p3308_p0 = scmp.lt.s32.totalorder %s48_s21, %s48_s21 }
  0x3e   :  { %p3304_p13 = scmp.ne.s32.totalorder %s48_s21, %s3303_s0  ;;  %p3309_p1 = scmp.lt.s32.totalorder %s3303_s0, %s3303_s0 }
  0x40   :  { %p3310_p2 = por %p3309_p1, %p3308_p0 }
  0x42   :  { %p3311_p3 = pnand %p3310_p2, %p3304_p13 }
  0x44   :  { %3314 = shalt.err (!%p3311_p3)
}
  0x45   :  { %50 = dma.hbm_to_vmem [thread:$0]  %s4286_s2, 128, %s48_s21, [#allocation8]  }
  0x46   :  { %s3315_s13 = scalar_lea.hbm %s4288_s4, 256 }
  0x47   :  { %p3316_p4 = scmp.ne.s32.totalorder %s4288_s4, %s3315_s13  ;;  %p3319_p5 = scmp.lt.u32.totalorder %s3315_s13, %s4288_s4 }
  0x49   :  { %p3321_p6 = pnand %p3319_p5, %p3316_p4 }
  0x4b   :  { %3324 = shalt.err (!%p3321_p6)
}
  0x4c   :  { %s3325_s3 = scalar_lea.vmem %s69_s23, 256  ;;  %p3330_p8 = scmp.lt.s32.totalorder %s69_s23, %s69_s23 }
  0x4d   :  { %p3326_p7 = scmp.ne.s32.totalorder %s69_s23, %s3325_s3  ;;  %p3331_p9 = scmp.lt.s32.totalorder %s3325_s3, %s3325_s3 }
  0x4f   :  { %p3332_p10 = por %p3331_p9, %p3330_p8 }
  0x51   :  { %p3333_p11 = pnand %p3332_p10, %p3326_p7 }
  0x53   :  { %3336 = shalt.err (!%p3333_p11)
}
  0x54   :  { %74 = dma.hbm_to_vmem [thread:$0]  %s4288_s4, 256, %s69_s23, [#allocation11], %s3416_s28, %s3416_s28, %s3417_s29  }
  0x55   :  { %3403 = dma.done.wait [#allocation5], 512  }
  0x56   :  { %3404 = vsyncadd [#allocation5], 4294966784 }
  0x57   :  { %3405 = dma.done.wait [#allocation8], 256  }
  0x58   :  { %3406 = vsyncadd [#allocation8], 4294967040 }
  0x59   :  { %3407 = dma.done.wait [#allocation11], 512  }
  0x5a   :  { %3408 = vsyncadd [#allocation11], 4294966784  ;;  %v3420_v0 = vmov 0.0   ;;  %vm3421_vm0 = vmmov 0   ;;  %v3549_v1 = vld [vmem:[#allocation12] sm:$0xff]   ;;  %v3551_v2 = vld [vmem:[#allocation10] sm:$0xff]  }
  0x5b   :  { %2946 = vmatprep.subr.bf16.mxu0 %v3420_v0  ;;  %2954 = vmatprep.subr.bf16.mxu1 %v3420_v0  ;;  %vm98_vm1 = vcmask 261120   ;;  %v3554_v3 = vld [vmem:[#allocation12 + $0x8] sm:$0xff]   ;;  %vm211_vm2 = vcmask 1041409   ;;  %v97_v4 = vld [vmem:[#allocation7] sm:$0xff]  ;;  %vm214_vm3 = vcmask 1042434   ;;  %v3560_v5 = vld [vmem:[#allocation10 + $0x8] sm:$0xff]  }
  0x5c   :  { %2950 = vmatprep.mubr.msk.bf16.mxu0 %vm3421_vm0, %v3420_v0  ;;  %2958 = vmatprep.mubr.msk.bf16.mxu1 %vm3421_vm0, %v3420_v0  ;;  %99 = vst.msk [vmem:[#allocation2] sm:$0xff] %vm98_vm1, %v97_v4  ;;  %vm217_vm4 = vcmask 1043459   ;;  %vm220_vm5 = vcmask 1044484   ;;  %vm223_vm6 = vcmask 1045509   ;;  %vm226_vm7 = vcmask 1046534   ;;  %v100_v22 = vld [vmem:[#allocation9] sm:$0xff] }
  0x5d   :  { %2947 = vmatpush3.bf16.msra.mxu0 %v3549_v1  ;;  %2955 = vmatpush3.bf16.msra.mxu1 %v3551_v2  ;;  %v3094_v6 = vld [vmem:[#allocation4] ss:$0 sps:$4 sm:$0x11]   ;;  %v3095_v7 = vld [vmem:[#allocation4 + $0x4] ss:$0 sps:$4 sm:$0x11]  }
  0x5e   :  { %2948 = vmatprep.subr.bf16.mxu0 %v3420_v0  ;;  %2956 = vmatprep.subr.bf16.mxu1 %v3420_v0  ;;  %v3096_v8 = vld [vmem:[#allocation4 + $0x8] ss:$0 sps:$4 sm:$0x11]   ;;  %v3097_v9 = vld [vmem:[#allocation4 + $0xc] ss:$0 sps:$4 sm:$0x11]   ;;  %v202_v12 = vunpack.c.l.b16 %v3094_v6  ;;  %v203_v13 = vunpack.c.l.b16 %v3095_v7 }
  0x5f   :  { %v3098_v10 = vld [vmem:[#allocation4 + $0x10] ss:$0 sps:$4 sm:$0x11]   ;;  %v3099_v11 = vld [vmem:[#allocation4 + $0x14] ss:$0 sps:$4 sm:$0x11]   ;;  %v204_v16 = vunpack.c.l.b16 %v3096_v8  ;;  %v205_v17 = vunpack.c.l.b16 %v3097_v9 }
  0x60   :  { %v3100_v14 = vld [vmem:[#allocation4 + $0x18] ss:$0 sps:$4 sm:$0x11]   ;;  %v3101_v15 = vld [vmem:[#allocation4 + $0x1c] ss:$0 sps:$4 sm:$0x11]   ;;  %v206_v19 = vunpack.c.l.b16 %v3098_v10  ;;  %v207_v20 = vunpack.c.l.b16 %v3099_v11 }
  0x61   :  { %2949 = vmatpush3.bf16.msra.mxu0 %v3554_v3  ;;  %2957 = vmatpush3.bf16.msra.mxu1 %v3560_v5  ;;  %v210_v21 = vrot.slane %v203_v13, 7  ;;  %vm229_vm8 = vcmask 1047559   ;;  %v208_v24 = vunpack.c.l.b16 %v3100_v14  ;;  %v209_v25 = vunpack.c.l.b16 %v3101_v15  ;;  %101 = vst.msk [vmem:[#allocation3] sm:$0xff] %vm98_vm1, %v100_v22  ;;  %s3422_s4 = smov 32   ;;  %v3592_v45 = vld [vmem:[%s4289_s5] ss:$0 sm:$0xff] }
  0x62   :  { %2962 = vmatprep.subr.bf16.mxu0 %v3420_v0  ;;  %2970 = vmatprep.subr.bf16.mxu1 %v3420_v0  ;;  %v213_v26 = vrot.slane %v204_v16, 6  ;;  %v216_v28 = vrot.slane %v205_v17, 5  ;;  %v219_v29 = vrot.slane %v206_v19, 4  ;;  %v222_v30 = vrot.slane %v207_v20, 3  ;;  %s3423_s22 = smov 96   ;;  %s3427_s26 = smov [#allocation16]  }
  0x63   :  { %v111_v18 = vld [vmem:[#allocation2] sm:$0xff]  ;;  %v212_v27 = vsel %vm211_vm2, %v210_v21, %v202_v12  ;;  %v225_v32 = vrot.slane %v208_v24, 2  ;;  %v228_v33 = vrot.slane %v209_v25, 1  ;;  %v3102_v63 = vld [vmem:[#allocation4] ss:$0 sps:$4 sm:$0x11]  }
  0x64   :  { %v121_v23 = vpack.c.bf16 %v111_v18, %v111_v18  ;;  %v215_v31 = vsel %vm214_vm3, %v213_v26, %v212_v27  ;;  %v3103_v4 = vld [vmem:[#allocation4 + $0x4] ss:$0 sps:$4 sm:$0x11]   ;;  %v3104_v6 = vld [vmem:[#allocation4 + $0x8] ss:$0 sps:$4 sm:$0x11]   ;;  %v548_v10 = vunpack.c.l.b16 %v3102_v63 }
  0x65   :  { %v218_v34 = vsel %vm217_vm4, %v216_v28, %v215_v31  ;;  %v3105_v7 = vld [vmem:[#allocation4 + $0xc] ss:$0 sps:$4 sm:$0x11]   ;;  %v3106_v8 = vld [vmem:[#allocation4 + $0x10] ss:$0 sps:$4 sm:$0x11]   ;;  %v549_v11 = vunpack.c.l.b16 %v3103_v4  ;;  %v550_v14 = vunpack.c.l.b16 %v3104_v6 }
  0x66   :  { %2951 = vmatmul.mubr.msk.bf16.vlgmr.msra.gmra.mrb[0].mxu0 %vm98_vm1, %v121_v23  ;;  %v221_v35 = vsel %vm220_vm5, %v219_v29, %v218_v34  ;;  %v3107_v9 = vld [vmem:[#allocation4 + $0x14] ss:$0 sps:$4 sm:$0x11]   ;;  %v3108_v12 = vld [vmem:[#allocation4 + $0x18] ss:$0 sps:$4 sm:$0x11]   ;;  %v551_v15 = vunpack.c.l.b16 %v3105_v7  ;;  %v552_v17 = vunpack.c.l.b16 %v3106_v8 }
  0x67   :  { %2963 = vmatpush3.bf16.msra.mxu0 %v3549_v1  ;;  %2966 = vmatprep.mubr.msk.bf16.mxu0 %vm3421_vm0, %v3420_v0  ;;  %v224_v36 = vsel %vm223_vm6, %v222_v30, %v221_v35  ;;  %v3109_v13 = vld [vmem:[#allocation4 + $0x1c] ss:$0 sps:$4 sm:$0x11]   ;;  %v553_v18 = vunpack.c.l.b16 %v3107_v9  ;;  %v556_v19 = vrot.slane %v548_v10, 1  ;;  %v554_v20 = vunpack.c.l.b16 %v3108_v12  ;;  %s2755_s27 = sshll.u32 %s3427_s26, 4  ;;  %s4221_s27 = int_to_ptr.vmem [resolvable:$true] %s2755_s27 }
  0x68   :  { %2964 = vmatprep.subr.bf16.mxu0 %v3420_v0  ;;  %v227_v37 = vsel %vm226_vm7, %v225_v32, %v224_v36  ;;  %v112_v39 = vld [vmem:[#allocation3] sm:$0xff]  ;;  %v555_v21 = vunpack.c.l.b16 %v3109_v13  ;;  %v558_v22 = vrot.slane %v550_v14, 7  ;;  %v560_v23 = vrot.slane %v551_v15, 6  ;;  %v3111_v63 = vld [vmem:[#allocation4 + $0x4] ss:$0 sps:$4 sm:$0x22]  }
  0x69   :  { %v230_v38 = vsel %vm229_vm8, %v228_v33, %v227_v37  ;;  %307 = vrot.lane.b32.xlu0 %v112_v39, %s3422_s4  ;;  %v557_v24 = vsel %vm211_vm2, %v549_v11, %v556_v19  ;;  %v562_v25 = vrot.slane %v552_v17, 5  ;;  %v564_v26 = vrot.slane %v553_v18, 4  ;;  %v3112_v4 = vld [vmem:[#allocation4 + $0x8] ss:$0 sps:$4 sm:$0x22]  }
  0x6a   :  { %v231_v40 = vpack.c.b16 %v230_v38, %v230_v38  ;;  %v559_v27 = vsel %vm214_vm3, %v558_v22, %v557_v24  ;;  %v566_v28 = vrot.slane %v554_v20, 3  ;;  %v568_v30 = vrot.slane %v555_v21, 2  ;;  %v3113_v6 = vld [vmem:[#allocation4 + $0xc] ss:$0 sps:$4 sm:$0x22]  }
  0x6b   :  { %2965 = vmatpush3.bf16.msra.mxu0 %v3554_v3  ;;  %v561_v29 = vsel %vm217_vm4, %v560_v23, %v559_v27  ;;  %v3114_v7 = vld [vmem:[#allocation4 + $0x10] ss:$0 sps:$4 sm:$0x22]   ;;  %v3115_v8 = vld [vmem:[#allocation4 + $0x14] ss:$0 sps:$4 sm:$0x22]   ;;  %v869_v10 = vunpack.c.l.b16 %v3111_v63  ;;  %v870_v13 = vunpack.c.l.b16 %v3112_v4  ;;  %v871_v14 = vunpack.c.l.b16 %v3113_v6 }
  0x6c   :  { %2978 = vmatprep.subr.bf16.mxu0 %v3420_v0  ;;  %2959 = vmatmul.mubr.msk.bf16.vlgmr.msra.gmra.mrb[0].mxu1 %vm98_vm1, %v231_v40  ;;  %v563_v31 = vsel %vm220_vm5, %v562_v25, %v561_v29  ;;  %v3116_v11 = vld [vmem:[#allocation4 + $0x18] ss:$0 sps:$4 sm:$0x22]   ;;  %v3117_v12 = vld [vmem:[#allocation4 + $0x1c] ss:$0 sps:$4 sm:$0x22]   ;;  %v873_v17 = vunpack.c.l.b16 %v3115_v8 }
  0x6d   :  { %2971 = vmatpush3.bf16.msra.mxu1 %v3551_v2  ;;  %2974 = vmatprep.mubr.msk.bf16.mxu1 %vm3421_vm0, %v3420_v0  ;;  %v565_v32 = vsel %vm223_vm6, %v564_v26, %v563_v31  ;;  %v877_v19 = vrot.slane %v869_v10, 1  ;;  %v874_v20 = vunpack.c.l.b16 %v3116_v11  ;;  %v875_v21 = vunpack.c.l.b16 %v3117_v12  ;;  %v3119_v63 = vld [vmem:[#allocation4 + $0x4] ss:$0 sps:$4 sm:$0x22]  }
  0x6e   :  { %2972 = vmatprep.subr.bf16.mxu1 %v3420_v0  ;;  %v567_v33 = vsel %vm226_vm7, %v566_v28, %v565_v32  ;;  %v880_v22 = vrot.slane %v871_v14, 7  ;;  %v884_v25 = vrot.slane %v873_v17, 5  ;;  %v3120_v4 = vld [vmem:[#allocation4 + $0x8] ss:$0 sps:$4 sm:$0x22]   ;;  %v1190_v10 = vunpack.c.l.b16 %v3119_v63 }
  0x6f   :  { %v569_v34 = vsel %vm229_vm8, %v568_v30, %v567_v33  ;;  %v886_v27 = vrot.slane %v874_v20, 4  ;;  %v888_v29 = vrot.slane %v875_v21, 3  ;;  %v3121_v6 = vld [vmem:[#allocation4 + $0xc] ss:$0 sps:$4 sm:$0x22]   ;;  %vm444_vm9 = vcmask 253952  }
  0x70   :  { %v570_v35 = vpack.c.b16 %v569_v34, %v569_v34  ;;  %v3123_v8 = vld [vmem:[#allocation4 + $0x14] ss:$0 sps:$4 sm:$0x22]   ;;  %v3124_v11 = vld [vmem:[#allocation4 + $0x18] ss:$0 sps:$4 sm:$0x22]   ;;  %v1192_v14 = vunpack.c.l.b16 %v3121_v6 }
  0x71   :  { %2973 = vmatpush3.bf16.msra.mxu1 %v3560_v5  ;;  %v3125_v12 = vld [vmem:[#allocation4 + $0x1c] ss:$0 sps:$4 sm:$0x22]   ;;  %v1194_v17 = vunpack.c.l.b16 %v3123_v8  ;;  %v1195_v20 = vunpack.c.l.b16 %v3124_v11  ;;  %v3126_v63 = vld [vmem:[#allocation4] ss:$0 sps:$4 sm:$0x44]  }
  0x72   :  { %2986 = vmatprep.subr.bf16.mxu1 %v3420_v0  ;;  %v1196_v21 = vunpack.c.l.b16 %v3125_v12  ;;  %v3128_v6 = vld [vmem:[#allocation4 + $0x8] ss:$0 sps:$4 sm:$0x44]   ;;  %v3130_v8 = vld [vmem:[#allocation4 + $0x10] ss:$0 sps:$4 sm:$0x44]  }
  0x73   :  { %v3132_v12 = vld [vmem:[#allocation4 + $0x18] ss:$0 sps:$4 sm:$0x44]   ;;  %vm445_vm10 = vsmask.f32 256  ;;  %vm1085_vm14 = vcmask 254977  }
  0x74   :  { %2975 = vmatmul.mubr.msk.bf16.vlgmr.msra.gmra.mrb[4].mxu1 %vm98_vm1, %v570_v35  ;;  %vm3975_vm11 = vmand %vm444_vm9, %vm445_vm10  ;;  %vm765_vm12 = vsmask.f32 7938  ;;  %vm1086_vm15 = vsmask.f32 1280  ;;  %vm2047_vm10 = vsmask.f32 7946 }
  0x75   :  { %2987 = vmatpush3.bf16.msra.mxu1 %v3551_v2  ;;  %2990 = vmatprep.mubr.msk.bf16.mxu1 %vm3421_vm0, %v3420_v0  ;;  %vm4003_vm13 = vmand %vm444_vm9, %vm765_vm12  ;;  %vm2688_vm12 = vsmask.f32 7950 }
  0x76   :  { %2988 = vmatprep.subr.bf16.mxu1 %v3420_v0 }
  0x79   :  { %2989 = vmatpush3.bf16.msra.mxu1 %v3560_v5 }
  0x7a   :  { %3002 = vmatprep.subr.bf16.mxu1 %v3420_v0 }
  0xdb   :  { %v308_v56 = vpop.permute.xlu0 %307 }
 0x139   :  { %v172_v41 = vpop.f32.mrb[0].mxu0 }
 0x13a   :  { %v2952_v42 = vpop.f32.mrb[1].mxu0 }
 0x13b   :  { %v175_v43 = vpop.f32.mrb[2].mxu0 }
 0x13c   :  { %v2953_v44 = vpop.f32.mrb[3].mxu0 }
 0x13f   :  { %v281_v46 = vpop.f32.mrb[0].mxu1 }
 0x140   :  { %v282_v47 = vadd.f32 %v281_v46, %v172_v41  ;;  %v2960_v48 = vpop.f32.mrb[1].mxu1 }
 0x141   :  { %v284_v49 = vpop.f32.mrb[2].mxu1 }
 0x142   :  { %v293_v50 = vadd.f32 %v3592_v45, %v282_v47  ;;  %v2961_v51 = vpop.f32.mrb[3].mxu1 }
 0x144   :  { %v2788_v52 = vmul.f32 -1.442695, %v293_v50  ;;  %3158 = vtanh.f32 %v293_v50 }
 0x146   :  { %3160 = vpow2.f32 %v2788_v52 }
 0x147   :  { %v608_v39 = vpop.f32.mrb[4].mxu1 }
 0x148   :  { %v2976_v40 = vpop.f32.mrb[5].mxu1 }
 0x149   :  { %v611_v41 = vpop.f32.mrb[6].mxu1 }
 0x14a   :  { %v2977_v42 = vpop.f32.mrb[7].mxu1 }
 0x14e   :  { %v3159_v53 = vpop.eup %3158 }
 0x14f   :  { %302 = vrot.lane.b32.xlu0 %v3159_v53, %s3416_s28 }
 0x150   :  { %v3161_v54 = vpop.eup %3160 }
 0x151   :  { %v297_v55 = vadd.f32 1.0, %v3161_v54 }
 0x153   :  { %3162 = vrcp.f32 %v297_v55 }
 0x15d   :  { %v3163_v57 = vpop.eup %3162 }
 0x15e   :  { %v310_v58 = vmul.f32 %v3163_v57, %v308_v56 }
 0x160   :  { %312 = vrot.lane.b32.xlu1 %v310_v58, %s3423_s22 }
 0x1c1   :  { %v303_v59 = vpop.permute.xlu0 %302 }
 0x1c2   :  { %v305_v60 = vmul.f32 %v3163_v57, %v303_v59 }
 0x1d2   :  { %v313_v61 = vpop.permute.xlu1 %312 }
 0x1d3   :  { %v315_v62 = vadd.f32 %v313_v61, %v305_v60 }
 0x1d5   :  { %3164 = vtanh.f32 %v315_v62 }
 0x1df   :  { %v3165_v16 = vpop.eup %3164 }
 0x1e0   :  { %318 = vrot.lane.b32.xlu1 %v3165_v16, %s3423_s22  ;;  %v872_v16 = vunpack.c.l.b16 %v3114_v7  ;;  %v3122_v7 = vld [vmem:[#allocation4 + $0x10] ss:$0 sps:$4 sm:$0x22]  }
 0x1e2   :  { %v882_v24 = vrot.slane %v872_v16, 6  ;;  %v1193_v16 = vunpack.c.l.b16 %v3122_v7  ;;  %v3129_v7 = vld [vmem:[#allocation4 + $0xc] ss:$0 sps:$4 sm:$0x44]  }
 0x1e4   :  { %628 = vrot.lane.b32.xlu1 %v315_v62, %s3422_s4  ;;  %v3110_v62 = vld [vmem:[#allocation4] ss:$0 sps:$4 sm:$0x22]  }
 0x1e5   :  { %v868_v9 = vunpack.c.l.b16 %v3110_v62  ;;  %v3118_v62 = vld [vmem:[#allocation4] ss:$0 sps:$4 sm:$0x22]  }
 0x1e7   :  { %v876_v18 = vrot.slane %v868_v9, 2  ;;  %v1189_v9 = vunpack.c.l.b16 %v3118_v62 }
 0x1e9   :  { %v878_v23 = vsel %vm211_vm2, %v877_v19, %v876_v18  ;;  %v1197_v18 = vrot.slane %v1189_v9, 3  ;;  %v1198_v19 = vrot.slane %v1190_v10, 2  ;;  %v3131_v9 = vld [vmem:[#allocation4 + $0x14] ss:$0 sps:$4 sm:$0x44]   ;;  %v1509_v10 = vunpack.c.l.b16 %v3126_v63 }
 0x1ea   :  { %v879_v26 = vsel %vm214_vm3, %v870_v13, %v878_v23  ;;  %v1191_v13 = vunpack.c.l.b16 %v3120_v4  ;;  %v3127_v4 = vld [vmem:[#allocation4 + $0x4] ss:$0 sps:$4 sm:$0x44]  }
 0x1eb   :  { %v881_v28 = vsel %vm217_vm4, %v880_v22, %v879_v26  ;;  %v1199_v23 = vsel %vm211_vm2, %v1198_v19, %v1197_v18  ;;  %v1510_v11 = vunpack.c.l.b16 %v3127_v4  ;;  %v1514_v18 = vunpack.c.l.b16 %v3131_v9  ;;  %v3135_v63 = vld [vmem:[#allocation4 + $0x4] ss:$0 sps:$4 sm:$0x44]   ;;  %v3136_v4 = vld [vmem:[#allocation4 + $0x8] ss:$0 sps:$4 sm:$0x44]  }
 0x1ec   :  { %v883_v30 = vsel %vm220_vm5, %v882_v24, %v881_v28  ;;  %v1200_v22 = vrot.slane %v1191_v13, 1  ;;  %v1203_v24 = vrot.slane %v1193_v16, 7  ;;  %v3133_v13 = vld [vmem:[#allocation4 + $0x1c] ss:$0 sps:$4 sm:$0x44]   ;;  %v1517_v19 = vrot.slane %v1509_v10, 4 }
 0x1ed   :  { %v885_v31 = vsel %vm223_vm6, %v884_v25, %v883_v30  ;;  %v1205_v25 = vrot.slane %v1194_v17, 6  ;;  %v1513_v17 = vunpack.c.l.b16 %v3130_v8  ;;  %v3139_v8 = vld [vmem:[#allocation4 + $0x14] ss:$0 sps:$4 sm:$0x44]   ;;  %v1831_v10 = vunpack.c.l.b16 %v3135_v63 }
 0x1ee   :  { %v887_v32 = vsel %vm226_vm7, %v886_v27, %v885_v31  ;;  %v1201_v26 = vsel %vm214_vm3, %v1200_v22, %v1199_v23  ;;  %v1207_v27 = vrot.slane %v1195_v20, 5  ;;  %v1518_v20 = vrot.slane %v1510_v11, 3  ;;  %v3140_v11 = vld [vmem:[#allocation4 + $0x18] ss:$0 sps:$4 sm:$0x44]  }
 0x1ef   :  { %v889_v33 = vsel %vm229_vm8, %v888_v29, %v887_v32  ;;  %v1202_v28 = vsel %vm217_vm4, %v1192_v14, %v1201_v26  ;;  %v1209_v29 = vrot.slane %v1196_v21, 4  ;;  %v1511_v14 = vunpack.c.l.b16 %v3128_v6  ;;  %v3137_v6 = vld [vmem:[#allocation4 + $0xc] ss:$0 sps:$4 sm:$0x44]  }
 0x1f0   :  { %v890_v34 = vpack.c.b16 %v889_v33, %v889_v33  ;;  %v1204_v30 = vsel %vm220_vm5, %v1203_v24, %v1202_v28  ;;  %v1515_v21 = vunpack.c.l.b16 %v3132_v12  ;;  %v1516_v22 = vunpack.c.l.b16 %v3133_v13  ;;  %v3141_v12 = vld [vmem:[#allocation4 + $0x1c] ss:$0 sps:$4 sm:$0x44]  }
 0x1f1   :  { %v1206_v31 = vsel %vm223_vm6, %v1205_v25, %v1204_v30  ;;  %v1520_v23 = vrot.slane %v1511_v14, 2  ;;  %v1519_v25 = vsel %vm211_vm2, %v1518_v20, %v1517_v19  ;;  %v1525_v26 = vrot.slane %v1514_v18, 7 }
 0x1f2   :  { %2991 = vmatmul.mubr.msk.bf16.vlgmr.msra.gmra.mrb[8].mxu1 %vm98_vm1, %v890_v34  ;;  %v1208_v32 = vsel %vm226_vm7, %v1207_v27, %v1206_v31  ;;  %v1527_v28 = vrot.slane %v1515_v21, 6  ;;  %v1529_v30 = vrot.slane %v1516_v22, 5  ;;  %v1832_v13 = vunpack.c.l.b16 %v3136_v4  ;;  %v3142_v4 = vld [vmem:[#allocation4] ss:$0 sps:$4 sm:$0x88]  }
 0x1f3   :  { %3003 = vmatpush3.bf16.msra.mxu1 %v3551_v2  ;;  %3006 = vmatprep.mubr.msk.bf16.mxu1 %vm3421_vm0, %v3420_v0  ;;  %v1210_v33 = vsel %vm229_vm8, %v1209_v29, %v1208_v32  ;;  %v1521_v27 = vsel %vm214_vm3, %v1520_v23, %v1519_v25  ;;  %v1833_v14 = vunpack.c.l.b16 %v3137_v6  ;;  %v1839_v18 = vrot.slane %v1831_v10, 4  ;;  %v3143_v6 = vld [vmem:[#allocation4 + $0x4] ss:$0 sps:$4 sm:$0x88]  }
 0x1f4   :  { %3004 = vmatprep.subr.bf16.mxu1 %v3420_v0  ;;  %v1211_v34 = vpack.c.b16 %v1210_v33, %v1210_v33  ;;  %v1836_v19 = vunpack.c.l.b16 %v3140_v11  ;;  %v1837_v20 = vunpack.c.l.b16 %v3141_v12  ;;  %v1841_v21 = vrot.slane %v1832_v13, 3  ;;  %v3147_v10 = vld [vmem:[#allocation4 + $0x14] ss:$0 sps:$4 sm:$0x88]  }
 0x1f5   :  { %v1843_v22 = vrot.slane %v1833_v14, 2  ;;  %v1835_v23 = vunpack.c.l.b16 %v3139_v8  ;;  %v3145_v8 = vld [vmem:[#allocation4 + $0xc] ss:$0 sps:$4 sm:$0x88]   ;;  %v2150_v11 = vunpack.c.l.b16 %v3142_v4  ;;  %v2151_v12 = vunpack.c.l.b16 %v3143_v6 }
 0x1f6   :  { %v3148_v13 = vld [vmem:[#allocation4 + $0x18] ss:$0 sps:$4 sm:$0x88]   ;;  %v3149_v14 = vld [vmem:[#allocation4 + $0x1c] ss:$0 sps:$4 sm:$0x88]  }
 0x1f7   :  { %3005 = vmatpush3.bf16.msra.mxu1 %v3560_v5  ;;  %v3151_v4 = vld [vmem:[#allocation4 + $0x4] ss:$0 sps:$4 sm:$0x88]   ;;  %v3152_v6 = vld [vmem:[#allocation4 + $0x8] ss:$0 sps:$4 sm:$0x88]  }
 0x1f8   :  { %3018 = vmatprep.subr.bf16.mxu1 %v3420_v0 }
 0x1fa   :  { %3007 = vmatmul.mubr.msk.bf16.vlgmr.msra.gmra.mrb[12].mxu1 %vm98_vm1, %v1211_v34 }
 0x1fb   :  { %3019 = vmatpush3.bf16.msra.mxu1 %v3551_v2  ;;  %3022 = vmatprep.mubr.msk.bf16.mxu1 %vm3421_vm0, %v3420_v0 }
 0x1fc   :  { %3020 = vmatprep.subr.bf16.mxu1 %v3420_v0 }
 0x1ff   :  { %3021 = vmatpush3.bf16.msra.mxu1 %v3560_v5 }
 0x200   :  { %3034 = vmatprep.subr.bf16.mxu1 %v3420_v0 }
 0x252   :  { %v319_v36 = vpop.permute.xlu1 %318 }
 0x253   :  { %v321_v37 = vmul.f32 %v3163_v57, %v319_v36 }
 0x255   :  { %v3613_v38 = vpack.c.bf16 %v321_v37, %v321_v37 }
 0x256   :  { %v629_v56 = vpop.permute.xlu1 %628 }
 0x257   :  { %479 = vrot.lane.b32.xlu0 %v3613_v38, %s3422_s4 }
 0x2c9   :  { %v480_v43 = vpop.permute.xlu0 %479 }
 0x2ca   :  { %2967 = vmatmul.mubr.msk.bf16.vlgmr.msra.gmra.mrb[4].mxu0 %vm98_vm1, %v480_v43 }
 0x2cb   :  { %2979 = vmatpush3.bf16.msra.mxu0 %v3549_v1  ;;  %2982 = vmatprep.mubr.msk.bf16.mxu0 %vm3421_vm0, %v3420_v0 }
 0x2cc   :  { %2980 = vmatprep.subr.bf16.mxu0 %v3420_v0 }
 0x2cf   :  { %2981 = vmatpush3.bf16.msra.mxu0 %v3554_v3 }
 0x2d0   :  { %2994 = vmatprep.subr.bf16.mxu0 %v3420_v0 }
 0x39d   :  { %v518_v44 = vpop.f32.mrb[4].mxu0 }
 0x39e   :  { %v609_v46 = vadd.f32 %v608_v39, %v518_v44  ;;  %v2968_v47 = vpop.f32.mrb[5].mxu0  ;;  %v928_v39 = vpop.f32.mrb[8].mxu1 }
 0x39f   :  { %v521_v48 = vpop.f32.mrb[6].mxu0  ;;  %v2992_v40 = vpop.f32.mrb[9].mxu1 }
 0x3a0   :  { %v614_v49 = vadd.f32 %v3592_v45, %v609_v46  ;;  %v2969_v50 = vpop.f32.mrb[7].mxu0  ;;  %v931_v41 = vpop.f32.mrb[10].mxu1 }
 0x3a1   :  { %v2993_v42 = vpop.f32.mrb[11].mxu1 }
 0x3a2   :  { %v2803_v51 = vmul.f32 -1.442695, %v614_v49  ;;  %3166 = vtanh.f32 %v614_v49  ;;  %v1249_v40 = vpop.f32.mrb[12].mxu1 }
 0x3a3   :  { %v3008_v41 = vpop.f32.mrb[13].mxu1 }
 0x3a4   :  { %3168 = vpow2.f32 %v2803_v51  ;;  %v1252_v42 = vpop.f32.mrb[14].mxu1 }
 0x3ac   :  { %v3167_v52 = vpop.eup %3166 }
 0x3ad   :  { %623 = vrot.lane.b32.xlu0 %v3167_v52, %s3416_s28 }
 0x3ae   :  { %v3169_v53 = vpop.eup %3168 }
 0x3af   :  { %v618_v54 = vadd.f32 1.0, %v3169_v53 }
 0x3b1   :  { %3170 = vrcp.f32 %v618_v54 }
 0x3bb   :  { %v3171_v55 = vpop.eup %3170 }
 0x3bc   :  { %v631_v57 = vmul.f32 %v3171_v55, %v629_v56 }
 0x3be   :  { %633 = vrot.lane.b32.xlu1 %v631_v57, %s3423_s22 }
 0x41f   :  { %v624_v58 = vpop.permute.xlu0 %623 }
 0x420   :  { %v626_v59 = vmul.f32 %v3171_v55, %v624_v58 }
 0x430   :  { %v634_v60 = vpop.permute.xlu1 %633 }
 0x431   :  { %v636_v61 = vadd.f32 %v634_v60, %v626_v59 }
 0x433   :  { %3172 = vtanh.f32 %v636_v61 }
 0x43d   :  { %v3173_v15 = vpop.eup %3172 }
 0x43e   :  { %639 = vrot.lane.b32.xlu0 %v3173_v15, %s3423_s22 }
 0x442   :  { %948 = vrot.lane.b32.xlu0 %v636_v61, %s3422_s4 }
 0x4b0   :  { %v640_v35 = vpop.permute.xlu0 %639 }
 0x4b1   :  { %v642_v36 = vmul.f32 %v3171_v55, %v640_v35 }
 0x4b3   :  { %v3643_v37 = vpack.c.bf16 %v642_v36, %v642_v36 }
 0x4b4   :  { %v949_v56 = vpop.permute.xlu0 %948 }
 0x4b5   :  { %799 = vrot.lane.b32.xlu1 %v3643_v37, %s3422_s4 }
 0x527   :  { %v800_v43 = vpop.permute.xlu1 %799 }
 0x528   :  { %2983 = vmatmul.mubr.msk.bf16.vlgmr.msra.gmra.mrb[8].mxu0 %vm98_vm1, %v800_v43  ;;  %v3009_v43 = vpop.f32.mrb[15].mxu1 }
 0x529   :  { %2995 = vmatpush3.bf16.msra.mxu0 %v3549_v1  ;;  %2998 = vmatprep.mubr.msk.bf16.mxu0 %vm3421_vm0, %v3420_v0 }
 0x52a   :  { %2996 = vmatprep.subr.bf16.mxu0 %v3420_v0 }
 0x52d   :  { %2997 = vmatpush3.bf16.msra.mxu0 %v3554_v3 }
 0x52e   :  { %3010 = vmatprep.subr.bf16.mxu0 %v3420_v0 }
 0x5fb   :  { %v838_v44 = vpop.f32.mrb[8].mxu0 }
 0x5fc   :  { %v929_v46 = vadd.f32 %v928_v39, %v838_v44  ;;  %v2984_v47 = vpop.f32.mrb[9].mxu0 }
 0x5fd   :  { %v841_v48 = vpop.f32.mrb[10].mxu0 }
 0x5fe   :  { %v934_v49 = vadd.f32 %v3592_v45, %v929_v46  ;;  %v2985_v50 = vpop.f32.mrb[11].mxu0 }
 0x600   :  { %v2818_v51 = vmul.f32 -1.442695, %v934_v49  ;;  %3174 = vtanh.f32 %v934_v49 }
 0x602   :  { %3176 = vpow2.f32 %v2818_v51 }
 0x60a   :  { %v3175_v52 = vpop.eup %3174 }
 0x60b   :  { %943 = vrot.lane.b32.xlu1 %v3175_v52, %s3416_s28 }
 0x60c   :  { %v3177_v53 = vpop.eup %3176 }
 0x60d   :  { %v938_v54 = vadd.f32 1.0, %v3177_v53 }
 0x60f   :  { %3178 = vrcp.f32 %v938_v54 }
 0x619   :  { %v3179_v55 = vpop.eup %3178 }
 0x61a   :  { %v951_v57 = vmul.f32 %v3179_v55, %v949_v56 }
 0x61c   :  { %953 = vrot.lane.b32.xlu0 %v951_v57, %s3423_s22 }
 0x67d   :  { %v944_v58 = vpop.permute.xlu1 %943 }
 0x67e   :  { %v946_v59 = vmul.f32 %v3179_v55, %v944_v58 }
 0x68e   :  { %v954_v60 = vpop.permute.xlu0 %953 }
 0x68f   :  { %v956_v61 = vadd.f32 %v954_v60, %v946_v59 }
 0x691   :  { %3180 = vtanh.f32 %v956_v61 }
 0x69b   :  { %v3181_v15 = vpop.eup %3180 }
 0x69c   :  { %959 = vrot.lane.b32.xlu1 %v3181_v15, %s3423_s22  ;;  %v1512_v15 = vunpack.c.l.b16 %v3129_v7  ;;  %v3138_v7 = vld [vmem:[#allocation4 + $0x10] ss:$0 sps:$4 sm:$0x44]  }
 0x69e   :  { %v1522_v24 = vrot.slane %v1512_v15, 1 }
 0x6a0   :  { %1269 = vrot.lane.b32.xlu1 %v956_v61, %s3422_s4  ;;  %v1523_v29 = vsel %vm217_vm4, %v1522_v24, %v1521_v27  ;;  %v1848_v27 = vrot.slane %v1836_v19, 7  ;;  %v2155_v19 = vunpack.c.l.b16 %v3147_v10 }
 0x6a1   :  { %v1524_v31 = vsel %vm220_vm5, %v1513_v17, %v1523_v29  ;;  %v1850_v29 = vrot.slane %v1837_v20, 6  ;;  %v2158_v20 = vrot.slane %v2150_v11, 6  ;;  %v2472_v11 = vunpack.c.l.b16 %v3151_v4 }
 0x6a2   :  { %v1526_v32 = vsel %vm223_vm6, %v1525_v26, %v1524_v31 }
 0x6a3   :  { %v1528_v33 = vsel %vm226_vm7, %v1527_v28, %v1526_v32 }
 0x6a4   :  { %v1530_v34 = vsel %vm229_vm8, %v1529_v30, %v1528_v33 }
 0x70e   :  { %v960_v35 = vpop.permute.xlu1 %959 }
 0x70f   :  { %v962_v36 = vmul.f32 %v3179_v55, %v960_v35  ;;  %v1531_v35 = vpack.c.b16 %v1530_v34, %v1530_v34 }
 0x711   :  { %v3673_v39 = vpack.c.bf16 %v962_v36, %v962_v36  ;;  %3023 = vmatmul.mubr.msk.bf16.vlgmr.msra.gmra.mrb[16].mxu1 %vm98_vm1, %v1531_v35  ;;  %v3727_v35 = vld [vmem:[#allocation10] sm:$0xff]  }
 0x712   :  { %v1270_v57 = vpop.permute.xlu1 %1269  ;;  %3035 = vmatpush3.bf16.msra.mxu1 %v3551_v2  ;;  %3038 = vmatprep.mubr.msk.bf16.mxu1 %vm3421_vm0, %v3420_v0 }
 0x713   :  { %1120 = vrot.lane.b32.xlu0 %v3673_v39, %s3422_s4  ;;  %3036 = vmatprep.subr.bf16.mxu1 %v3420_v0 }
 0x716   :  { %3037 = vmatpush3.bf16.msra.mxu1 %v3560_v5 }
 0x717   :  { %3050 = vmatprep.subr.bf16.mxu1 %v3420_v0 }
 0x785   :  { %v1121_v44 = vpop.permute.xlu0 %1120 }
 0x786   :  { %2999 = vmatmul.mubr.msk.bf16.vlgmr.msra.gmra.mrb[12].mxu0 %vm98_vm1, %v1121_v44 }
 0x787   :  { %3011 = vmatpush3.bf16.msra.mxu0 %v3549_v1  ;;  %3014 = vmatprep.mubr.msk.bf16.mxu0 %vm3421_vm0, %v3420_v0 }
 0x788   :  { %3012 = vmatprep.subr.bf16.mxu0 %v3420_v0 }
 0x78b   :  { %3013 = vmatpush3.bf16.msra.mxu0 %v3554_v3 }
 0x78c   :  { %3026 = vmatprep.subr.bf16.mxu0 %v3420_v0 }
 0x7e4   :  { %v1569_v42 = vpop.f32.mrb[16].mxu1 }
 0x7e5   :  { %v3024_v43 = vpop.f32.mrb[17].mxu1 }
 0x7e6   :  { %v1572_v44 = vpop.f32.mrb[18].mxu1 }
 0x7e7   :  { %v3025_v2 = vpop.f32.mrb[19].mxu1 }
 0x859   :  { %v1159_v46 = vpop.f32.mrb[12].mxu0 }
 0x85a   :  { %v1250_v47 = vadd.f32 %v1249_v40, %v1159_v46  ;;  %v3000_v48 = vpop.f32.mrb[13].mxu0 }
 0x85b   :  { %v1162_v49 = vpop.f32.mrb[14].mxu0 }
 0x85c   :  { %v1255_v50 = vadd.f32 %v3592_v45, %v1250_v47  ;;  %v3001_v51 = vpop.f32.mrb[15].mxu0 }
 0x85e   :  { %v2833_v52 = vmul.f32 -1.442695, %v1255_v50  ;;  %3182 = vtanh.f32 %v1255_v50 }
 0x860   :  { %3184 = vpow2.f32 %v2833_v52 }
 0x868   :  { %v3183_v53 = vpop.eup %3182 }
 0x869   :  { %1264 = vrot.lane.b32.xlu0 %v3183_v53, %s3416_s28 }
 0x86a   :  { %v3185_v54 = vpop.eup %3184 }
 0x86b   :  { %v1259_v55 = vadd.f32 1.0, %v3185_v54 }
 0x86d   :  { %3186 = vrcp.f32 %v1259_v55 }
 0x877   :  { %v3187_v56 = vpop.eup %3186 }
 0x878   :  { %v1272_v58 = vmul.f32 %v3187_v56, %v1270_v57 }
 0x87a   :  { %1274 = vrot.lane.b32.xlu1 %v1272_v58, %s3423_s22 }
 0x8db   :  { %v1265_v59 = vpop.permute.xlu0 %1264 }
 0x8dc   :  { %v1267_v60 = vmul.f32 %v3187_v56, %v1265_v59 }
 0x8ec   :  { %v1275_v61 = vpop.permute.xlu1 %1274 }
 0x8ed   :  { %v1277_v62 = vadd.f32 %v1275_v61, %v1267_v60 }
 0x8ef   :  { %3188 = vtanh.f32 %v1277_v62 }
 0x8f9   :  { %v3189_v16 = vpop.eup %3188 }
 0x8fa   :  { %1280 = vrot.lane.b32.xlu0 %v3189_v16, %s3423_s22  ;;  %v1834_v16 = vunpack.c.l.b16 %v3138_v7  ;;  %v3144_v7 = vld [vmem:[#allocation4 + $0x8] ss:$0 sps:$4 sm:$0x88]  }
 0x8fc   :  { %v1845_v25 = vrot.slane %v1834_v16, 1  ;;  %v2153_v16 = vunpack.c.l.b16 %v3145_v8  ;;  %v3154_v8 = vld [vmem:[#allocation4 + $0x10] ss:$0 sps:$4 sm:$0x88]  }
 0x8fe   :  { %1589 = vrot.lane.b32.xlu0 %v1277_v62, %s3422_s4  ;;  %v3134_v62 = vld [vmem:[#allocation4] ss:$0 sps:$4 sm:$0x44]  }
 0x8ff   :  { %v1830_v9 = vunpack.c.l.b16 %v3134_v62 }
 0x901   :  { %v1838_v17 = vrot.slane %v1830_v9, 5  ;;  %v3146_v9 = vld [vmem:[#allocation4 + $0x10] ss:$0 sps:$4 sm:$0x88]  }
 0x903   :  { %v1840_v24 = vsel %vm211_vm2, %v1839_v18, %v1838_v17  ;;  %v2154_v18 = vunpack.c.l.b16 %v3146_v9  ;;  %v3155_v9 = vld [vmem:[#allocation4 + $0x14] ss:$0 sps:$4 sm:$0x88]  }
 0x904   :  { %v1842_v26 = vsel %vm214_vm3, %v1841_v21, %v1840_v24  ;;  %v2159_v21 = vrot.slane %v2151_v12, 5  ;;  %v2163_v24 = vrot.slane %v2153_v16, 3  ;;  %v3156_v12 = vld [vmem:[#allocation4 + $0x18] ss:$0 sps:$4 sm:$0x88]  }
 0x905   :  { %v1844_v28 = vsel %vm217_vm4, %v1843_v22, %v1842_v26  ;;  %v2157_v22 = vunpack.c.l.b16 %v3149_v14  ;;  %v2165_v26 = vrot.slane %v2154_v18, 2  ;;  %v3157_v16 = vld [vmem:[#allocation4 + $0x1c] ss:$0 sps:$4 sm:$0x88]   ;;  %v2476_v18 = vunpack.c.l.b16 %v3155_v9 }
 0x906   :  { %v1846_v30 = vsel %vm220_vm5, %v1845_v25, %v1844_v28  ;;  %v2160_v25 = vsel %vm211_vm2, %v2159_v21, %v2158_v20  ;;  %v2156_v28 = vunpack.c.l.b16 %v3148_v13  ;;  %v2473_v13 = vunpack.c.l.b16 %v3152_v6 }
 0x907   :  { %v1847_v31 = vsel %vm223_vm6, %v1835_v23, %v1846_v30  ;;  %v2480_v20 = vrot.slane %v2472_v11, 6  ;;  %v2477_v21 = vunpack.c.l.b16 %v3156_v12 }
 0x908   :  { %v1849_v32 = vsel %vm226_vm7, %v1848_v27, %v1847_v31  ;;  %v2167_v27 = vrot.slane %v2155_v19, 1  ;;  %v2170_v31 = vrot.slane %v2157_v22, 7  ;;  %v2482_v22 = vrot.slane %v2473_v13, 5 }
 0x909   :  { %v1851_v33 = vsel %vm229_vm8, %v1850_v29, %v1849_v32 }
 0x90a   :  { %v1852_v34 = vpack.c.b16 %v1851_v33, %v1851_v33 }
 0x90c   :  { %3039 = vmatmul.mubr.msk.bf16.vlgmr.msra.gmra.mrb[20].mxu1 %vm98_vm1, %v1852_v34 }
 0x90d   :  { %3051 = vmatpush3.bf16.msra.mxu1 %v3727_v35  ;;  %3054 = vmatprep.mubr.msk.bf16.mxu1 %vm3421_vm0, %v3420_v0 }
 0x90e   :  { %3052 = vmatprep.subr.bf16.mxu1 %v3420_v0 }
 0x911   :  { %3053 = vmatpush3.bf16.msra.mxu1 %v3560_v5  ;;  %v3746_v5 = vld [vmem:[#allocation12 + $0x8] sm:$0xff]  }
 0x912   :  { %3066 = vmatprep.subr.bf16.mxu1 %v3420_v0 }
 0x96c   :  { %v1281_v36 = vpop.permute.xlu0 %1280 }
 0x96d   :  { %v1283_v40 = vmul.f32 %v3187_v56, %v1281_v36 }
 0x96f   :  { %v3703_v41 = vpack.c.bf16 %v1283_v40, %v1283_v40 }
 0x971   :  { %1440 = vrot.lane.b32.xlu1 %v3703_v41, %s3422_s4 }
 0x9df   :  { %v1890_v43 = vpop.f32.mrb[20].mxu1 }
 0x9e0   :  { %v3040_v44 = vpop.f32.mrb[21].mxu1 }
 0x9e1   :  { %v1893_v2 = vpop.f32.mrb[22].mxu1 }
 0x9e3   :  { %v1441_v46 = vpop.permute.xlu1 %1440 }
 0x9e4   :  { %3015 = vmatmul.mubr.msk.bf16.vlgmr.msra.gmra.mrb[16].mxu0 %vm98_vm1, %v1441_v46  ;;  %v3041_v46 = vpop.f32.mrb[23].mxu1 }
 0x9e5   :  { %3027 = vmatpush3.bf16.msra.mxu0 %v3549_v1  ;;  %3030 = vmatprep.mubr.msk.bf16.mxu0 %vm3421_vm0, %v3420_v0 }
 0x9e6   :  { %3028 = vmatprep.subr.bf16.mxu0 %v3420_v0 }
 0x9e9   :  { %3029 = vmatpush3.bf16.msra.mxu0 %v3554_v3  ;;  %v1590_v3 = vpop.permute.xlu0 %1589 }
 0x9ea   :  { %3042 = vmatprep.subr.bf16.mxu0 %v3420_v0 }
 0xab7   :  { %v1479_v47 = vpop.f32.mrb[16].mxu0 }
 0xab8   :  { %v1570_v48 = vadd.f32 %v1569_v42, %v1479_v47  ;;  %v3016_v49 = vpop.f32.mrb[17].mxu0 }
 0xab9   :  { %v1482_v50 = vpop.f32.mrb[18].mxu0 }
 0xaba   :  { %v1575_v51 = vadd.f32 %v3592_v45, %v1570_v48  ;;  %v3017_v52 = vpop.f32.mrb[19].mxu0  ;;  %v3740_v48 = vld [vmem:[#allocation12] sm:$0xff]  }
 0xabc   :  { %v2848_v53 = vmul.f32 -1.442695, %v1575_v51  ;;  %3190 = vtanh.f32 %v1575_v51 }
 0xabe   :  { %3192 = vpow2.f32 %v2848_v53 }
 0xac6   :  { %v3191_v1 = vpop.eup %3190 }
 0xac7   :  { %1584 = vrot.lane.b32.xlu1 %v3191_v1, %s3416_s28 }
 0xac8   :  { %v3193_v54 = vpop.eup %3192 }
 0xac9   :  { %v1579_v55 = vadd.f32 1.0, %v3193_v54 }
 0xacb   :  { %3194 = vrcp.f32 %v1579_v55 }
 0xad5   :  { %v3195_v56 = vpop.eup %3194 }
 0xad6   :  { %v1592_v57 = vmul.f32 %v3195_v56, %v1590_v3 }
 0xad8   :  { %1594 = vrot.lane.b32.xlu0 %v1592_v57, %s3423_s22 }
 0xb39   :  { %v1585_v58 = vpop.permute.xlu1 %1584 }
 0xb3a   :  { %v1587_v59 = vmul.f32 %v3195_v56, %v1585_v58 }
 0xb4a   :  { %v1595_v60 = vpop.permute.xlu0 %1594 }
 0xb4b   :  { %v1597_v61 = vadd.f32 %v1595_v60, %v1587_v59 }
 0xb4d   :  { %3196 = vtanh.f32 %v1597_v61 }
 0xb57   :  { %v3197_v15 = vpop.eup %3196 }
 0xb58   :  { %1600 = vrot.lane.b32.xlu1 %v3197_v15, %s3423_s22  ;;  %v2152_v15 = vunpack.c.l.b16 %v3144_v7  ;;  %v3153_v7 = vld [vmem:[#allocation4 + $0xc] ss:$0 sps:$4 sm:$0x88]  }
 0xb59   :  { %v2474_v14 = vunpack.c.l.b16 %v3153_v7 }
 0xb5a   :  { %v2161_v23 = vrot.slane %v2152_v15, 4 }
 0xb5c   :  { %1910 = vrot.lane.b32.xlu1 %v1597_v61, %s3422_s4  ;;  %v2162_v29 = vsel %vm214_vm3, %v2161_v23, %v2160_v25  ;;  %v2484_v23 = vrot.slane %v2474_v14, 4 }
 0xb5d   :  { %v2164_v30 = vsel %vm217_vm4, %v2163_v24, %v2162_v29  ;;  %v2478_v29 = vunpack.c.l.b16 %v3157_v16 }
 0xb5e   :  { %v2166_v32 = vsel %vm220_vm5, %v2165_v26, %v2164_v30  ;;  %v2488_v26 = vrot.slane %v2476_v18, 2 }
 0xb5f   :  { %v2168_v33 = vsel %vm223_vm6, %v2167_v27, %v2166_v32 }
 0xb60   :  { %v2169_v34 = vsel %vm226_vm7, %v2156_v28, %v2168_v33  ;;  %v2490_v28 = vrot.slane %v2477_v21, 1 }
 0xbca   :  { %v1601_v36 = vpop.permute.xlu1 %1600 }
 0xbcb   :  { %v1603_v40 = vmul.f32 %v3195_v56, %v1601_v36  ;;  %v2171_v36 = vsel %vm229_vm8, %v2170_v31, %v2169_v34 }
 0xbcd   :  { %v3735_v42 = vpack.c.bf16 %v1603_v40, %v1603_v40  ;;  %v2172_v40 = vpack.c.b16 %v2171_v36, %v2171_v36 }
 0xbce   :  { %v1911_v58 = vpop.permute.xlu1 %1910 }
 0xbcf   :  { %1761 = vrot.lane.b32.xlu0 %v3735_v42, %s3422_s4  ;;  %3055 = vmatmul.mubr.msk.bf16.vlgmr.msra.gmra.mrb[24].mxu1 %vm98_vm1, %v2172_v40 }
 0xbd0   :  { %3067 = vmatpush3.bf16.msra.mxu1 %v3727_v35  ;;  %3070 = vmatprep.mubr.msk.bf16.mxu1 %vm3421_vm0, %v3420_v0 }
 0xbd1   :  { %3068 = vmatprep.subr.bf16.mxu1 %v3420_v0 }
 0xc41   :  { %v1762_v47 = vpop.permute.xlu0 %1761 }
 0xc42   :  { %3031 = vmatmul.mubr.msk.bf16.vlgmr.msra.gmra.mrb[20].mxu0 %vm98_vm1, %v1762_v47 }
 0xc43   :  { %3043 = vmatpush3.bf16.msra.mxu0 %v3740_v48  ;;  %3046 = vmatprep.mubr.msk.bf16.mxu0 %vm3421_vm0, %v3420_v0 }
 0xc44   :  { %3044 = vmatprep.subr.bf16.mxu0 %v3420_v0 }
 0xc47   :  { %3045 = vmatpush3.bf16.msra.mxu0 %v3746_v5 }
 0xc48   :  { %3058 = vmatprep.subr.bf16.mxu0 %v3420_v0 }
 0xca2   :  { %v2210_v47 = vpop.f32.mrb[24].mxu1 }
 0xd15   :  { %v1800_v49 = vpop.f32.mrb[20].mxu0 }
 0xd16   :  { %v1891_v50 = vadd.f32 %v1890_v43, %v1800_v49  ;;  %v3032_v51 = vpop.f32.mrb[21].mxu0  ;;  %v3225_v43 = vld [vmem:[#allocation10 + $0x8] sm:$0xff]   ;;  %v3056_v49 = vpop.f32.mrb[25].mxu1 }
 0xd17   :  { %v1803_v52 = vpop.f32.mrb[22].mxu0  ;;  %3069 = vmatpush3.bf16.msra.mxu1 %v3225_v43 }
 0xd18   :  { %v1896_v53 = vadd.f32 %v3592_v45, %v1891_v50  ;;  %v3033_v1 = vpop.f32.mrb[23].mxu0  ;;  %v2213_v50 = vpop.f32.mrb[26].mxu1 }
 0xd19   :  { %v3057_v51 = vpop.f32.mrb[27].mxu1 }
 0xd1a   :  { %v2863_v54 = vmul.f32 -1.442695, %v1896_v53  ;;  %3198 = vtanh.f32 %v1896_v53 }
 0xd1c   :  { %3200 = vpow2.f32 %v2863_v54 }
 0xd24   :  { %v3199_v55 = vpop.eup %3198 }
 0xd25   :  { %1905 = vrot.lane.b32.xlu0 %v3199_v55, %s3416_s28 }
 0xd26   :  { %v3201_v56 = vpop.eup %3200 }
 0xd27   :  { %v1900_v3 = vadd.f32 1.0, %v3201_v56 }
 0xd29   :  { %3202 = vrcp.f32 %v1900_v3 }
 0xd33   :  { %v3203_v57 = vpop.eup %3202 }
 0xd34   :  { %v1913_v59 = vmul.f32 %v3203_v57, %v1911_v58 }
 0xd36   :  { %1915 = vrot.lane.b32.xlu1 %v1913_v59, %s3423_s22 }
 0xd97   :  { %v1906_v60 = vpop.permute.xlu0 %1905 }
 0xd98   :  { %v1908_v61 = vmul.f32 %v3203_v57, %v1906_v60 }
 0xda8   :  { %v1916_v62 = vpop.permute.xlu1 %1915 }
 0xda9   :  { %v1918_v63 = vadd.f32 %v1916_v62, %v1908_v61 }
 0xdab   :  { %3204 = vtanh.f32 %v1918_v63 }
 0xdb5   :  { %v3205_v17 = vpop.eup %3204 }
 0xdb6   :  { %1921 = vrot.lane.b32.xlu0 %v3205_v17, %s3423_s22  ;;  %v2475_v17 = vunpack.c.l.b16 %v3154_v8 }
 0xdb8   :  { %v2486_v25 = vrot.slane %v2475_v17, 3 }
 0xdba   :  { %2230 = vrot.lane.b32.xlu0 %v1918_v63, %s3422_s4 }
 0xe28   :  { %v1922_v44 = vpop.permute.xlu0 %1921 }
 0xe29   :  { %v1924_v2 = vmul.f32 %v3203_v57, %v1922_v44 }
 0xe2b   :  { %v3767_v46 = vpack.c.bf16 %v1924_v2, %v1924_v2 }
 0xe2d   :  { %2081 = vrot.lane.b32.xlu1 %v3767_v46, %s3422_s4 }
 0xe9f   :  { %v2082_v52 = vpop.permute.xlu1 %2081 }
 0xea0   :  { %3047 = vmatmul.mubr.msk.bf16.vlgmr.msra.gmra.mrb[24].mxu0 %vm98_vm1, %v2082_v52  ;;  %v3424_v52 = vmov 1966171168  }
 0xea1   :  { %3059 = vmatpush3.bf16.msra.mxu0 %v3740_v48  ;;  %3062 = vmatprep.mubr.msk.bf16.mxu0 %vm3421_vm0, %v3420_v0  ;;  %vm4031_vm0 = vmand %vm1085_vm14, %vm1086_vm15 }
 0xea2   :  { %3060 = vmatprep.subr.bf16.mxu0 %v3420_v0  ;;  %v2231_v0 = vpop.permute.xlu0 %2230 }
 0xea5   :  { %3061 = vmatpush3.bf16.msra.mxu0 %v3746_v5 }
 0xf73   :  { %v2120_v35 = vpop.f32.mrb[24].mxu0 }
 0xf74   :  { %v2211_v53 = vadd.f32 %v2210_v47, %v2120_v35  ;;  %v3048_v1 = vpop.f32.mrb[25].mxu0  ;;  %v325_v35 = vunpack.c.l.s4 %v3424_v52 }
 0xf75   :  { %v2123_v54 = vpop.f32.mrb[26].mxu0 }
 0xf76   :  { %v2216_v55 = vadd.f32 %v3592_v45, %v2211_v53  ;;  %v3049_v56 = vpop.f32.mrb[27].mxu0  ;;  %v3150_v45 = vld [vmem:[#allocation4] ss:$0 sps:$4 sm:$0x88]   ;;  %v327_v53 = vlaneseq  ;;  %v326_v1 = vunpack.c.0.s8 %v325_v35 }
 0xf77   :  { %v2471_v10 = vunpack.c.l.b16 %v3150_v45 }
 0xf78   :  { %v2878_v3 = vmul.f32 -1.442695, %v2216_v55  ;;  %3206 = vtanh.f32 %v2216_v55  ;;  %v328_v54 = vshrl.u32 %v327_v53, 7 }
 0xf79   :  { %v2479_v19 = vrot.slane %v2471_v10, 7 }
 0xf7a   :  { %3208 = vpow2.f32 %v2878_v3  ;;  %v3795_v55 = vsub.s32 %v326_v1, %v328_v54 }
 0xf7b   :  { %v2481_v24 = vsel %vm211_vm2, %v2480_v20, %v2479_v19  ;;  %vm1406_vm2 = vsmask.f32 7942 }
 0xf7c   :  { %v2483_v27 = vsel %vm214_vm3, %v2482_v22, %v2481_v24  ;;  %vm4068_vm3 = vmand %vm1085_vm14, %vm1406_vm2 }
 0xf7d   :  { %v2485_v30 = vsel %vm217_vm4, %v2484_v23, %v2483_v27  ;;  %vm1726_vm4 = vcmask 256002  }
 0xf7e   :  { %v2487_v31 = vsel %vm220_vm5, %v2486_v25, %v2485_v30  ;;  %vm1727_vm5 = vsmask.f32 2304 }
 0xf7f   :  { %v2489_v32 = vsel %vm223_vm6, %v2488_v26, %v2487_v31  ;;  %vm4124_vm6 = vmand %vm1726_vm4, %vm1727_vm5 }
 0xf80   :  { %v2491_v33 = vsel %vm226_vm7, %v2490_v28, %v2489_v32  ;;  %vm2367_vm7 = vcmask 257027  }
 0xf81   :  { %v2492_v34 = vsel %vm229_vm8, %v2478_v29, %v2491_v33  ;;  %vm2368_vm8 = vsmask.f32 3328 }
 0xf82   :  { %v3207_v57 = vpop.eup %3206  ;;  %v2493_v36 = vpack.c.b16 %v2492_v34, %v2492_v34  ;;  %vm4139_vm9 = vmand %vm2367_vm7, %vm2368_vm8 }
 0xf83   :  { %2225 = vrot.lane.b32.xlu1 %v3207_v57, %s3416_s28 }
 0xf84   :  { %v3209_v48 = vpop.eup %3208  ;;  %3071 = vmatmul.mubr.msk.bf16.vlgmr.msra.gmra.mrb[28].mxu1 %vm98_vm1, %v2493_v36 }
 0xf85   :  { %v2220_v58 = vadd.f32 1.0, %v3209_v48  ;;  %v330_v48 = vrot.slane %v3613_v38, %v3795_v55 }
 0xf87   :  { %3210 = vrcp.f32 %v2220_v58 }
 0xf91   :  { %v3211_v59 = vpop.eup %3210 }
 0xf92   :  { %v2233_v60 = vmul.f32 %v3211_v59, %v2231_v0 }
 0xf94   :  { %2235 = vrot.lane.b32.xlu0 %v2233_v60, %s3423_s22 }
 0xff5   :  { %v2226_v5 = vpop.permute.xlu1 %2225 }
 0xff6   :  { %v2228_v61 = vmul.f32 %v3211_v59, %v2226_v5 }
0x1006   :  { %v2236_v62 = vpop.permute.xlu0 %2235 }
0x1007   :  { %v2238_v63 = vadd.f32 %v2236_v62, %v2228_v61  ;;  %v331_v61 = vcombine.high %v330_v48, %v330_v48  ;;  %v338_v62 = vrot.slane %v330_v48, %v3795_v55 }
0x1009   :  { %3212 = vtanh.f32 %v2238_v63  ;;  %v345_v4 = vrot.slane %v331_v61, %v3795_v55  ;;  %v349_v6 = vunpack.i.h.s16 %v338_v62  ;;  %v346_v38 = vcombine.high %v338_v62, %v338_v62 }
0x100a   :  { %v2789_v34 = vpack.i.b16 %v338_v62, %v338_v62 }
0x100b   :  { %v357_v8 = vpack.i.b16 %v349_v6, %v349_v6  ;;  %v351_v9 = vunpack.i.h.s16 %v345_v4  ;;  %v353_v13 = vunpack.i.h.s16 %v346_v38  ;;  %v347_v14 = vcombine.high %v345_v4, %v345_v4 }
0x100d   :  { %v359_v18 = vpack.i.b16 %v351_v9, %v351_v9  ;;  %v361_v19 = vpack.i.b16 %v353_v13, %v353_v13  ;;  %v355_v23 = vunpack.i.h.s16 %v347_v14 }
0x100f   :  { %v363_v25 = vpack.i.b16 %v355_v23, %v355_v23 }
0x1013   :  { %v3213_v15 = vpop.eup %3212 }
0x1014   :  { %2241 = vrot.lane.b32.xlu1 %v3213_v15, %s3423_s22  ;;  %v651_v15 = vrot.slane %v3643_v37, %v3795_v55 }
0x1016   :  { %v652_v20 = vcombine.high %v651_v15, %v651_v15  ;;  %v659_v21 = vrot.slane %v651_v15, %v3795_v55 }
0x1018   :  { %2551 = vrot.lane.b32.xlu1 %v2238_v63, %s3422_s4  ;;  %v3425_v63 = vmov 286326784   ;;  %v3815_v24 = vrot.slane %v652_v20, %v3795_v55  ;;  %v670_v26 = vunpack.i.h.s16 %v659_v21  ;;  %v3819_v27 = vcombine.high %v659_v21, %v659_v21 }
0x1019   :  { %v365_v45 = vunpack.c.l.s4 %v3425_v63  ;;  %v2804_v63 = vpack.i.b16 %v659_v21, %v659_v21 }
0x101a   :  { %v678_v31 = vpack.i.b16 %v670_v26, %v670_v26  ;;  %v672_v32 = vunpack.i.h.s16 %v3815_v24  ;;  %v674_v36 = vunpack.i.h.s16 %v3819_v27  ;;  %v2805_v9 = vpack.i.b16 %v3815_v24, %v3815_v24 }
0x101b   :  { %v366_v7 = vunpack.c.0.s8 %v365_v45  ;;  %v2806_v15 = vpack.i.b16 %v3819_v27, %v3819_v27 }
0x101d   :  { %v3804_v11 = vsub.s32 %v366_v7, %v328_v54  ;;  %v2791_v54 = vpack.i.b16 %v346_v38, %v346_v38 }
0x101f   :  { %v377_v17 = vrot.slane %v357_v8, %v3804_v11  ;;  %v391_v22 = vrot.slane %v359_v18, %v3804_v11  ;;  %v405_v37 = vrot.slane %v361_v19, %v3804_v11  ;;  %v419_v30 = vrot.slane %v363_v25, %v3804_v11 }
0x1020   :  { %v691_v8 = vrot.slane %v2804_v63, %v3804_v11  ;;  %v719_v19 = vrot.slane %v2806_v15, %v3804_v11  ;;  %v1933_v15 = vrot.slane %v3767_v46, %v3795_v55 }
0x1057   :  { %v2531_v2 = vpop.f32.mrb[28].mxu1 }
0x1058   :  { %v3072_v47 = vpop.f32.mrb[29].mxu1 }
0x1059   :  { %v2534_v49 = vpop.f32.mrb[30].mxu1  ;;  %v668_v47 = vcombine.high %v3815_v24, %v3815_v24 }
0x105a   :  { %v3073_v50 = vpop.f32.mrb[31].mxu1  ;;  %v370_v49 = vrot.slane %v2789_v34, %v3804_v11 }
0x105b   :  { %v2790_v50 = vpack.i.b16 %v345_v4, %v345_v4  ;;  %v1292_v4 = vrot.slane %v3703_v41, %v3795_v55  ;;  %v705_v41 = vrot.slane %v2805_v9, %v3804_v11  ;;  %v2807_v20 = vpack.i.b16 %v668_v47, %v668_v47 }
0x105d   :  { %v384_v1 = vrot.slane %v2790_v50, %v3804_v11  ;;  %v733_v23 = vrot.slane %v2807_v20, %v3804_v11  ;;  %v1934_v20 = vcombine.high %v1933_v15, %v1933_v15 }
0x1086   :  { %v2242_v40 = vpop.permute.xlu1 %2241 }
0x1087   :  { %v2244_v43 = vmul.f32 %v3211_v59, %v2242_v40  ;;  %v3226_v59 = vld [vmem:[%s4289_s5] ss:$0 sm:$0xff]  ;;  %v971_v40 = vrot.slane %v3673_v39, %v3795_v55  ;;  %v676_v39 = vunpack.i.h.s16 %v668_v47  ;;  %s3426_s5 = smov [#allocation14]  }
0x1088   :  { %s2745_s25 = sshll.u32 %s3426_s5, 4  ;;  %s2746_s25 = int_to_ptr.vmem [resolvable:$true] %s2745_s25 }
0x1089   :  { %v3790_v44 = vpack.c.bf16 %v2244_v43, %v2244_v43  ;;  %v698_v43 = vrot.slane %v678_v31, %v3804_v11  ;;  %v972_v52 = vcombine.high %v971_v40, %v971_v40  ;;  %v979_v35 = vrot.slane %v971_v40, %v3795_v55  ;;  %s3337_s1 = scalar_lea.vmem %s2746_s25, 128  ;;  %p3342_p13 = scmp.lt.s32.totalorder %s2746_s25, %s2746_s25 }
0x108a   :  { %v2552_v29 = vpop.permute.xlu1 %2551  ;;  %p3338_p12 = scmp.ne.s32.totalorder %s2746_s25, %s3337_s1  ;;  %p3343_p0 = scmp.lt.s32.totalorder %s3337_s1, %s3337_s1 }
0x108b   :  { %2402 = vrot.lane.b32.xlu0 %v3790_v44, %s3422_s4  ;;  %v990_v48 = vunpack.i.h.s16 %v979_v35  ;;  %v2819_v24 = vpack.i.b16 %v979_v35, %v979_v35 }
0x108c   :  { %p3344_p1 = por %p3343_p0, %p3342_p13 }
0x108d   :  { %v1011_v25 = vrot.slane %v2819_v24, %v3804_v11  ;;  %v3963_v24 = vrot.slane %v1934_v20, %v3795_v55 }
0x108e   :  { %p3345_p2 = pnand %p3344_p1, %p3338_p12 }
0x10fd   :  { %v2403_v51 = vpop.permute.xlu0 %2402 }
0x10fe   :  { %3063 = vmatmul.mubr.msk.bf16.vlgmr.msra.gmra.mrb[28].mxu0 %vm98_vm1, %v2403_v51  ;;  %v682_v51 = vpack.i.b16 %v674_v36, %v674_v36 }
0x11d1   :  { %v2441_v56 = vpop.f32.mrb[28].mxu0 }
0x11d2   :  { %v2532_v3 = vadd.f32 %v2531_v2, %v2441_v56  ;;  %v3064_v57 = vpop.f32.mrb[29].mxu0  ;;  %v680_v2 = vpack.i.b16 %v672_v32, %v672_v32  ;;  %v986_v56 = vrot.slane %v972_v52, %v3795_v55 }
0x11d3   :  { %v2444_v58 = vpop.f32.mrb[30].mxu0  ;;  %v684_v57 = vpack.i.b16 %v676_v39, %v676_v39 }
0x11d4   :  { %v2537_v0 = vadd.f32 %v3226_v59, %v2532_v3  ;;  %v3065_v60 = vpop.f32.mrb[31].mxu0  ;;  %v712_v53 = vrot.slane %v680_v2, %v3804_v11  ;;  %v726_v3 = vrot.slane %v682_v51, %v3804_v11  ;;  %v398_v58 = vrot.slane %v2791_v54, %v3804_v11 }
0x11d5   :  { %v2792_v59 = vpack.i.b16 %v347_v14, %v347_v14  ;;  %v740_v60 = vrot.slane %v684_v57, %v3804_v11  ;;  %v992_v61 = vunpack.i.h.s16 %v986_v56  ;;  %v988_v38 = vcombine.high %v986_v56, %v986_v56 }
0x11d6   :  { %v2893_v5 = vmul.f32 -1.442695, %v2537_v0  ;;  %3214 = vtanh.f32 %v2537_v0  ;;  %v987_v0 = vcombine.high %v979_v35, %v979_v35  ;;  %v2820_v26 = vpack.i.b16 %v986_v56, %v986_v56 }
0x11d7   :  { %v412_v62 = vrot.slane %v2792_v59, %v3804_v11  ;;  %v1000_v7 = vpack.i.b16 %v992_v61, %v992_v61  ;;  %v996_v14 = vunpack.i.h.s16 %v988_v38  ;;  %v2822_v32 = vpack.i.b16 %v988_v38, %v988_v38 }
0x11d8   :  { %3216 = vpow2.f32 %v2893_v5  ;;  %v998_v5 = vpack.i.b16 %v990_v48, %v990_v48  ;;  %v994_v45 = vunpack.i.h.s16 %v987_v0  ;;  %v1025_v27 = vrot.slane %v2820_v26, %v3804_v11 }
0x11d9   :  { %v1053_v34 = vrot.slane %v2822_v32, %v3804_v11 }
0x11da   :  { %v1018_v6 = vrot.slane %v998_v5, %v3804_v11  ;;  %v1002_v13 = vpack.i.b16 %v994_v45, %v994_v45 }
0x11e0   :  { %v3215_v10 = vpop.eup %3214 }
0x11e1   :  { %2546 = vrot.lane.b32.xlu0 %v3215_v10, %s3416_s28  ;;  %v1300_v10 = vrot.slane %v1292_v4, %v3795_v55 }
0x11e2   :  { %v3217_v12 = vpop.eup %3216 }
0x11e3   :  { %v2541_v16 = vadd.f32 1.0, %v3217_v12  ;;  %v1032_v12 = vrot.slane %v1000_v7, %v3804_v11  ;;  %v1311_v18 = vunpack.i.h.s16 %v1300_v10  ;;  %v2834_v36 = vpack.i.b16 %v1300_v10, %v1300_v10 }
0x11e4   :  { %v3887_v40 = vcombine.high %v1300_v10, %v1300_v10 }
0x11e5   :  { %3218 = vrcp.f32 %v2541_v16  ;;  %422 = vrot.lane.b32.xlu0 %v377_v17, %s3422_s4  ;;  %v1046_v16 = vrot.slane %v1002_v13, %v3804_v11  ;;  %v1004_v17 = vpack.i.b16 %v996_v14, %v996_v14  ;;  %v1332_v2 = vrot.slane %v2834_v36, %v3804_v11 }
0x11e7   :  { %v1060_v21 = vrot.slane %v1004_v17, %v3804_v11 }
0x11e9   :  { %426 = vrot.lane.b32.xlu0 %v391_v22, %s3422_s4  ;;  %v1319_v22 = vpack.i.b16 %v1311_v18, %v1311_v18 }
0x11ed   :  { %430 = vrot.lane.b32.xlu0 %v405_v37, %s3422_s4  ;;  %v1339_v37 = vrot.slane %v1319_v22, %v3804_v11 }
0x11ef   :  { %v3821_v28 = vpop.eup %3218 }
0x11f0   :  { %v2554_v33 = vmul.f32 %v3821_v28, %v2552_v29  ;;  %v2821_v29 = vpack.i.b16 %v987_v0, %v987_v0 }
0x11f1   :  { %434 = vrot.lane.b32.xlu0 %v419_v30, %s3422_s4  ;;  %v1293_v30 = vcombine.high %v1292_v4, %v1292_v4 }
0x11f2   :  { %2556 = vrot.lane.b32.xlu1 %v2554_v33, %s3423_s22  ;;  %v1039_v31 = vrot.slane %v2821_v29, %v3804_v11 }
0x11f3   :  { %v3883_v33 = vrot.slane %v1293_v30, %v3795_v55 }
0x11f5   :  { %743 = vrot.lane.b32.xlu0 %v698_v43, %s3422_s4  ;;  %v1612_v43 = vrot.slane %v3735_v42, %v3795_v55  ;;  %v2835_v47 = vpack.i.b16 %v3883_v33, %v3883_v33  ;;  %v1309_v35 = vcombine.high %v3883_v33, %v3883_v33  ;;  %v1313_v20 = vunpack.i.h.s16 %v3883_v33 }
0x11f6   :  { %420 = vrot.lane.b32.xlu1 %v370_v49, %s3422_s4  ;;  %v2836_v49 = vpack.i.b16 %v3887_v40, %v3887_v40 }
0x11f7   :  { %v1613_v50 = vcombine.high %v1612_v43, %v1612_v43  ;;  %v3898_v51 = vrot.slane %v1612_v43, %v3795_v55  ;;  %v1346_v52 = vrot.slane %v2835_v47, %v3804_v11  ;;  %v2837_v39 = vpack.i.b16 %v1309_v35, %v1309_v35 }
0x11f9   :  { %747 = vrot.lane.b32.xlu0 %v712_v53, %s3422_s4  ;;  %v3905_v42 = vrot.slane %v1613_v50, %v3795_v55  ;;  %v1360_v53 = vrot.slane %v2836_v49, %v3804_v11  ;;  %v3912_v54 = vcombine.high %v3898_v51, %v3898_v51  ;;  %v1374_v56 = vrot.slane %v2837_v39, %v3804_v11 }
0x11fa   :  { %424 = vrot.lane.b32.xlu1 %v384_v1, %s3422_s4  ;;  %v1631_v1 = vunpack.i.h.s16 %v3898_v51  ;;  %v3986_v50 = vcombine.high %v3963_v24, %v3963_v24  ;;  %v2849_v32 = vpack.i.b16 %v3898_v51, %v3898_v51 }
0x11fb   :  { %v1633_v57 = vunpack.i.h.s16 %v3905_v42  ;;  %v1635_v48 = vunpack.i.h.s16 %v3912_v54 }
0x11fd   :  { %751 = vrot.lane.b32.xlu0 %v726_v3, %s3422_s4  ;;  %v1639_v3 = vpack.i.b16 %v1631_v1, %v1631_v1  ;;  %v1641_v0 = vpack.i.b16 %v1633_v57, %v1633_v57  ;;  %v1643_v5 = vpack.i.b16 %v1635_v48, %v1635_v48 }
0x11fe   :  { %428 = vrot.lane.b32.xlu1 %v398_v58, %s3422_s4  ;;  %v2253_v58 = vrot.slane %v3790_v44, %v3795_v55 }
0x11ff   :  { %v1659_v59 = vrot.slane %v1639_v3, %v3804_v11  ;;  %v1673_v63 = vrot.slane %v1641_v0, %v3804_v11  ;;  %v1687_v4 = vrot.slane %v1643_v5, %v3804_v11  ;;  %v462_v3 = vld [vmem:[#allocation13 + $0x14] sm:$0x1]  ;;  %v468_v0 = vld [vmem:[#allocation13 + $0x1c] sm:$0x1] }
0x1200   :  { %v2254_v61 = vcombine.high %v2253_v58, %v2253_v58 }
0x1201   :  { %755 = vrot.lane.b32.xlu0 %v740_v60, %s3422_s4  ;;  %v3923_v60 = vcombine.high %v3905_v42, %v3905_v42 }
0x1202   :  { %432 = vrot.lane.b32.xlu1 %v412_v62, %s3422_s4  ;;  %v3927_v62 = vrot.slane %v2253_v58, %v3795_v55  ;;  %v3933_v44 = vrot.slane %v2254_v61, %v3795_v55 }
0x1203   :  { %v1637_v45 = vunpack.i.h.s16 %v3923_v60 }
0x1204   :  { %v2272_v7 = vunpack.i.h.s16 %v3927_v62  ;;  %v2274_v9 = vunpack.i.h.s16 %v3933_v44  ;;  %v3942_v10 = vcombine.high %v3927_v62, %v3927_v62 }
0x1205   :  { %1063 = vrot.lane.b32.xlu0 %v1018_v6, %s3422_s4  ;;  %v1645_v6 = vpack.i.b16 %v1637_v45, %v1637_v45 }
0x1206   :  { %741 = vrot.lane.b32.xlu1 %v691_v8, %s3422_s4  ;;  %v2280_v8 = vpack.i.b16 %v2272_v7, %v2272_v7  ;;  %v2282_v13 = vpack.i.b16 %v2274_v9, %v2274_v9  ;;  %v2276_v14 = vunpack.i.h.s16 %v3942_v10  ;;  %v2879_v7 = vpack.i.b16 %v3927_v62, %v3927_v62  ;;  %v1100_v62 = vld [vmem:[#allocation13 + $0x10] sm:$0x2] }
0x1207   :  { %v1701_v38 = vrot.slane %v1645_v6, %v3804_v11 }
0x1208   :  { %v2284_v17 = vpack.i.b16 %v2276_v14, %v2276_v14 }
0x1209   :  { %1067 = vrot.lane.b32.xlu0 %v1032_v12, %s3422_s4  ;;  %v2300_v12 = vrot.slane %v2280_v8, %v3804_v11 }
0x120a   :  { %745 = vrot.lane.b32.xlu1 %v705_v41, %s3422_s4  ;;  %v3949_v41 = vcombine.high %v3933_v44, %v3933_v44  ;;  %v2328_v22 = vrot.slane %v2284_v17, %v3804_v11 }
0x120c   :  { %v2278_v18 = vunpack.i.h.s16 %v3949_v41 }
0x120d   :  { %1071 = vrot.lane.b32.xlu0 %v1046_v16, %s3422_s4  ;;  %v2314_v16 = vrot.slane %v2282_v13, %v3804_v11 }
0x120e   :  { %749 = vrot.lane.b32.xlu1 %v719_v19, %s3422_s4  ;;  %v1317_v19 = vunpack.i.h.s16 %v1309_v35 }
0x1211   :  { %1075 = vrot.lane.b32.xlu0 %v1060_v21, %s3422_s4  ;;  %v3958_v21 = vrot.slane %v1933_v15, %v3795_v55  ;;  %v453_v15 = vld [vmem:[#allocation13 + $0x8] sm:$0x1] }
0x1212   :  { %753 = vrot.lane.b32.xlu1 %v733_v23, %s3422_s4  ;;  %v2286_v23 = vpack.i.b16 %v2278_v18, %v2278_v18 }
0x1214   :  { %v2342_v46 = vrot.slane %v2286_v23, %v3804_v11  ;;  %v459_v23 = vld [vmem:[#allocation13 + $0x10] sm:$0x1] }
0x1215   :  { %1384 = vrot.lane.b32.xlu0 %v1339_v37, %s3422_s4  ;;  %v1325_v37 = vpack.i.b16 %v1317_v19, %v1317_v19 }
0x1216   :  { %1061 = vrot.lane.b32.xlu1 %v1011_v25, %s3422_s4  ;;  %v1952_v25 = vunpack.i.h.s16 %v3958_v21 }
0x1217   :  { %v1381_v29 = vrot.slane %v1325_v37, %v3804_v11 }
0x1218   :  { %v1960_v30 = vpack.i.b16 %v1952_v25, %v1952_v25 }
0x121a   :  { %1065 = vrot.lane.b32.xlu1 %v1025_v27, %s3422_s4  ;;  %v3970_v27 = vcombine.high %v3958_v21, %v3958_v21  ;;  %v1980_v47 = vrot.slane %v1960_v30, %v3804_v11  ;;  %v1321_v30 = vpack.i.b16 %v1313_v20, %v1313_v20 }
0x121c   :  { %v1956_v43 = vunpack.i.h.s16 %v3970_v27 }
0x121e   :  { %1069 = vrot.lane.b32.xlu1 %v1039_v31, %s3422_s4  ;;  %v1954_v31 = vunpack.i.h.s16 %v3963_v24  ;;  %v1964_v1 = vpack.i.b16 %v1956_v43, %v1956_v43 }
0x1220   :  { %v1962_v49 = vpack.i.b16 %v1954_v31, %v1954_v31  ;;  %v2008_v58 = vrot.slane %v1964_v1, %v3804_v11  ;;  %v1315_v31 = vunpack.i.h.s16 %v3887_v40 }
0x1222   :  { %1073 = vrot.lane.b32.xlu1 %v1053_v34, %s3422_s4  ;;  %v450_v34 = vld [vmem:[#allocation13 + $0x4] sm:$0x1]  ;;  %v1994_v39 = vrot.slane %v1962_v49, %v3804_v11  ;;  %v1323_v40 = vpack.i.b16 %v1315_v31, %v1315_v31  ;;  %v1094_v31 = vld [vmem:[#allocation13 + $0x8] sm:$0x2] }
0x1226   :  { %1382 = vrot.lane.b32.xlu1 %v1332_v2, %s3422_s4 }
0x122a   :  { %1386 = vrot.lane.b32.xlu1 %v1346_v52, %s3422_s4  ;;  %v456_v52 = vld [vmem:[#allocation13 + $0xc] sm:$0x1] }
0x122e   :  { %1390 = vrot.lane.b32.xlu1 %v1360_v53, %s3422_s4 }
0x1232   :  { %1394 = vrot.lane.b32.xlu1 %v1374_v56, %s3422_s4  ;;  %v1958_v56 = vunpack.i.h.s16 %v3986_v50 }
0x1236   :  { %1704 = vrot.lane.b32.xlu1 %v1659_v59, %s3422_s4  ;;  %v1966_v59 = vpack.i.b16 %v1958_v56, %v1958_v56 }
0x123a   :  { %1708 = vrot.lane.b32.xlu1 %v1673_v63, %s3422_s4 }
0x123e   :  { %1712 = vrot.lane.b32.xlu1 %v1687_v4, %s3422_s4  ;;  %v2022_v4 = vrot.slane %v1966_v59, %v3804_v11  ;;  %v1097_v59 = vld [vmem:[#allocation13 + $0xc] sm:$0x2] }
0x1242   :  { %1716 = vrot.lane.b32.xlu1 %v1701_v38, %s3422_s4  ;;  %v447_v38 = vld [vmem:[#allocation13] sm:$0x1] }
0x1246   :  { %2345 = vrot.lane.b32.xlu1 %v2300_v12, %s3422_s4 }
0x124a   :  { %2349 = vrot.lane.b32.xlu1 %v2314_v16, %s3422_s4 }
0x124e   :  { %2353 = vrot.lane.b32.xlu1 %v2328_v22, %s3422_s4 }
0x1252   :  { %2357 = vrot.lane.b32.xlu1 %v2342_v46, %s3422_s4 }
0x1253   :  { %v2547_v26 = vpop.permute.xlu0 %2546 }
0x1254   :  { %v2549_v5 = vmul.f32 %v3821_v28, %v2547_v26 }
0x1256   :  { %1396 = vrot.lane.b32.xlu1 %v1381_v29, %s3422_s4 }
0x1257   :  { %v423_v36 = vpop.permute.xlu0 %422 }
0x1258   :  { %v451_v2 = vsel %vm3975_vm11, %v423_v36, %v450_v34  ;;  %v465_v36 = vld [vmem:[#allocation13 + $0x18] sm:$0x1] }
0x1259   :  { %452 = vst [vmem:[#allocation13 + $0x4] sm:$0x1] %v451_v2 }
0x125a   :  { %2025 = vrot.lane.b32.xlu1 %v1980_v47, %s3422_s4 }
0x125b   :  { %v427_v35 = vpop.permute.xlu0 %426 }
0x125c   :  { %v457_v53 = vsel %vm3975_vm11, %v427_v35, %v456_v52  ;;  %v1353_v52 = vrot.slane %v1321_v30, %v3804_v11 }
0x125d   :  { %458 = vst [vmem:[#allocation13 + $0xc] sm:$0x1] %v457_v53 }
0x125e   :  { %2029 = vrot.lane.b32.xlu1 %v1994_v39, %s3422_s4  ;;  %v1091_v39 = vld [vmem:[#allocation13 + $0x4] sm:$0x2] }
0x125f   :  { %v431_v57 = vpop.permute.xlu0 %430 }
0x1260   :  { %v463_v48 = vsel %vm3975_vm11, %v431_v57, %v462_v3  ;;  %v770_v8 = vld [vmem:[#allocation13 + $0x4] sm:$0x1] }
0x1261   :  { %464 = vst [vmem:[#allocation13 + $0x14] sm:$0x1] %v463_v48  ;;  %v1367_v48 = vrot.slane %v1323_v40, %v3804_v11 }
0x1262   :  { %2033 = vrot.lane.b32.xlu1 %v2008_v58, %s3422_s4 }
0x1263   :  { %v435_v61 = vpop.permute.xlu0 %434 }
0x1264   :  { %v469_v63 = vsel %vm3975_vm11, %v435_v61, %v468_v0  ;;  %v2557_v45 = vpop.permute.xlu1 %2556  ;;  %v776_v16 = vld [vmem:[#allocation13 + $0xc] sm:$0x1] }
0x1265   :  { %470 = vst [vmem:[#allocation13 + $0x1c] sm:$0x1] %v469_v63  ;;  %v2559_v6 = vadd.f32 %v2557_v45, %v2549_v5  ;;  %v1652_v45 = vrot.slane %v2849_v32, %v3804_v11 }
0x1266   :  { %2037 = vrot.lane.b32.xlu1 %v2022_v4, %s3422_s4  ;;  %v2850_v4 = vpack.i.b16 %v3905_v42, %v3905_v42 }
0x1267   :  { %3220 = vtanh.f32 %v2559_v6  ;;  %2719 = vst.msk [vmem:[#allocation3] sm:$0xff] %vm98_vm1, %v2559_v6  ;;  %v744_v9 = vpop.permute.xlu0 %743  ;;  %v1103_v6 = vld [vmem:[#allocation13 + $0x14] sm:$0x2] }
0x1268   :  { %v771_v12 = vsel %vm4003_vm13, %v744_v9, %v770_v8  ;;  %v421_v13 = vpop.permute.xlu1 %420  ;;  %v782_v37 = vld [vmem:[#allocation13 + $0x14] sm:$0x1] }
0x1269   :  { %772 = vst [vmem:[#allocation13 + $0x4] sm:$0x1] %v771_v12  ;;  %v448_v14 = vsel %vm3975_vm11, %v421_v13, %v447_v38  ;;  %v1666_v13 = vrot.slane %v2850_v4, %v3804_v11 }
0x126a   :  { %449 = vst [vmem:[#allocation13] sm:$0x1] %v448_v14  ;;  %v2851_v14 = vpack.i.b16 %v3912_v54, %v3912_v54  ;;  %v2852_v54 = vpack.i.b16 %v3923_v60, %v3923_v60 }
0x126b   :  { %v748_v17 = vpop.permute.xlu0 %747 }
0x126c   :  { %v777_v18 = vsel %vm4003_vm13, %v748_v17, %v776_v16  ;;  %v425_v19 = vpop.permute.xlu1 %424  ;;  %v788_v43 = vld [vmem:[#allocation13 + $0x1c] sm:$0x1]  ;;  %v1680_v20 = vrot.slane %v2851_v14, %v3804_v11  ;;  %v1694_v60 = vrot.slane %v2852_v54, %v3804_v11  ;;  %v2373_v54 = vld [vmem:[#allocation13 + $0x4] sm:$0x8] }
0x126d   :  { %778 = vst [vmem:[#allocation13 + $0xc] sm:$0x1] %v777_v18  ;;  %v454_v22 = vsel %vm3975_vm11, %v425_v19, %v453_v15  ;;  %v1109_v15 = vld [vmem:[#allocation13 + $0x1c] sm:$0x2] }
0x126e   :  { %455 = vst [vmem:[#allocation13 + $0x8] sm:$0x1] %v454_v22  ;;  %v2725_v46 = vld [vmem:[#allocation3] sm:$0xff] }
0x126f   :  { %v752_v25 = vpop.permute.xlu0 %751  ;;  %2726 = vst.msk [vmem:[#allocation16] sm:$0xff] %vm98_vm1, %v2725_v46  ;;  %v1088_v46 = vld [vmem:[#allocation13] sm:$0x2] }
0x1270   :  { %v783_v26 = vsel %vm4003_vm13, %v752_v25, %v782_v37  ;;  %v429_v29 = vpop.permute.xlu1 %428 }
0x1271   :  { %v3221_v34 = vpop.eup %3220  ;;  %784 = vst [vmem:[#allocation13 + $0x14] sm:$0x1] %v783_v26  ;;  %v460_v33 = vsel %vm3975_vm11, %v429_v29, %v459_v23  ;;  %v767_v3 = vld [vmem:[#allocation13] sm:$0x1]  ;;  %v1735_v23 = vld [vmem:[#allocation13 + $0x8] sm:$0x4] }
0x1272   :  { %461 = vst [vmem:[#allocation13 + $0x10] sm:$0x1] %v460_v33  ;;  %2562 = vrot.lane.b32.xlu0 %v3221_v34, %s3423_s22  ;;  %v2293_v33 = vrot.slane %v2879_v7, %v3804_v11 }
0x1273   :  { %v756_v2 = vpop.permute.xlu0 %755 }
0x1274   :  { %v789_v47 = vsel %vm4003_vm13, %v756_v2, %v788_v43  ;;  %v433_v49 = vpop.permute.xlu1 %432 }
0x1275   :  { %790 = vst [vmem:[#allocation13 + $0x1c] sm:$0x1] %v789_v47  ;;  %v466_v35 = vsel %vm3975_vm11, %v433_v49, %v465_v36  ;;  %v773_v61 = vld [vmem:[#allocation13 + $0x8] sm:$0x1]  ;;  %v2880_v36 = vpack.i.b16 %v3933_v44, %v3933_v44  ;;  %v2881_v49 = vpack.i.b16 %v3942_v10, %v3942_v10  ;;  %v1106_v44 = vld [vmem:[#allocation13 + $0x18] sm:$0x2]  ;;  %vm4154_vm11 = vmand %vm1726_vm4, %vm2047_vm10 }
0x1276   :  { %467 = vst [vmem:[#allocation13 + $0x18] sm:$0x1] %v466_v35  ;;  %1388 = vrot.lane.b32.xlu0 %v1353_v52, %s3422_s4 }
0x1277   :  { %v1064_v1 = vpop.permute.xlu0 %1063  ;;  %v2307_v47 = vrot.slane %v2880_v36, %v3804_v11  ;;  %v2321_v35 = vrot.slane %v2881_v49, %v3804_v11 }
0x1278   :  { %v1092_v56 = vsel %vm4031_vm0, %v1064_v1, %v1091_v39  ;;  %v742_v57 = vpop.permute.xlu1 %741  ;;  %v2882_v39 = vpack.i.b16 %v3949_v41, %v3949_v41 }
0x1279   :  { %1093 = vst [vmem:[#allocation13 + $0x4] sm:$0x2] %v1092_v56  ;;  %v768_v58 = vsel %vm4003_vm13, %v742_v57, %v767_v3  ;;  %v779_v9 = vld [vmem:[#allocation13 + $0x10] sm:$0x1]  ;;  %v2864_v57 = vpack.i.b16 %v3958_v21, %v3958_v21 }
0x127a   :  { %769 = vst [vmem:[#allocation13] sm:$0x1] %v768_v58  ;;  %1392 = vrot.lane.b32.xlu0 %v1367_v48, %s3422_s4  ;;  %v2335_v3 = vrot.slane %v2882_v39, %v3804_v11  ;;  %v2865_v58 = vpack.i.b16 %v3963_v24, %v3963_v24 }
0x127b   :  { %v1068_v0 = vpop.permute.xlu0 %1067  ;;  %v1973_v53 = vrot.slane %v2864_v57, %v3804_v11 }
0x127c   :  { %v1098_v5 = vsel %vm4031_vm0, %v1068_v0, %v1097_v59  ;;  %v746_v63 = vpop.permute.xlu1 %745 }
0x127d   :  { %1099 = vst [vmem:[#allocation13 + $0xc] sm:$0x2] %v1098_v5  ;;  %v774_v51 = vsel %vm4003_vm13, %v746_v63, %v773_v61  ;;  %v785_v18 = vld [vmem:[#allocation13 + $0x18] sm:$0x1]  ;;  %v1987_v5 = vrot.slane %v2865_v58, %v3804_v11  ;;  %v2866_v61 = vpack.i.b16 %v3970_v27, %v3970_v27  ;;  %v2382_v27 = vld [vmem:[#allocation13 + $0x10] sm:$0x8] }
0x127e   :  { %775 = vst [vmem:[#allocation13 + $0x8] sm:$0x1] %v774_v51  ;;  %1702 = vrot.lane.b32.xlu0 %v1652_v45, %s3422_s4  ;;  %v2867_v51 = vpack.i.b16 %v3986_v50, %v3986_v50  ;;  %v1738_v50 = vld [vmem:[#allocation13 + $0xc] sm:$0x4] }
0x127f   :  { %v1072_v38 = vpop.permute.xlu0 %1071  ;;  %v2001_v4 = vrot.slane %v2866_v61, %v3804_v11 }
0x1280   :  { %v1104_v8 = vsel %vm4031_vm0, %v1072_v38, %v1103_v6  ;;  %v750_v12 = vpop.permute.xlu1 %749  ;;  %v1411_v37 = vld [vmem:[#allocation13 + $0x4] sm:$0x2]  ;;  %v1732_v38 = vld [vmem:[#allocation13 + $0x4] sm:$0x4] }
0x1281   :  { %1105 = vst [vmem:[#allocation13 + $0x14] sm:$0x2] %v1104_v8  ;;  %v780_v42 = vsel %vm4003_vm13, %v750_v12, %v779_v9  ;;  %v2015_v9 = vrot.slane %v2867_v51, %v3804_v11 }
0x1282   :  { %781 = vst [vmem:[#allocation13 + $0x10] sm:$0x1] %v780_v42  ;;  %1706 = vrot.lane.b32.xlu0 %v1666_v13, %s3422_s4  ;;  %v1744_v42 = vld [vmem:[#allocation13 + $0x14] sm:$0x4] }
0x1283   :  { %v1076_v16 = vpop.permute.xlu0 %1075 }
0x1284   :  { %v1110_v17 = vsel %vm4031_vm0, %v1076_v16, %v1109_v15  ;;  %v754_v19 = vpop.permute.xlu1 %753 }
0x1285   :  { %1111 = vst [vmem:[#allocation13 + $0x1c] sm:$0x2] %v1110_v17  ;;  %v786_v22 = vsel %vm4003_vm13, %v754_v19, %v785_v18  ;;  %v1750_v17 = vld [vmem:[#allocation13 + $0x1c] sm:$0x4]  ;;  %vm4217_vm13 = vmand %vm2367_vm7, %vm2688_vm12 }
0x1286   :  { %787 = vst [vmem:[#allocation13 + $0x18] sm:$0x1] %v786_v22  ;;  %1710 = vrot.lane.b32.xlu0 %v1680_v20, %s3422_s4 }
0x1287   :  { %v1385_v25 = vpop.permute.xlu0 %1384 }
0x1288   :  { %v1412_v26 = vsel %vm4068_vm3, %v1385_v25, %v1411_v37  ;;  %v1062_v29 = vpop.permute.xlu1 %1061  ;;  %v2379_v37 = vld [vmem:[#allocation13 + $0xc] sm:$0x8] }
0x1289   :  { %1413 = vst [vmem:[#allocation13 + $0x4] sm:$0x2] %v1412_v26  ;;  %v1089_v30 = vsel %vm4031_vm0, %v1062_v29, %v1088_v46  ;;  %v2385_v29 = vld [vmem:[#allocation13 + $0x14] sm:$0x8] }
0x128a   :  { %1090 = vst [vmem:[#allocation13] sm:$0x2] %v1089_v30  ;;  %1714 = vrot.lane.b32.xlu0 %v1694_v60, %s3422_s4  ;;  %v2391_v30 = vld [vmem:[#allocation13 + $0x1c] sm:$0x8] }
0x128c   :  { %v1066_v34 = vpop.permute.xlu1 %1065 }
0x128d   :  { %v1095_v43 = vsel %vm4031_vm0, %v1066_v34, %v1094_v31 }
0x128e   :  { %1096 = vst [vmem:[#allocation13 + $0x8] sm:$0x2] %v1095_v43  ;;  %2343 = vrot.lane.b32.xlu0 %v2293_v33, %s3422_s4  ;;  %v1429_v33 = vld [vmem:[#allocation13 + $0x1c] sm:$0x2] }
0x1290   :  { %v1070_v2 = vpop.permute.xlu1 %1069 }
0x1291   :  { %v1101_v52 = vsel %vm4031_vm0, %v1070_v2, %v1100_v62  ;;  %v1408_v10 = vld [vmem:[#allocation13] sm:$0x2] }
0x1292   :  { %1102 = vst [vmem:[#allocation13 + $0x10] sm:$0x2] %v1101_v52  ;;  %2347 = vrot.lane.b32.xlu0 %v2307_v47, %s3422_s4 }
0x1294   :  { %v1074_v40 = vpop.permute.xlu1 %1073 }
0x1295   :  { %v1107_v1 = vsel %vm4031_vm0, %v1074_v40, %v1106_v44  ;;  %v1414_v41 = vld [vmem:[#allocation13 + $0x8] sm:$0x2] }
0x1296   :  { %1108 = vst [vmem:[#allocation13 + $0x18] sm:$0x2] %v1107_v1  ;;  %2351 = vrot.lane.b32.xlu0 %v2321_v35, %s3422_s4 }
0x1298   :  { %v1383_v56 = vpop.permute.xlu1 %1382 }
0x1299   :  { %v1409_v48 = vsel %vm4068_vm3, %v1383_v56, %v1408_v10  ;;  %v1420_v21 = vld [vmem:[#allocation13 + $0x10] sm:$0x2] }
0x129a   :  { %1410 = vst [vmem:[#allocation13] sm:$0x2] %v1409_v48  ;;  %2355 = vrot.lane.b32.xlu0 %v2335_v3, %s3422_s4 }
0x129c   :  { %v1387_v32 = vpop.permute.xlu1 %1386 }
0x129d   :  { %v1415_v59 = vsel %vm4068_vm3, %v1387_v32, %v1414_v41  ;;  %v1426_v24 = vld [vmem:[#allocation13 + $0x18] sm:$0x2]  ;;  %v1417_v32 = vld [vmem:[#allocation13 + $0xc] sm:$0x2] }
0x129e   :  { %1416 = vst [vmem:[#allocation13 + $0x8] sm:$0x2] %v1415_v59  ;;  %2023 = vrot.lane.b32.xlu0 %v1973_v53, %s3422_s4 }
0x12a0   :  { %v1391_v0 = vpop.permute.xlu1 %1390 }
0x12a1   :  { %v1421_v63 = vsel %vm4068_vm3, %v1391_v0, %v1420_v21 }
0x12a2   :  { %1422 = vst [vmem:[#allocation13 + $0x10] sm:$0x2] %v1421_v63  ;;  %2027 = vrot.lane.b32.xlu0 %v1987_v5, %s3422_s4  ;;  %v1423_v5 = vld [vmem:[#allocation13 + $0x14] sm:$0x2] }
0x12a4   :  { %v1395_v45 = vpop.permute.xlu1 %1394 }
0x12a5   :  { %v1427_v6 = vsel %vm4068_vm3, %v1395_v45, %v1426_v24 }
0x12a6   :  { %1428 = vst [vmem:[#allocation13 + $0x18] sm:$0x2] %v1427_v6  ;;  %2031 = vrot.lane.b32.xlu0 %v2001_v4, %s3422_s4  ;;  %v1729_v4 = vld [vmem:[#allocation13] sm:$0x4] }
0x12a8   :  { %v1705_v8 = vpop.permute.xlu1 %1704 }
0x12a9   :  { %v1733_v12 = vsel %vm4124_vm6, %v1705_v8, %v1732_v38 }
0x12aa   :  { %1734 = vst [vmem:[#allocation13 + $0x4] sm:$0x4] %v1733_v12  ;;  %2035 = vrot.lane.b32.xlu0 %v2015_v9, %s3422_s4 }
0x12ac   :  { %v1709_v13 = vpop.permute.xlu1 %1708 }
0x12ad   :  { %v1739_v14 = vsel %vm4124_vm6, %v1709_v13, %v1738_v50 }
0x12ae   :  { %1740 = vst [vmem:[#allocation13 + $0xc] sm:$0x4] %v1739_v14 }
0x12b0   :  { %v1713_v15 = vpop.permute.xlu1 %1712 }
0x12b1   :  { %v1745_v16 = vsel %vm4124_vm6, %v1713_v15, %v1744_v42  ;;  %v2052_v2 = vld [vmem:[#allocation13 + $0x4] sm:$0x4] }
0x12b2   :  { %1746 = vst [vmem:[#allocation13 + $0x14] sm:$0x4] %v1745_v16 }
0x12b4   :  { %v1717_v18 = vpop.permute.xlu1 %1716 }
0x12b5   :  { %v1751_v19 = vsel %vm4124_vm6, %v1717_v18, %v1750_v17  ;;  %v2058_v52 = vld [vmem:[#allocation13 + $0xc] sm:$0x4] }
0x12b6   :  { %1752 = vst [vmem:[#allocation13 + $0x1c] sm:$0x4] %v1751_v19 }
0x12b8   :  { %v2346_v22 = vpop.permute.xlu1 %2345 }
0x12b9   :  { %v2374_v46 = vsel %vm4139_vm9, %v2346_v22, %v2373_v54  ;;  %v2064_v35 = vld [vmem:[#allocation13 + $0x14] sm:$0x4]  ;;  %v1741_v54 = vld [vmem:[#allocation13 + $0x10] sm:$0x4] }
0x12ba   :  { %2375 = vst [vmem:[#allocation13 + $0x4] sm:$0x8] %v2374_v46 }
0x12bc   :  { %v2350_v25 = vpop.permute.xlu1 %2349 }
0x12bd   :  { %v2380_v26 = vsel %vm4139_vm9, %v2350_v25, %v2379_v37  ;;  %v2070_v10 = vld [vmem:[#allocation13 + $0x1c] sm:$0x4] }
0x12be   :  { %2381 = vst [vmem:[#allocation13 + $0xc] sm:$0x8] %v2380_v26 }
0x12c0   :  { %v2354_v60 = vpop.permute.xlu1 %2353 }
0x12c1   :  { %v2386_v7 = vsel %vm4139_vm9, %v2354_v60, %v2385_v29 }
0x12c2   :  { %2387 = vst [vmem:[#allocation13 + $0x14] sm:$0x8] %v2386_v7  ;;  %v1747_v7 = vld [vmem:[#allocation13 + $0x18] sm:$0x4] }
0x12c4   :  { %v2358_v31 = vpop.permute.xlu1 %2357 }
0x12c5   :  { %v2392_v34 = vsel %vm4139_vm9, %v2358_v31, %v2391_v30 }
0x12c6   :  { %2393 = vst [vmem:[#allocation13 + $0x1c] sm:$0x8] %v2392_v34 }
0x12c8   :  { %v1397_v36 = vpop.permute.xlu1 %1396 }
0x12c9   :  { %v1430_v43 = vsel %vm4068_vm3, %v1397_v36, %v1429_v33 }
0x12ca   :  { %1431 = vst [vmem:[#allocation13 + $0x1c] sm:$0x2] %v1430_v43  ;;  %v2370_v43 = vld [vmem:[#allocation13] sm:$0x8] }
0x12cc   :  { %v2026_v47 = vpop.permute.xlu1 %2025 }
0x12cd   :  { %v2053_v49 = vsel %vm4154_vm11, %v2026_v47, %v2052_v2 }
0x12ce   :  { %2054 = vst [vmem:[#allocation13 + $0x4] sm:$0x4] %v2053_v49  ;;  %v2376_v49 = vld [vmem:[#allocation13 + $0x8] sm:$0x8] }
0x12d0   :  { %v2030_v44 = vpop.permute.xlu1 %2029 }
0x12d1   :  { %v2059_v40 = vsel %vm4154_vm11, %v2030_v44, %v2058_v52 }
0x12d2   :  { %2060 = vst [vmem:[#allocation13 + $0xc] sm:$0x4] %v2059_v40 }
0x12d4   :  { %v2034_v39 = vpop.permute.xlu1 %2033 }
0x12d5   :  { %v2065_v1 = vsel %vm4154_vm11, %v2034_v39, %v2064_v35 }
0x12d6   :  { %2066 = vst [vmem:[#allocation13 + $0x14] sm:$0x4] %v2065_v1 }
0x12d8   :  { %v2038_v56 = vpop.permute.xlu1 %2037 }
0x12d9   :  { %v2071_v3 = vsel %vm4154_vm11, %v2038_v56, %v2070_v10 }
0x12da   :  { %2072 = vst [vmem:[#allocation13 + $0x1c] sm:$0x4] %v2071_v3 }
0x12e4   :  { %v2563_v57 = vpop.permute.xlu0 %2562 }
0x12e5   :  { %v2565_v48 = vmul.f32 %v3821_v28, %v2563_v57 }
0x12e7   :  { %v2566_v41 = vpack.c.bf16 %v2565_v48, %v2565_v48  ;;  %2715 = vrot.lane.b32.xlu0 %v2565_v48, %s3422_s4 }
0x12e8   :  { %v1389_v53 = vpop.permute.xlu0 %1388 }
0x12e9   :  { %v2574_v58 = vrot.slane %v2566_v41, %v3795_v55  ;;  %v1418_v59 = vsel %vm4068_vm3, %v1389_v53, %v1417_v32 }
0x12ea   :  { %1419 = vst [vmem:[#allocation13 + $0xc] sm:$0x2] %v1418_v59 }
0x12eb   :  { %v2575_v21 = vcombine.high %v2574_v58, %v2574_v58  ;;  %v2582_v0 = vrot.slane %v2574_v58, %v3795_v55 }
0x12ec   :  { %v1393_v61 = vpop.permute.xlu0 %1392 }
0x12ed   :  { %v2589_v63 = vrot.slane %v2575_v21, %v3795_v55  ;;  %v1424_v28 = vsel %vm4068_vm3, %v1393_v61, %v1423_v5  ;;  %v2894_v24 = vpack.i.b16 %v2582_v0, %v2582_v0  ;;  %v2590_v45 = vcombine.high %v2582_v0, %v2582_v0 }
0x12ee   :  { %1425 = vst [vmem:[#allocation13 + $0x14] sm:$0x2] %v1424_v28  ;;  %v2593_v51 = vunpack.i.h.s16 %v2582_v0 }
0x12ef   :  { %v2614_v6 = vrot.slane %v2894_v24, %v3804_v11  ;;  %v2895_v38 = vpack.i.b16 %v2589_v63, %v2589_v63  ;;  %v2595_v8 = vunpack.i.h.s16 %v2589_v63  ;;  %v2597_v14 = vunpack.i.h.s16 %v2590_v45 }
0x12f0   :  { %v1703_v9 = vpop.permute.xlu0 %1702  ;;  %v2601_v12 = vpack.i.b16 %v2593_v51, %v2593_v51  ;;  %v2591_v42 = vcombine.high %v2589_v63, %v2589_v63  ;;  %v2896_v16 = vpack.i.b16 %v2590_v45, %v2590_v45 }
0x12f1   :  { %v1730_v50 = vsel %vm4124_vm6, %v1703_v9, %v1729_v4  ;;  %2664 = vrot.lane.b32.xlu0 %v2614_v6, %s3422_s4  ;;  %v2603_v13 = vpack.i.b16 %v2595_v8, %v2595_v8  ;;  %v2628_v15 = vrot.slane %v2895_v38, %v3804_v11  ;;  %v2605_v22 = vpack.i.b16 %v2597_v14, %v2597_v14 }
0x12f2   :  { %1731 = vst [vmem:[#allocation13] sm:$0x4] %v1730_v50  ;;  %v2621_v55 = vrot.slane %v2601_v12, %v3804_v11  ;;  %v2599_v46 = vunpack.i.h.s16 %v2591_v42  ;;  %v2642_v37 = vrot.slane %v2896_v16, %v3804_v11  ;;  %v2897_v25 = vpack.i.b16 %v2591_v42, %v2591_v42 }
0x12f3   :  { %v2635_v19 = vrot.slane %v2603_v13, %v3804_v11  ;;  %v2649_v60 = vrot.slane %v2605_v22, %v3804_v11 }
0x12f4   :  { %2666 = vrot.lane.b32.xlu1 %v2621_v55, %s3422_s4  ;;  %v1707_v17 = vpop.permute.xlu0 %1706  ;;  %v2607_v30 = vpack.i.b16 %v2599_v46, %v2599_v46  ;;  %v2656_v31 = vrot.slane %v2897_v25, %v3804_v11 }
0x12f5   :  { %v1736_v18 = vsel %vm4124_vm6, %v1707_v17, %v1735_v23  ;;  %2668 = vrot.lane.b32.xlu0 %v2628_v15, %s3422_s4 }
0x12f6   :  { %1737 = vst [vmem:[#allocation13 + $0x8] sm:$0x4] %v1736_v18  ;;  %v2663_v36 = vrot.slane %v2607_v30, %v3804_v11  ;;  %v2388_v11 = vld [vmem:[#allocation13 + $0x18] sm:$0x8] }
0x12f8   :  { %2670 = vrot.lane.b32.xlu1 %v2635_v19, %s3422_s4  ;;  %v1711_v26 = vpop.permute.xlu0 %1710 }
0x12f9   :  { %v1742_v29 = vsel %vm4124_vm6, %v1711_v26, %v1741_v54  ;;  %2672 = vrot.lane.b32.xlu0 %v2642_v37, %s3422_s4  ;;  %v2049_v10 = vld [vmem:[#allocation13] sm:$0x4] }
0x12fa   :  { %1743 = vst [vmem:[#allocation13 + $0x10] sm:$0x4] %v1742_v29 }
0x12fc   :  { %2674 = vrot.lane.b32.xlu1 %v2649_v60, %s3422_s4  ;;  %v1715_v34 = vpop.permute.xlu0 %1714 }
0x12fd   :  { %v1748_v33 = vsel %vm4124_vm6, %v1715_v34, %v1747_v7  ;;  %2676 = vrot.lane.b32.xlu0 %v2656_v31, %s3422_s4  ;;  %v2055_v57 = vld [vmem:[#allocation13 + $0x8] sm:$0x4] }
0x12fe   :  { %1749 = vst [vmem:[#allocation13 + $0x18] sm:$0x4] %v1748_v33 }
0x1300   :  { %2678 = vrot.lane.b32.xlu1 %v2663_v36, %s3422_s4  ;;  %v2344_v2 = vpop.permute.xlu0 %2343 }
0x1301   :  { %v2371_v47 = vsel %vm4139_vm9, %v2344_v2, %v2370_v43  ;;  %v2061_v32 = vld [vmem:[#allocation13 + $0x10] sm:$0x4] }
0x1302   :  { %2372 = vst [vmem:[#allocation13] sm:$0x8] %v2371_v47 }
0x1304   :  { %v2348_v52 = vpop.permute.xlu0 %2347 }
0x1305   :  { %v2377_v44 = vsel %vm4139_vm9, %v2348_v52, %v2376_v49  ;;  %v2067_v20 = vld [vmem:[#allocation13 + $0x18] sm:$0x4] }
0x1306   :  { %2378 = vst [vmem:[#allocation13 + $0x8] sm:$0x8] %v2377_v44 }
0x1308   :  { %v2352_v40 = vpop.permute.xlu0 %2351 }
0x1309   :  { %v2383_v35 = vsel %vm4139_vm9, %v2352_v40, %v2382_v27  ;;  %v2690_v62 = vld [vmem:[#allocation13] sm:$0x8] }
0x130a   :  { %2384 = vst [vmem:[#allocation13 + $0x10] sm:$0x8] %v2383_v35 }
0x130c   :  { %v2356_v39 = vpop.permute.xlu0 %2355 }
0x130d   :  { %v2389_v1 = vsel %vm4139_vm9, %v2356_v39, %v2388_v11 }
0x130e   :  { %2390 = vst [vmem:[#allocation13 + $0x18] sm:$0x8] %v2389_v1 }
0x1310   :  { %v2024_v56 = vpop.permute.xlu0 %2023 }
0x1311   :  { %v2050_v3 = vsel %vm4154_vm11, %v2024_v56, %v2049_v10 }
0x1312   :  { %2051 = vst [vmem:[#allocation13] sm:$0x4] %v2050_v3 }
0x1314   :  { %v2028_v48 = vpop.permute.xlu0 %2027 }
0x1315   :  { %v2056_v41 = vsel %vm4154_vm11, %v2028_v48, %v2055_v57 }
0x1316   :  { %2057 = vst [vmem:[#allocation13 + $0x8] sm:$0x4] %v2056_v41 }
0x1318   :  { %v2032_v53 = vpop.permute.xlu0 %2031 }
0x1319   :  { %v2062_v58 = vsel %vm4154_vm11, %v2032_v53, %v2061_v32 }
0x131a   :  { %2063 = vst [vmem:[#allocation13 + $0x10] sm:$0x4] %v2062_v58 }
0x131c   :  { %v2036_v59 = vpop.permute.xlu0 %2035 }
0x131d   :  { %v2068_v21 = vsel %vm4154_vm11, %v2036_v59, %v2067_v20 }
0x131e   :  { %2069 = vst [vmem:[#allocation13 + $0x18] sm:$0x4] %v2068_v21 }
0x1359   :  { %v2716_v0 = vpop.permute.xlu0 %2715 }
0x135a   :  { %2718 = vst.msk [vmem:[#allocation2] sm:$0xff] %vm98_vm1, %v2716_v0 }
0x1361   :  { %v2723_v61 = vld [vmem:[#allocation2] sm:$0xff] }
0x1362   :  { %2724 = vst.msk [vmem:[#allocation14] sm:$0xff] %vm98_vm1, %v2723_v61 }
0x1363   :  { %v2665_v63 = vpop.permute.xlu0 %2664 }
0x1364   :  { %3348 = shalt.err (!%p3345_p2)
}
0x1365   :  { %s3349_s0 = scalar_lea.hbm %s4291_s7, 128 }
0x1366   :  { %p3350_p3 = scmp.ne.s32.totalorder %s4291_s7, %s3349_s0  ;;  %p3353_p4 = scmp.lt.u32.totalorder %s3349_s0, %s4291_s7 }
0x1368   :  { %p3355_p5 = pnand %p3353_p4, %p3350_p3 }
0x136a   :  { %3358 = shalt.err (!%p3355_p5)
}
0x136b   :  { %2748 = dma.vmem_to_hbm [thread:$0]  %s2746_s25, 128, %s4291_s7, [#allocation15]   ;;  %v2691_v28 = vsel %vm4217_vm13, %v2665_v63, %v2690_v62 }
0x136c   :  { %s3359_s15 = scalar_lea.vmem %s4221_s27, 128  ;;  %p3364_p7 = scmp.lt.s32.totalorder %s4221_s27, %s4221_s27 }
0x136d   :  { %p3360_p6 = scmp.ne.s32.totalorder %s4221_s27, %s3359_s15  ;;  %p3365_p8 = scmp.lt.s32.totalorder %s3359_s15, %s3359_s15 }
0x136f   :  { %p3366_p9 = por %p3365_p8, %p3364_p7 }
0x1371   :  { %p3367_p10 = pnand %p3366_p9, %p3360_p6 }
0x1373   :  { %3370 = shalt.err (!%p3367_p10)
}
0x1374   :  { %s3371_s3 = scalar_lea.hbm %s4292_s8, 128 }
0x1375   :  { %p3372_p11 = scmp.ne.s32.totalorder %s4292_s8, %s3371_s3  ;;  %p3375_p12 = scmp.lt.u32.totalorder %s3371_s3, %s4292_s8 }
0x1377   :  { %p3377_p13 = pnand %p3375_p12, %p3372_p11 }
0x1379   :  { %3380 = shalt.err (!%p3377_p13)
}
0x137a   :  { %2758 = dma.vmem_to_hbm [thread:$0]  %s4221_s27, 128, %s4292_s8, [#allocation15]   ;;  %2692 = vst [vmem:[#allocation13] sm:$0x8] %v2691_v28  ;;  %v2693_v24 = vld [vmem:[#allocation13 + $0x4] sm:$0x8]  ;;  %v2667_v45 = vpop.permute.xlu1 %2666  ;;  %v2669_v6 = vpop.permute.xlu0 %2668 }
0x137b   :  { %v2694_v4 = vsel %vm4217_vm13, %v2667_v45, %v2693_v24  ;;  %v2696_v51 = vld [vmem:[#allocation13 + $0x8] sm:$0x8]  ;;  %v2699_v8 = vld [vmem:[#allocation13 + $0xc] sm:$0x8]  ;;  %v2702_v50 = vld [vmem:[#allocation13 + $0x10] sm:$0x8] }
0x137c   :  { %2695 = vst [vmem:[#allocation13 + $0x4] sm:$0x8] %v2694_v4  ;;  %v2697_v38 = vsel %vm4217_vm13, %v2669_v6, %v2696_v51  ;;  %v2705_v13 = vld [vmem:[#allocation13 + $0x14] sm:$0x8]  ;;  %v2708_v15 = vld [vmem:[#allocation13 + $0x18] sm:$0x8] }
0x137d   :  { %2698 = vst [vmem:[#allocation13 + $0x8] sm:$0x8] %v2697_v38  ;;  %s3428_s8 = smov [#allocation13]   ;;  %v2711_v18 = vld [vmem:[#allocation13 + $0x1c] sm:$0x8] }
0x137e   :  { %v2671_v9 = vpop.permute.xlu1 %2670  ;;  %v2673_v55 = vpop.permute.xlu0 %2672  ;;  %s2732_s22 = sshll.u32 %s3428_s8, 4  ;;  %s2733_s22 = int_to_ptr.vmem [resolvable:$true] %s2732_s22 }
0x137f   :  { %v2700_v12 = vsel %vm4217_vm13, %v2671_v9, %v2699_v8  ;;  %v2703_v23 = vsel %vm4217_vm13, %v2673_v55, %v2702_v50  ;;  %s3381_s23 = scalar_lea.vmem %s2733_s22, 512  ;;  %p3386_p1 = scmp.lt.s32.totalorder %s2733_s22, %s2733_s22 }
0x1380   :  { %2701 = vst [vmem:[#allocation13 + $0xc] sm:$0x8] %v2700_v12  ;;  %2704 = vst [vmem:[#allocation13 + $0x10] sm:$0x8] %v2703_v23  ;;  %p3382_p0 = scmp.ne.s32.totalorder %s2733_s22, %s3381_s23  ;;  %p3387_p2 = scmp.lt.s32.totalorder %s3381_s23, %s3381_s23 }
0x1382   :  { %v2675_v14 = vpop.permute.xlu1 %2674  ;;  %v2677_v16 = vpop.permute.xlu0 %2676  ;;  %p3388_p3 = por %p3387_p2, %p3386_p1 }
0x1383   :  { %v2706_v42 = vsel %vm4217_vm13, %v2675_v14, %v2705_v13  ;;  %v2709_v17 = vsel %vm4217_vm13, %v2677_v16, %v2708_v15 }
0x1384   :  { %2707 = vst [vmem:[#allocation13 + $0x14] sm:$0x8] %v2706_v42  ;;  %2710 = vst [vmem:[#allocation13 + $0x18] sm:$0x8] %v2709_v17  ;;  %p3389_p4 = pnand %p3388_p3, %p3382_p0 }
0x1386   :  { %v2679_v19 = vpop.permute.xlu1 %2678 }
0x1387   :  { %v2712_v54 = vsel %vm4217_vm13, %v2679_v19, %v2711_v18 }
0x1388   :  { %2713 = vst [vmem:[#allocation13 + $0x1c] sm:$0x8] %v2712_v54 }
0x1389   :  { %3392 = shalt.err (!%p3389_p4)
}
0x138a   :  { %s3393_s25 = scalar_lea.hbm %s4290_s6, 512 }
0x138b   :  { %p3394_p5 = scmp.ne.s32.totalorder %s4290_s6, %s3393_s25  ;;  %p3397_p6 = scmp.lt.u32.totalorder %s3393_s25, %s4290_s6 }
0x138d   :  { %p3399_p7 = pnand %p3397_p6, %p3394_p5 }
0x138f   :  { %3402 = shalt.err (!%p3399_p7)
}
0x1390   :  { %2738 = dma.vmem_to_hbm [thread:$0]  %s2733_s22, 512, %s4290_s6, [#allocation6], %s3416_s28, %s3416_s28, %s3417_s29  }
0x1391   :  { %3409 = dma.done.wait [#allocation6], 512  }
0x1392   :  { %3410 = vsyncadd [#allocation6], 4294966784 }
0x1393   :  { %3411 = dma.done.wait [#allocation15], 256  }
0x1394   :  { %3412 = vsyncadd [#allocation15], 4294967040 }
0x1395   :  { %2768 = vsyncpa [#allocation5], 1 }
0x1396   :  { %2769 = vsyncpa [#allocation8], 1 }
0x1397   :  { %2770 = vsyncpa [#allocation11], 1 }
0x1398   :  { %2771 = vsyncpa [#allocation6], 1 }
0x1399   :  { %2772 = vsyncpa [#allocation15], 1 }

// kernel: tpu_custom_call.1
= control target key start
LH: loop header
LB: loop body
LE: loop exit
PB: predicated region body
PF: predicated region fallthrough
CT: control target
= control target key end

     0   :  { %14 = vsyncpa [#allocation5], 0  ;;  %s4284_s0 = inlined_call_operand.hbm [shape: bf16[8,8,32], index: 0, kind: input, shape index: {}]   ;;  %s4285_s1 = inlined_call_operand.hbm [shape: f32[8,32], index: 1, kind: input, shape index: {}]   ;;  %s4286_s2 = inlined_call_operand.hbm [shape: f32[8,32], index: 2, kind: input, shape index: {}]   ;;  %s4287_s3 = inlined_call_operand.hbm [shape: bf16[32,128], index: 3, kind: input, shape index: {}]   ;;  %s4288_s4 = inlined_call_operand.hbm [shape: bf16[32,128], index: 4, kind: input, shape index: {}]   ;;  %s4289_s5 = inlined_call_operand.vmem [shape: f32[1,128], index: 5, kind: input, shape index: {}]   ;;  %s4290_s6 = inlined_call_operand.hbm [shape: bf16[8,8,32], index: 6, kind: output, shape index: {0}]   ;;  %s4291_s7 = inlined_call_operand.hbm [shape: f32[8,32], index: 7, kind: output, shape index: {1}]   ;;  %s4292_s8 = inlined_call_operand.hbm [shape: f32[8,32], index: 8, kind: output, shape index: {2}]  }
   0x1   :  { %15 = vsyncpa [#allocation8], 0 }
   0x2   :  { %16 = vsyncpa [#allocation11], 0 }
   0x3   :  { %17 = vsyncpa [#allocation6], 0 }
   0x4   :  { %18 = vsyncpa [#allocation15], 0  ;;  %s3413_s27 = smov [#allocation7]   ;;  %s3227_s9 = scalar_lea.hbm %s4285_s1, 128 }
   0x5   :  { %s37_s28 = sshll.u32 %s3413_s27, 4  ;;  %p3228_p0 = scmp.ne.s32.totalorder %s4285_s1, %s3227_s9  ;;  %s38_s28 = int_to_ptr.vmem [resolvable:$true] %s37_s28 }
   0x6   :  { %p3231_p1 = scmp.lt.u32.totalorder %s3227_s9, %s4285_s1 }
   0x8   :  { %p3233_p2 = pnand %p3231_p1, %p3228_p0 }
   0xa   :  { %3236 = shalt.err (!%p3233_p2)
}
   0xb   :  { %s3237_s14 = scalar_lea.vmem %s38_s28, 128  ;;  %p3242_p4 = scmp.lt.s32.totalorder %s38_s28, %s38_s28 }
   0xc   :  { %p3238_p3 = scmp.ne.s32.totalorder %s38_s28, %s3237_s14  ;;  %p3243_p5 = scmp.lt.s32.totalorder %s3237_s14, %s3237_s14 }
   0xe   :  { %p3244_p6 = por %p3243_p5, %p3242_p4 }
  0x10   :  { %p3245_p7 = pnand %p3244_p6, %p3238_p3 }
  0x12   :  { %3248 = shalt.err (!%p3245_p7)
}
  0x13   :  { %40 = dma.hbm_to_vmem [thread:$0]  %s4285_s1, 128, %s38_s28, [#allocation8]  }
  0x14   :  { %s3414_s17 = smov [#allocation10]   ;;  %s3415_s19 = smov [#allocation4]  }
  0x15   :  { %s56_s18 = sshll.u32 %s3414_s17, 4  ;;  %s24_s20 = sshll.u32 %s3415_s19, 4  ;;  %s57_s18 = int_to_ptr.vmem [resolvable:$true] %s56_s18  ;;  %s25_s20 = int_to_ptr.vmem [resolvable:$true] %s24_s20 }
  0x16   :  { %s3249_s23 = scalar_lea.hbm %s4287_s3, 256 }
  0x17   :  { %p3250_p8 = scmp.ne.s32.totalorder %s4287_s3, %s3249_s23  ;;  %p3253_p9 = scmp.lt.u32.totalorder %s3249_s23, %s4287_s3 }
  0x19   :  { %p3255_p10 = pnand %p3253_p9, %p3250_p8 }
  0x1b   :  { %3258 = shalt.err (!%p3255_p10)
}
  0x1c   :  { %s3259_s1 = scalar_lea.vmem %s57_s18, 256  ;;  %p3264_p12 = scmp.lt.s32.totalorder %s57_s18, %s57_s18 }
  0x1d   :  { %p3260_p11 = scmp.ne.s32.totalorder %s57_s18, %s3259_s1  ;;  %p3265_p13 = scmp.lt.s32.totalorder %s3259_s1, %s3259_s1 }
  0x1f   :  { %p3266_p0 = por %p3265_p13, %p3264_p12 }
  0x21   :  { %p3267_p1 = pnand %p3266_p0, %p3260_p11 }
  0x23   :  { %3270 = shalt.err (!%p3267_p1)
}
  0x24   :  { %s3416_s28 = smov 64   ;;  %s3417_s29 = smov 4  }
  0x25   :  { %62 = dma.hbm_to_vmem [thread:$0]  %s4287_s3, 256, %s57_s18, [#allocation11], %s3416_s28, %s3416_s28, %s3417_s29  }
  0x26   :  { %s3271_s12 = scalar_lea.hbm %s4284_s0, 512 }
  0x27   :  { %p3272_p2 = scmp.ne.s32.totalorder %s4284_s0, %s3271_s12  ;;  %p3275_p3 = scmp.lt.u32.totalorder %s3271_s12, %s4284_s0 }
  0x29   :  { %p3277_p4 = pnand %p3275_p3, %p3272_p2 }
  0x2b   :  { %3280 = shalt.err (!%p3277_p4)
}
  0x2c   :  { %s3281_s17 = scalar_lea.vmem %s25_s20, 512  ;;  %p3286_p6 = scmp.lt.s32.totalorder %s25_s20, %s25_s20 }
  0x2d   :  { %p3282_p5 = scmp.ne.s32.totalorder %s25_s20, %s3281_s17  ;;  %p3287_p7 = scmp.lt.s32.totalorder %s3281_s17, %s3281_s17 }
  0x2f   :  { %p3288_p8 = por %p3287_p7, %p3286_p6 }
  0x31   :  { %p3289_p9 = pnand %p3288_p8, %p3282_p5 }
  0x33   :  { %3292 = shalt.err (!%p3289_p9)
}
  0x34   :  { %30 = dma.hbm_to_vmem [thread:$0]  %s4284_s0, 512, %s25_s20, [#allocation5], %s3416_s28, %s3416_s28, %s3417_s29  }
  0x35   :  { %s3418_s19 = smov [#allocation9]   ;;  %s3419_s22 = smov [#allocation12]  }
  0x36   :  { %s47_s21 = sshll.u32 %s3418_s19, 4  ;;  %s68_s23 = sshll.u32 %s3419_s22, 4  ;;  %s48_s21 = int_to_ptr.vmem [resolvable:$true] %s47_s21  ;;  %s69_s23 = int_to_ptr.vmem [resolvable:$true] %s68_s23 }
  0x37   :  { %s3293_s26 = scalar_lea.hbm %s4286_s2, 128 }
  0x38   :  { %p3294_p10 = scmp.ne.s32.totalorder %s4286_s2, %s3293_s26  ;;  %p3297_p11 = scmp.lt.u32.totalorder %s3293_s26, %s4286_s2 }
  0x3a   :  { %p3299_p12 = pnand %p3297_p11, %p3294_p10 }
  0x3c   :  { %3302 = shalt.err (!%p3299_p12)
}
  0x3d   :  { %s3303_s0 = scalar_lea.vmem %s48_s21, 128  ;;  %p3308_p0 = scmp.lt.s32.totalorder %s48_s21, %s48_s21 }
  0x3e   :  { %p3304_p13 = scmp.ne.s32.totalorder %s48_s21, %s3303_s0  ;;  %p3309_p1 = scmp.lt.s32.totalorder %s3303_s0, %s3303_s0 }
  0x40   :  { %p3310_p2 = por %p3309_p1, %p3308_p0 }
  0x42   :  { %p3311_p3 = pnand %p3310_p2, %p3304_p13 }
  0x44   :  { %3314 = shalt.err (!%p3311_p3)
}
  0x45   :  { %50 = dma.hbm_to_vmem [thread:$0]  %s4286_s2, 128, %s48_s21, [#allocation8]  }
  0x46   :  { %s3315_s13 = scalar_lea.hbm %s4288_s4, 256 }
  0x47   :  { %p3316_p4 = scmp.ne.s32.totalorder %s4288_s4, %s3315_s13  ;;  %p3319_p5 = scmp.lt.u32.totalorder %s3315_s13, %s4288_s4 }
  0x49   :  { %p3321_p6 = pnand %p3319_p5, %p3316_p4 }
  0x4b   :  { %3324 = shalt.err (!%p3321_p6)
}
  0x4c   :  { %s3325_s3 = scalar_lea.vmem %s69_s23, 256  ;;  %p3330_p8 = scmp.lt.s32.totalorder %s69_s23, %s69_s23 }
  0x4d   :  { %p3326_p7 = scmp.ne.s32.totalorder %s69_s23, %s3325_s3  ;;  %p3331_p9 = scmp.lt.s32.totalorder %s3325_s3, %s3325_s3 }
  0x4f   :  { %p3332_p10 = por %p3331_p9, %p3330_p8 }
  0x51   :  { %p3333_p11 = pnand %p3332_p10, %p3326_p7 }
  0x53   :  { %3336 = shalt.err (!%p3333_p11)
}
  0x54   :  { %74 = dma.hbm_to_vmem [thread:$0]  %s4288_s4, 256, %s69_s23, [#allocation11], %s3416_s28, %s3416_s28, %s3417_s29  }
  0x55   :  { %3403 = dma.done.wait [#allocation5], 512  }
  0x56   :  { %3404 = vsyncadd [#allocation5], 4294966784 }
  0x57   :  { %3405 = dma.done.wait [#allocation8], 256  }
  0x58   :  { %3406 = vsyncadd [#allocation8], 4294967040 }
  0x59   :  { %3407 = dma.done.wait [#allocation11], 512  }
  0x5a   :  { %3408 = vsyncadd [#allocation11], 4294966784  ;;  %v3420_v0 = vmov 0.0   ;;  %vm3421_vm0 = vmmov 0   ;;  %v3549_v1 = vld [vmem:[#allocation12] sm:$0xff]   ;;  %v3551_v2 = vld [vmem:[#allocation10] sm:$0xff]  }
  0x5b   :  { %2946 = vmatprep.subr.bf16.mxu0 %v3420_v0  ;;  %2954 = vmatprep.subr.bf16.mxu1 %v3420_v0  ;;  %vm98_vm1 = vcmask 261120   ;;  %v3554_v3 = vld [vmem:[#allocation12 + $0x8] sm:$0xff]   ;;  %vm211_vm2 = vcmask 1041409   ;;  %v97_v4 = vld [vmem:[#allocation7] sm:$0xff]  ;;  %vm214_vm3 = vcmask 1042434   ;;  %v3560_v5 = vld [vmem:[#allocation10 + $0x8] sm:$0xff]  }
  0x5c   :  { %2950 = vmatprep.mubr.msk.bf16.mxu0 %vm3421_vm0, %v3420_v0  ;;  %2958 = vmatprep.mubr.msk.bf16.mxu1 %vm3421_vm0, %v3420_v0  ;;  %99 = vst.msk [vmem:[#allocation2] sm:$0xff] %vm98_vm1, %v97_v4  ;;  %vm217_vm4 = vcmask 1043459   ;;  %vm220_vm5 = vcmask 1044484   ;;  %vm223_vm6 = vcmask 1045509   ;;  %vm226_vm7 = vcmask 1046534   ;;  %v100_v22 = vld [vmem:[#allocation9] sm:$0xff] }
  0x5d   :  { %2947 = vmatpush3.bf16.msra.mxu0 %v3549_v1  ;;  %2955 = vmatpush3.bf16.msra.mxu1 %v3551_v2  ;;  %v3094_v6 = vld [vmem:[#allocation4] ss:$0 sps:$4 sm:$0x11]   ;;  %v3095_v7 = vld [vmem:[#allocation4 + $0x4] ss:$0 sps:$4 sm:$0x11]  }
  0x5e   :  { %2948 = vmatprep.subr.bf16.mxu0 %v3420_v0  ;;  %2956 = vmatprep.subr.bf16.mxu1 %v3420_v0  ;;  %v3096_v8 = vld [vmem:[#allocation4 + $0x8] ss:$0 sps:$4 sm:$0x11]   ;;  %v3097_v9 = vld [vmem:[#allocation4 + $0xc] ss:$0 sps:$4 sm:$0x11]   ;;  %v202_v12 = vunpack.c.l.b16 %v3094_v6  ;;  %v203_v13 = vunpack.c.l.b16 %v3095_v7 }
  0x5f   :  { %v3098_v10 = vld [vmem:[#allocation4 + $0x10] ss:$0 sps:$4 sm:$0x11]   ;;  %v3099_v11 = vld [vmem:[#allocation4 + $0x14] ss:$0 sps:$4 sm:$0x11]   ;;  %v204_v16 = vunpack.c.l.b16 %v3096_v8  ;;  %v205_v17 = vunpack.c.l.b16 %v3097_v9 }
  0x60   :  { %v3100_v14 = vld [vmem:[#allocation4 + $0x18] ss:$0 sps:$4 sm:$0x11]   ;;  %v3101_v15 = vld [vmem:[#allocation4 + $0x1c] ss:$0 sps:$4 sm:$0x11]   ;;  %v206_v19 = vunpack.c.l.b16 %v3098_v10  ;;  %v207_v20 = vunpack.c.l.b16 %v3099_v11 }
  0x61   :  { %2949 = vmatpush3.bf16.msra.mxu0 %v3554_v3  ;;  %2957 = vmatpush3.bf16.msra.mxu1 %v3560_v5  ;;  %v210_v21 = vrot.slane %v203_v13, 7  ;;  %vm229_vm8 = vcmask 1047559   ;;  %v208_v24 = vunpack.c.l.b16 %v3100_v14  ;;  %v209_v25 = vunpack.c.l.b16 %v3101_v15  ;;  %101 = vst.msk [vmem:[#allocation3] sm:$0xff] %vm98_vm1, %v100_v22  ;;  %s3422_s4 = smov 32   ;;  %v3592_v45 = vld [vmem:[%s4289_s5] ss:$0 sm:$0xff] }
  0x62   :  { %2962 = vmatprep.subr.bf16.mxu0 %v3420_v0  ;;  %2970 = vmatprep.subr.bf16.mxu1 %v3420_v0  ;;  %v213_v26 = vrot.slane %v204_v16, 6  ;;  %v216_v28 = vrot.slane %v205_v17, 5  ;;  %v219_v29 = vrot.slane %v206_v19, 4  ;;  %v222_v30 = vrot.slane %v207_v20, 3  ;;  %s3423_s22 = smov 96   ;;  %s3427_s26 = smov [#allocation16]  }
  0x63   :  { %v111_v18 = vld [vmem:[#allocation2] sm:$0xff]  ;;  %v212_v27 = vsel %vm211_vm2, %v210_v21, %v202_v12  ;;  %v225_v32 = vrot.slane %v208_v24, 2  ;;  %v228_v33 = vrot.slane %v209_v25, 1  ;;  %v3102_v63 = vld [vmem:[#allocation4] ss:$0 sps:$4 sm:$0x11]  }
  0x64   :  { %v121_v23 = vpack.c.bf16 %v111_v18, %v111_v18  ;;  %v215_v31 = vsel %vm214_vm3, %v213_v26, %v212_v27  ;;  %v3103_v4 = vld [vmem:[#allocation4 + $0x4] ss:$0 sps:$4 sm:$0x11]   ;;  %v3104_v6 = vld [vmem:[#allocation4 + $0x8] ss:$0 sps:$4 sm:$0x11]   ;;  %v548_v10 = vunpack.c.l.b16 %v3102_v63 }
  0x65   :  { %v218_v34 = vsel %vm217_vm4, %v216_v28, %v215_v31  ;;  %v3105_v7 = vld [vmem:[#allocation4 + $0xc] ss:$0 sps:$4 sm:$0x11]   ;;  %v3106_v8 = vld [vmem:[#allocation4 + $0x10] ss:$0 sps:$4 sm:$0x11]   ;;  %v549_v11 = vunpack.c.l.b16 %v3103_v4  ;;  %v550_v14 = vunpack.c.l.b16 %v3104_v6 }
  0x66   :  { %2951 = vmatmul.mubr.msk.bf16.vlgmr.msra.gmra.mrb[0].mxu0 %vm98_vm1, %v121_v23  ;;  %v221_v35 = vsel %vm220_vm5, %v219_v29, %v218_v34  ;;  %v3107_v9 = vld [vmem:[#allocation4 + $0x14] ss:$0 sps:$4 sm:$0x11]   ;;  %v3108_v12 = vld [vmem:[#allocation4 + $0x18] ss:$0 sps:$4 sm:$0x11]   ;;  %v551_v15 = vunpack.c.l.b16 %v3105_v7  ;;  %v552_v17 = vunpack.c.l.b16 %v3106_v8 }
  0x67   :  { %2963 = vmatpush3.bf16.msra.mxu0 %v3549_v1  ;;  %2966 = vmatprep.mubr.msk.bf16.mxu0 %vm3421_vm0, %v3420_v0  ;;  %v224_v36 = vsel %vm223_vm6, %v222_v30, %v221_v35  ;;  %v3109_v13 = vld [vmem:[#allocation4 + $0x1c] ss:$0 sps:$4 sm:$0x11]   ;;  %v553_v18 = vunpack.c.l.b16 %v3107_v9  ;;  %v556_v19 = vrot.slane %v548_v10, 1  ;;  %v554_v20 = vunpack.c.l.b16 %v3108_v12  ;;  %s2755_s27 = sshll.u32 %s3427_s26, 4  ;;  %s4221_s27 = int_to_ptr.vmem [resolvable:$true] %s2755_s27 }
  0x68   :  { %2964 = vmatprep.subr.bf16.mxu0 %v3420_v0  ;;  %v227_v37 = vsel %vm226_vm7, %v225_v32, %v224_v36  ;;  %v112_v39 = vld [vmem:[#allocation3] sm:$0xff]  ;;  %v555_v21 = vunpack.c.l.b16 %v3109_v13  ;;  %v558_v22 = vrot.slane %v550_v14, 7  ;;  %v560_v23 = vrot.slane %v551_v15, 6  ;;  %v3111_v63 = vld [vmem:[#allocation4 + $0x4] ss:$0 sps:$4 sm:$0x22]  }
  0x69   :  { %v230_v38 = vsel %vm229_vm8, %v228_v33, %v227_v37  ;;  %307 = vrot.lane.b32.xlu0 %v112_v39, %s3422_s4  ;;  %v557_v24 = vsel %vm211_vm2, %v549_v11, %v556_v19  ;;  %v562_v25 = vrot.slane %v552_v17, 5  ;;  %v564_v26 = vrot.slane %v553_v18, 4  ;;  %v3112_v4 = vld [vmem:[#allocation4 + $0x8] ss:$0 sps:$4 sm:$0x22]  }
  0x6a   :  { %v231_v40 = vpack.c.b16 %v230_v38, %v230_v38  ;;  %v559_v27 = vsel %vm214_vm3, %v558_v22, %v557_v24  ;;  %v566_v28 = vrot.slane %v554_v20, 3  ;;  %v568_v30 = vrot.slane %v555_v21, 2  ;;  %v3113_v6 = vld [vmem:[#allocation4 + $0xc] ss:$0 sps:$4 sm:$0x22]  }
  0x6b   :  { %2965 = vmatpush3.bf16.msra.mxu0 %v3554_v3  ;;  %v561_v29 = vsel %vm217_vm4, %v560_v23, %v559_v27  ;;  %v3114_v7 = vld [vmem:[#allocation4 + $0x10] ss:$0 sps:$4 sm:$0x22]   ;;  %v3115_v8 = vld [vmem:[#allocation4 + $0x14] ss:$0 sps:$4 sm:$0x22]   ;;  %v869_v10 = vunpack.c.l.b16 %v3111_v63  ;;  %v870_v13 = vunpack.c.l.b16 %v3112_v4  ;;  %v871_v14 = vunpack.c.l.b16 %v3113_v6 }
  0x6c   :  { %2978 = vmatprep.subr.bf16.mxu0 %v3420_v0  ;;  %2959 = vmatmul.mubr.msk.bf16.vlgmr.msra.gmra.mrb[0].mxu1 %vm98_vm1, %v231_v40  ;;  %v563_v31 = vsel %vm220_vm5, %v562_v25, %v561_v29  ;;  %v3116_v11 = vld [vmem:[#allocation4 + $0x18] ss:$0 sps:$4 sm:$0x22]   ;;  %v3117_v12 = vld [vmem:[#allocation4 + $0x1c] ss:$0 sps:$4 sm:$0x22]   ;;  %v873_v17 = vunpack.c.l.b16 %v3115_v8 }
  0x6d   :  { %2971 = vmatpush3.bf16.msra.mxu1 %v3551_v2  ;;  %2974 = vmatprep.mubr.msk.bf16.mxu1 %vm3421_vm0, %v3420_v0  ;;  %v565_v32 = vsel %vm223_vm6, %v564_v26, %v563_v31  ;;  %v877_v19 = vrot.slane %v869_v10, 1  ;;  %v874_v20 = vunpack.c.l.b16 %v3116_v11  ;;  %v875_v21 = vunpack.c.l.b16 %v3117_v12  ;;  %v3119_v63 = vld [vmem:[#allocation4 + $0x4] ss:$0 sps:$4 sm:$0x22]  }
  0x6e   :  { %2972 = vmatprep.subr.bf16.mxu1 %v3420_v0  ;;  %v567_v33 = vsel %vm226_vm7, %v566_v28, %v565_v32  ;;  %v880_v22 = vrot.slane %v871_v14, 7  ;;  %v884_v25 = vrot.slane %v873_v17, 5  ;;  %v3120_v4 = vld [vmem:[#allocation4 + $0x8] ss:$0 sps:$4 sm:$0x22]   ;;  %v1190_v10 = vunpack.c.l.b16 %v3119_v63 }
  0x6f   :  { %v569_v34 = vsel %vm229_vm8, %v568_v30, %v567_v33  ;;  %v886_v27 = vrot.slane %v874_v20, 4  ;;  %v888_v29 = vrot.slane %v875_v21, 3  ;;  %v3121_v6 = vld [vmem:[#allocation4 + $0xc] ss:$0 sps:$4 sm:$0x22]   ;;  %vm444_vm9 = vcmask 253952  }
  0x70   :  { %v570_v35 = vpack.c.b16 %v569_v34, %v569_v34  ;;  %v3123_v8 = vld [vmem:[#allocation4 + $0x14] ss:$0 sps:$4 sm:$0x22]   ;;  %v3124_v11 = vld [vmem:[#allocation4 + $0x18] ss:$0 sps:$4 sm:$0x22]   ;;  %v1192_v14 = vunpack.c.l.b16 %v3121_v6 }
  0x71   :  { %2973 = vmatpush3.bf16.msra.mxu1 %v3560_v5  ;;  %v3125_v12 = vld [vmem:[#allocation4 + $0x1c] ss:$0 sps:$4 sm:$0x22]   ;;  %v1194_v17 = vunpack.c.l.b16 %v3123_v8  ;;  %v1195_v20 = vunpack.c.l.b16 %v3124_v11  ;;  %v3126_v63 = vld [vmem:[#allocation4] ss:$0 sps:$4 sm:$0x44]  }
  0x72   :  { %2986 = vmatprep.subr.bf16.mxu1 %v3420_v0  ;;  %v1196_v21 = vunpack.c.l.b16 %v3125_v12  ;;  %v3128_v6 = vld [vmem:[#allocation4 + $0x8] ss:$0 sps:$4 sm:$0x44]   ;;  %v3130_v8 = vld [vmem:[#allocation4 + $0x10] ss:$0 sps:$4 sm:$0x44]  }
  0x73   :  { %v3132_v12 = vld [vmem:[#allocation4 + $0x18] ss:$0 sps:$4 sm:$0x44]   ;;  %vm445_vm10 = vsmask.f32 256  ;;  %vm1085_vm14 = vcmask 254977  }
  0x74   :  { %2975 = vmatmul.mubr.msk.bf16.vlgmr.msra.gmra.mrb[4].mxu1 %vm98_vm1, %v570_v35  ;;  %vm3975_vm11 = vmand %vm444_vm9, %vm445_vm10  ;;  %vm765_vm12 = vsmask.f32 7938  ;;  %vm1086_vm15 = vsmask.f32 1280  ;;  %vm2047_vm10 = vsmask.f32 7946 }
  0x75   :  { %2987 = vmatpush3.bf16.msra.mxu1 %v3551_v2  ;;  %2990 = vmatprep.mubr.msk.bf16.mxu1 %vm3421_vm0, %v3420_v0  ;;  %vm4003_vm13 = vmand %vm444_vm9, %vm765_vm12  ;;  %vm2688_vm12 = vsmask.f32 7950 }
  0x76   :  { %2988 = vmatprep.subr.bf16.mxu1 %v3420_v0 }
  0x79   :  { %2989 = vmatpush3.bf16.msra.mxu1 %v3560_v5 }
  0x7a   :  { %3002 = vmatprep.subr.bf16.mxu1 %v3420_v0 }
  0xdb   :  { %v308_v56 = vpop.permute.xlu0 %307 }
 0x139   :  { %v172_v41 = vpop.f32.mrb[0].mxu0 }
 0x13a   :  { %v2952_v42 = vpop.f32.mrb[1].mxu0 }
 0x13b   :  { %v175_v43 = vpop.f32.mrb[2].mxu0 }
 0x13c   :  { %v2953_v44 = vpop.f32.mrb[3].mxu0 }
 0x13f   :  { %v281_v46 = vpop.f32.mrb[0].mxu1 }
 0x140   :  { %v282_v47 = vadd.f32 %v281_v46, %v172_v41  ;;  %v2960_v48 = vpop.f32.mrb[1].mxu1 }
 0x141   :  { %v284_v49 = vpop.f32.mrb[2].mxu1 }
 0x142   :  { %v293_v50 = vadd.f32 %v3592_v45, %v282_v47  ;;  %v2961_v51 = vpop.f32.mrb[3].mxu1 }
 0x144   :  { %v2788_v52 = vmul.f32 -1.442695, %v293_v50  ;;  %3158 = vtanh.f32 %v293_v50 }
 0x146   :  { %3160 = vpow2.f32 %v2788_v52 }
 0x147   :  { %v608_v39 = vpop.f32.mrb[4].mxu1 }
 0x148   :  { %v2976_v40 = vpop.f32.mrb[5].mxu1 }
 0x149   :  { %v611_v41 = vpop.f32.mrb[6].mxu1 }
 0x14a   :  { %v2977_v42 = vpop.f32.mrb[7].mxu1 }
 0x14e   :  { %v3159_v53 = vpop.eup %3158 }
 0x14f   :  { %302 = vrot.lane.b32.xlu0 %v3159_v53, %s3416_s28 }
 0x150   :  { %v3161_v54 = vpop.eup %3160 }
 0x151   :  { %v297_v55 = vadd.f32 1.0, %v3161_v54 }
 0x153   :  { %3162 = vrcp.f32 %v297_v55 }
 0x15d   :  { %v3163_v57 = vpop.eup %3162 }
 0x15e   :  { %v310_v58 = vmul.f32 %v3163_v57, %v308_v56 }
 0x160   :  { %312 = vrot.lane.b32.xlu1 %v310_v58, %s3423_s22 }
 0x1c1   :  { %v303_v59 = vpop.permute.xlu0 %302 }
 0x1c2   :  { %v305_v60 = vmul.f32 %v3163_v57, %v303_v59 }
 0x1d2   :  { %v313_v61 = vpop.permute.xlu1 %312 }
 0x1d3   :  { %v315_v62 = vadd.f32 %v313_v61, %v305_v60 }
 0x1d5   :  { %3164 = vtanh.f32 %v315_v62 }
 0x1df   :  { %v3165_v16 = vpop.eup %3164 }
 0x1e0   :  { %318 = vrot.lane.b32.xlu1 %v3165_v16, %s3423_s22  ;;  %v872_v16 = vunpack.c.l.b16 %v3114_v7  ;;  %v3122_v7 = vld [vmem:[#allocation4 + $0x10] ss:$0 sps:$4 sm:$0x22]  }
 0x1e2   :  { %v882_v24 = vrot.slane %v872_v16, 6  ;;  %v1193_v16 = vunpack.c.l.b16 %v3122_v7  ;;  %v3129_v7 = vld [vmem:[#allocation4 + $0xc] ss:$0 sps:$4 sm:$0x44]  }
 0x1e4   :  { %628 = vrot.lane.b32.xlu1 %v315_v62, %s3422_s4  ;;  %v3110_v62 = vld [vmem:[#allocation4] ss:$0 sps:$4 sm:$0x22]  }
 0x1e5   :  { %v868_v9 = vunpack.c.l.b16 %v3110_v62  ;;  %v3118_v62 = vld [vmem:[#allocation4] ss:$0 sps:$4 sm:$0x22]  }
 0x1e7   :  { %v876_v18 = vrot.slane %v868_v9, 2  ;;  %v1189_v9 = vunpack.c.l.b16 %v3118_v62 }
 0x1e9   :  { %v878_v23 = vsel %vm211_vm2, %v877_v19, %v876_v18  ;;  %v1197_v18 = vrot.slane %v1189_v9, 3  ;;  %v1198_v19 = vrot.slane %v1190_v10, 2  ;;  %v3131_v9 = vld [vmem:[#allocation4 + $0x14] ss:$0 sps:$4 sm:$0x44]   ;;  %v1509_v10 = vunpack.c.l.b16 %v3126_v63 }
 0x1ea   :  { %v879_v26 = vsel %vm214_vm3, %v870_v13, %v878_v23  ;;  %v1191_v13 = vunpack.c.l.b16 %v3120_v4  ;;  %v3127_v4 = vld [vmem:[#allocation4 + $0x4] ss:$0 sps:$4 sm:$0x44]  }
 0x1eb   :  { %v881_v28 = vsel %vm217_vm4, %v880_v22, %v879_v26  ;;  %v1199_v23 = vsel %vm211_vm2, %v1198_v19, %v1197_v18  ;;  %v1510_v11 = vunpack.c.l.b16 %v3127_v4  ;;  %v1514_v18 = vunpack.c.l.b16 %v3131_v9  ;;  %v3135_v63 = vld [vmem:[#allocation4 + $0x4] ss:$0 sps:$4 sm:$0x44]   ;;  %v3136_v4 = vld [vmem:[#allocation4 + $0x8] ss:$0 sps:$4 sm:$0x44]  }
 0x1ec   :  { %v883_v30 = vsel %vm220_vm5, %v882_v24, %v881_v28  ;;  %v1200_v22 = vrot.slane %v1191_v13, 1  ;;  %v1203_v24 = vrot.slane %v1193_v16, 7  ;;  %v3133_v13 = vld [vmem:[#allocation4 + $0x1c] ss:$0 sps:$4 sm:$0x44]   ;;  %v1517_v19 = vrot.slane %v1509_v10, 4 }
 0x1ed   :  { %v885_v31 = vsel %vm223_vm6, %v884_v25, %v883_v30  ;;  %v1205_v25 = vrot.slane %v1194_v17, 6  ;;  %v1513_v17 = vunpack.c.l.b16 %v3130_v8  ;;  %v3139_v8 = vld [vmem:[#allocation4 + $0x14] ss:$0 sps:$4 sm:$0x44]   ;;  %v1831_v10 = vunpack.c.l.b16 %v3135_v63 }
 0x1ee   :  { %v887_v32 = vsel %vm226_vm7, %v886_v27, %v885_v31  ;;  %v1201_v26 = vsel %vm214_vm3, %v1200_v22, %v1199_v23  ;;  %v1207_v27 = vrot.slane %v1195_v20, 5  ;;  %v1518_v20 = vrot.slane %v1510_v11, 3  ;;  %v3140_v11 = vld [vmem:[#allocation4 + $0x18] ss:$0 sps:$4 sm:$0x44]  }
 0x1ef   :  { %v889_v33 = vsel %vm229_vm8, %v888_v29, %v887_v32  ;;  %v1202_v28 = vsel %vm217_vm4, %v1192_v14, %v1201_v26  ;;  %v1209_v29 = vrot.slane %v1196_v21, 4  ;;  %v1511_v14 = vunpack.c.l.b16 %v3128_v6  ;;  %v3137_v6 = vld [vmem:[#allocation4 + $0xc] ss:$0 sps:$4 sm:$0x44]  }
 0x1f0   :  { %v890_v34 = vpack.c.b16 %v889_v33, %v889_v33  ;;  %v1204_v30 = vsel %vm220_vm5, %v1203_v24, %v1202_v28  ;;  %v1515_v21 = vunpack.c.l.b16 %v3132_v12  ;;  %v1516_v22 = vunpack.c.l.b16 %v3133_v13  ;;  %v3141_v12 = vld [vmem:[#allocation4 + $0x1c] ss:$0 sps:$4 sm:$0x44]  }
 0x1f1   :  { %v1206_v31 = vsel %vm223_vm6, %v1205_v25, %v1204_v30  ;;  %v1520_v23 = vrot.slane %v1511_v14, 2  ;;  %v1519_v25 = vsel %vm211_vm2, %v1518_v20, %v1517_v19  ;;  %v1525_v26 = vrot.slane %v1514_v18, 7 }
 0x1f2   :  { %2991 = vmatmul.mubr.msk.bf16.vlgmr.msra.gmra.mrb[8].mxu1 %vm98_vm1, %v890_v34  ;;  %v1208_v32 = vsel %vm226_vm7, %v1207_v27, %v1206_v31  ;;  %v1527_v28 = vrot.slane %v1515_v21, 6  ;;  %v1529_v30 = vrot.slane %v1516_v22, 5  ;;  %v1832_v13 = vunpack.c.l.b16 %v3136_v4  ;;  %v3142_v4 = vld [vmem:[#allocation4] ss:$0 sps:$4 sm:$0x88]  }
 0x1f3   :  { %3003 = vmatpush3.bf16.msra.mxu1 %v3551_v2  ;;  %3006 = vmatprep.mubr.msk.bf16.mxu1 %vm3421_vm0, %v3420_v0  ;;  %v1210_v33 = vsel %vm229_vm8, %v1209_v29, %v1208_v32  ;;  %v1521_v27 = vsel %vm214_vm3, %v1520_v23, %v1519_v25  ;;  %v1833_v14 = vunpack.c.l.b16 %v3137_v6  ;;  %v1839_v18 = vrot.slane %v1831_v10, 4  ;;  %v3143_v6 = vld [vmem:[#allocation4 + $0x4] ss:$0 sps:$4 sm:$0x88]  }
 0x1f4   :  { %3004 = vmatprep.subr.bf16.mxu1 %v3420_v0  ;;  %v1211_v34 = vpack.c.b16 %v1210_v33, %v1210_v33  ;;  %v1836_v19 = vunpack.c.l.b16 %v3140_v11  ;;  %v1837_v20 = vunpack.c.l.b16 %v3141_v12  ;;  %v1841_v21 = vrot.slane %v1832_v13, 3  ;;  %v3147_v10 = vld [vmem:[#allocation4 + $0x14] ss:$0 sps:$4 sm:$0x88]  }
 0x1f5   :  { %v1843_v22 = vrot.slane %v1833_v14, 2  ;;  %v1835_v23 = vunpack.c.l.b16 %v3139_v8  ;;  %v3145_v8 = vld [vmem:[#allocation4 + $0xc] ss:$0 sps:$4 sm:$0x88]   ;;  %v2150_v11 = vunpack.c.l.b16 %v3142_v4  ;;  %v2151_v12 = vunpack.c.l.b16 %v3143_v6 }
 0x1f6   :  { %v3148_v13 = vld [vmem:[#allocation4 + $0x18] ss:$0 sps:$4 sm:$0x88]   ;;  %v3149_v14 = vld [vmem:[#allocation4 + $0x1c] ss:$0 sps:$4 sm:$0x88]  }
 0x1f7   :  { %3005 = vmatpush3.bf16.msra.mxu1 %v3560_v5  ;;  %v3151_v4 = vld [vmem:[#allocation4 + $0x4] ss:$0 sps:$4 sm:$0x88]   ;;  %v3152_v6 = vld [vmem:[#allocation4 + $0x8] ss:$0 sps:$4 sm:$0x88]  }
 0x1f8   :  { %3018 = vmatprep.subr.bf16.mxu1 %v3420_v0 }
 0x1fa   :  { %3007 = vmatmul.mubr.msk.bf16.vlgmr.msra.gmra.mrb[12].mxu1 %vm98_vm1, %v1211_v34 }
 0x1fb   :  { %3019 = vmatpush3.bf16.msra.mxu1 %v3551_v2  ;;  %3022 = vmatprep.mubr.msk.bf16.mxu1 %vm3421_vm0, %v3420_v0 }
 0x1fc   :  { %3020 = vmatprep.subr.bf16.mxu1 %v3420_v0 }
 0x1ff   :  { %3021 = vmatpush3.bf16.msra.mxu1 %v3560_v5 }
 0x200   :  { %3034 = vmatprep.subr.bf16.mxu1 %v3420_v0 }
 0x252   :  { %v319_v36 = vpop.permute.xlu1 %318 }
 0x253   :  { %v321_v37 = vmul.f32 %v3163_v57, %v319_v36 }
 0x255   :  { %v3613_v38 = vpack.c.bf16 %v321_v37, %v321_v37 }
 0x256   :  { %v629_v56 = vpop.permute.xlu1 %628 }
 0x257   :  { %479 = vrot.lane.b32.xlu0 %v3613_v38, %s3422_s4 }
 0x2c9   :  { %v480_v43 = vpop.permute.xlu0 %479 }
 0x2ca   :  { %2967 = vmatmul.mubr.msk.bf16.vlgmr.msra.gmra.mrb[4].mxu0 %vm98_vm1, %v480_v43 }
 0x2cb   :  { %2979 = vmatpush3.bf16.msra.mxu0 %v3549_v1  ;;  %2982 = vmatprep.mubr.msk.bf16.mxu0 %vm3421_vm0, %v3420_v0 }
 0x2cc   :  { %2980 = vmatprep.subr.bf16.mxu0 %v3420_v0 }
 0x2cf   :  { %2981 = vmatpush3.bf16.msra.mxu0 %v3554_v3 }
 0x2d0   :  { %2994 = vmatprep.subr.bf16.mxu0 %v3420_v0 }
 0x39d   :  { %v518_v44 = vpop.f32.mrb[4].mxu0 }
 0x39e   :  { %v609_v46 = vadd.f32 %v608_v39, %v518_v44  ;;  %v2968_v47 = vpop.f32.mrb[5].mxu0  ;;  %v928_v39 = vpop.f32.mrb[8].mxu1 }
 0x39f   :  { %v521_v48 = vpop.f32.mrb[6].mxu0  ;;  %v2992_v40 = vpop.f32.mrb[9].mxu1 }
 0x3a0   :  { %v614_v49 = vadd.f32 %v3592_v45, %v609_v46  ;;  %v2969_v50 = vpop.f32.mrb[7].mxu0  ;;  %v931_v41 = vpop.f32.mrb[10].mxu1 }
 0x3a1   :  { %v2993_v42 = vpop.f32.mrb[11].mxu1 }
 0x3a2   :  { %v2803_v51 = vmul.f32 -1.442695, %v614_v49  ;;  %3166 = vtanh.f32 %v614_v49  ;;  %v1249_v40 = vpop.f32.mrb[12].mxu1 }
 0x3a3   :  { %v3008_v41 = vpop.f32.mrb[13].mxu1 }
 0x3a4   :  { %3168 = vpow2.f32 %v2803_v51  ;;  %v1252_v42 = vpop.f32.mrb[14].mxu1 }
 0x3ac   :  { %v3167_v52 = vpop.eup %3166 }
 0x3ad   :  { %623 = vrot.lane.b32.xlu0 %v3167_v52, %s3416_s28 }
 0x3ae   :  { %v3169_v53 = vpop.eup %3168 }
 0x3af   :  { %v618_v54 = vadd.f32 1.0, %v3169_v53 }
 0x3b1   :  { %3170 = vrcp.f32 %v618_v54 }
 0x3bb   :  { %v3171_v55 = vpop.eup %3170 }
 0x3bc   :  { %v631_v57 = vmul.f32 %v3171_v55, %v629_v56 }
 0x3be   :  { %633 = vrot.lane.b32.xlu1 %v631_v57, %s3423_s22 }
 0x41f   :  { %v624_v58 = vpop.permute.xlu0 %623 }
 0x420   :  { %v626_v59 = vmul.f32 %v3171_v55, %v624_v58 }
 0x430   :  { %v634_v60 = vpop.permute.xlu1 %633 }
 0x431   :  { %v636_v61 = vadd.f32 %v634_v60, %v626_v59 }
 0x433   :  { %3172 = vtanh.f32 %v636_v61 }
 0x43d   :  { %v3173_v15 = vpop.eup %3172 }
 0x43e   :  { %639 = vrot.lane.b32.xlu0 %v3173_v15, %s3423_s22 }
 0x442   :  { %948 = vrot.lane.b32.xlu0 %v636_v61, %s3422_s4 }
 0x4b0   :  { %v640_v35 = vpop.permute.xlu0 %639 }
 0x4b1   :  { %v642_v36 = vmul.f32 %v3171_v55, %v640_v35 }
 0x4b3   :  { %v3643_v37 = vpack.c.bf16 %v642_v36, %v642_v36 }
 0x4b4   :  { %v949_v56 = vpop.permute.xlu0 %948 }
 0x4b5   :  { %799 = vrot.lane.b32.xlu1 %v3643_v37, %s3422_s4 }
 0x527   :  { %v800_v43 = vpop.permute.xlu1 %799 }
 0x528   :  { %2983 = vmatmul.mubr.msk.bf16.vlgmr.msra.gmra.mrb[8].mxu0 %vm98_vm1, %v800_v43  ;;  %v3009_v43 = vpop.f32.mrb[15].mxu1 }
 0x529   :  { %2995 = vmatpush3.bf16.msra.mxu0 %v3549_v1  ;;  %2998 = vmatprep.mubr.msk.bf16.mxu0 %vm3421_vm0, %v3420_v0 }
 0x52a   :  { %2996 = vmatprep.subr.bf16.mxu0 %v3420_v0 }
 0x52d   :  { %2997 = vmatpush3.bf16.msra.mxu0 %v3554_v3 }
 0x52e   :  { %3010 = vmatprep.subr.bf16.mxu0 %v3420_v0 }
 0x5fb   :  { %v838_v44 = vpop.f32.mrb[8].mxu0 }
 0x5fc   :  { %v929_v46 = vadd.f32 %v928_v39, %v838_v44  ;;  %v2984_v47 = vpop.f32.mrb[9].mxu0 }
 0x5fd   :  { %v841_v48 = vpop.f32.mrb[10].mxu0 }
 0x5fe   :  { %v934_v49 = vadd.f32 %v3592_v45, %v929_v46  ;;  %v2985_v50 = vpop.f32.mrb[11].mxu0 }
 0x600   :  { %v2818_v51 = vmul.f32 -1.442695, %v934_v49  ;;  %3174 = vtanh.f32 %v934_v49 }
 0x602   :  { %3176 = vpow2.f32 %v2818_v51 }
 0x60a   :  { %v3175_v52 = vpop.eup %3174 }
 0x60b   :  { %943 = vrot.lane.b32.xlu1 %v3175_v52, %s3416_s28 }
 0x60c   :  { %v3177_v53 = vpop.eup %3176 }
 0x60d   :  { %v938_v54 = vadd.f32 1.0, %v3177_v53 }
 0x60f   :  { %3178 = vrcp.f32 %v938_v54 }
 0x619   :  { %v3179_v55 = vpop.eup %3178 }
 0x61a   :  { %v951_v57 = vmul.f32 %v3179_v55, %v949_v56 }
 0x61c   :  { %953 = vrot.lane.b32.xlu0 %v951_v57, %s3423_s22 }
 0x67d   :  { %v944_v58 = vpop.permute.xlu1 %943 }
 0x67e   :  { %v946_v59 = vmul.f32 %v3179_v55, %v944_v58 }
 0x68e   :  { %v954_v60 = vpop.permute.xlu0 %953 }
 0x68f   :  { %v956_v61 = vadd.f32 %v954_v60, %v946_v59 }
 0x691   :  { %3180 = vtanh.f32 %v956_v61 }
 0x69b   :  { %v3181_v15 = vpop.eup %3180 }
 0x69c   :  { %959 = vrot.lane.b32.xlu1 %v3181_v15, %s3423_s22  ;;  %v1512_v15 = vunpack.c.l.b16 %v3129_v7  ;;  %v3138_v7 = vld [vmem:[#allocation4 + $0x10] ss:$0 sps:$4 sm:$0x44]  }
 0x69e   :  { %v1522_v24 = vrot.slane %v1512_v15, 1 }
 0x6a0   :  { %1269 = vrot.lane.b32.xlu1 %v956_v61, %s3422_s4  ;;  %v1523_v29 = vsel %vm217_vm4, %v1522_v24, %v1521_v27  ;;  %v1848_v27 = vrot.slane %v1836_v19, 7  ;;  %v2155_v19 = vunpack.c.l.b16 %v3147_v10 }
 0x6a1   :  { %v1524_v31 = vsel %vm220_vm5, %v1513_v17, %v1523_v29  ;;  %v1850_v29 = vrot.slane %v1837_v20, 6  ;;  %v2158_v20 = vrot.slane %v2150_v11, 6  ;;  %v2472_v11 = vunpack.c.l.b16 %v3151_v4 }
 0x6a2   :  { %v1526_v32 = vsel %vm223_vm6, %v1525_v26, %v1524_v31 }
 0x6a3   :  { %v1528_v33 = vsel %vm226_vm7, %v1527_v28, %v1526_v32 }
 0x6a4   :  { %v1530_v34 = vsel %vm229_vm8, %v1529_v30, %v1528_v33 }
 0x70e   :  { %v960_v35 = vpop.permute.xlu1 %959 }
 0x70f   :  { %v962_v36 = vmul.f32 %v3179_v55, %v960_v35  ;;  %v1531_v35 = vpack.c.b16 %v1530_v34, %v1530_v34 }
 0x711   :  { %v3673_v39 = vpack.c.bf16 %v962_v36, %v962_v36  ;;  %3023 = vmatmul.mubr.msk.bf16.vlgmr.msra.gmra.mrb[16].mxu1 %vm98_vm1, %v1531_v35  ;;  %v3727_v35 = vld [vmem:[#allocation10] sm:$0xff]  }
 0x712   :  { %v1270_v57 = vpop.permute.xlu1 %1269  ;;  %3035 = vmatpush3.bf16.msra.mxu1 %v3551_v2  ;;  %3038 = vmatprep.mubr.msk.bf16.mxu1 %vm3421_vm0, %v3420_v0 }
 0x713   :  { %1120 = vrot.lane.b32.xlu0 %v3673_v39, %s3422_s4  ;;  %3036 = vmatprep.subr.bf16.mxu1 %v3420_v0 }
 0x716   :  { %3037 = vmatpush3.bf16.msra.mxu1 %v3560_v5 }
 0x717   :  { %3050 = vmatprep.subr.bf16.mxu1 %v3420_v0 }
 0x785   :  { %v1121_v44 = vpop.permute.xlu0 %1120 }
 0x786   :  { %2999 = vmatmul.mubr.msk.bf16.vlgmr.msra.gmra.mrb[12].mxu0 %vm98_vm1, %v1121_v44 }
 0x787   :  { %3011 = vmatpush3.bf16.msra.mxu0 %v3549_v1  ;;  %3014 = vmatprep.mubr.msk.bf16.mxu0 %vm3421_vm0, %v3420_v0 }
 0x788   :  { %3012 = vmatprep.subr.bf16.mxu0 %v3420_v0 }
 0x78b   :  { %3013 = vmatpush3.bf16.msra.mxu0 %v3554_v3 }
 0x78c   :  { %3026 = vmatprep.subr.bf16.mxu0 %v3420_v0 }
 0x7e4   :  { %v1569_v42 = vpop.f32.mrb[16].mxu1 }
 0x7e5   :  { %v3024_v43 = vpop.f32.mrb[17].mxu1 }
 0x7e6   :  { %v1572_v44 = vpop.f32.mrb[18].mxu1 }
 0x7e7   :  { %v3025_v2 = vpop.f32.mrb[19].mxu1 }
 0x859   :  { %v1159_v46 = vpop.f32.mrb[12].mxu0 }
 0x85a   :  { %v1250_v47 = vadd.f32 %v1249_v40, %v1159_v46  ;;  %v3000_v48 = vpop.f32.mrb[13].mxu0 }
 0x85b   :  { %v1162_v49 = vpop.f32.mrb[14].mxu0 }
 0x85c   :  { %v1255_v50 = vadd.f32 %v3592_v45, %v1250_v47  ;;  %v3001_v51 = vpop.f32.mrb[15].mxu0 }
 0x85e   :  { %v2833_v52 = vmul.f32 -1.442695, %v1255_v50  ;;  %3182 = vtanh.f32 %v1255_v50 }
 0x860   :  { %3184 = vpow2.f32 %v2833_v52 }
 0x868   :  { %v3183_v53 = vpop.eup %3182 }
 0x869   :  { %1264 = vrot.lane.b32.xlu0 %v3183_v53, %s3416_s28 }
 0x86a   :  { %v3185_v54 = vpop.eup %3184 }
 0x86b   :  { %v1259_v55 = vadd.f32 1.0, %v3185_v54 }
 0x86d   :  { %3186 = vrcp.f32 %v1259_v55 }
 0x877   :  { %v3187_v56 = vpop.eup %3186 }
 0x878   :  { %v1272_v58 = vmul.f32 %v3187_v56, %v1270_v57 }
 0x87a   :  { %1274 = vrot.lane.b32.xlu1 %v1272_v58, %s3423_s22 }
 0x8db   :  { %v1265_v59 = vpop.permute.xlu0 %1264 }
 0x8dc   :  { %v1267_v60 = vmul.f32 %v3187_v56, %v1265_v59 }
 0x8ec   :  { %v1275_v61 = vpop.permute.xlu1 %1274 }
 0x8ed   :  { %v1277_v62 = vadd.f32 %v1275_v61, %v1267_v60 }
 0x8ef   :  { %3188 = vtanh.f32 %v1277_v62 }
 0x8f9   :  { %v3189_v16 = vpop.eup %3188 }
 0x8fa   :  { %1280 = vrot.lane.b32.xlu0 %v3189_v16, %s3423_s22  ;;  %v1834_v16 = vunpack.c.l.b16 %v3138_v7  ;;  %v3144_v7 = vld [vmem:[#allocation4 + $0x8] ss:$0 sps:$4 sm:$0x88]  }
 0x8fc   :  { %v1845_v25 = vrot.slane %v1834_v16, 1  ;;  %v2153_v16 = vunpack.c.l.b16 %v3145_v8  ;;  %v3154_v8 = vld [vmem:[#allocation4 + $0x10] ss:$0 sps:$4 sm:$0x88]  }
 0x8fe   :  { %1589 = vrot.lane.b32.xlu0 %v1277_v62, %s3422_s4  ;;  %v3134_v62 = vld [vmem:[#allocation4] ss:$0 sps:$4 sm:$0x44]  }
 0x8ff   :  { %v1830_v9 = vunpack.c.l.b16 %v3134_v62 }
 0x901   :  { %v1838_v17 = vrot.slane %v1830_v9, 5  ;;  %v3146_v9 = vld [vmem:[#allocation4 + $0x10] ss:$0 sps:$4 sm:$0x88]  }
 0x903   :  { %v1840_v24 = vsel %vm211_vm2, %v1839_v18, %v1838_v17  ;;  %v2154_v18 = vunpack.c.l.b16 %v3146_v9  ;;  %v3155_v9 = vld [vmem:[#allocation4 + $0x14] ss:$0 sps:$4 sm:$0x88]  }
 0x904   :  { %v1842_v26 = vsel %vm214_vm3, %v1841_v21, %v1840_v24  ;;  %v2159_v21 = vrot.slane %v2151_v12, 5  ;;  %v2163_v24 = vrot.slane %v2153_v16, 3  ;;  %v3156_v12 = vld [vmem:[#allocation4 + $0x18] ss:$0 sps:$4 sm:$0x88]  }
 0x905   :  { %v1844_v28 = vsel %vm217_vm4, %v1843_v22, %v1842_v26  ;;  %v2157_v22 = vunpack.c.l.b16 %v3149_v14  ;;  %v2165_v26 = vrot.slane %v2154_v18, 2  ;;  %v3157_v16 = vld [vmem:[#allocation4 + $0x1c] ss:$0 sps:$4 sm:$0x88]   ;;  %v2476_v18 = vunpack.c.l.b16 %v3155_v9 }
 0x906   :  { %v1846_v30 = vsel %vm220_vm5, %v1845_v25, %v1844_v28  ;;  %v2160_v25 = vsel %vm211_vm2, %v2159_v21, %v2158_v20  ;;  %v2156_v28 = vunpack.c.l.b16 %v3148_v13  ;;  %v2473_v13 = vunpack.c.l.b16 %v3152_v6 }
 0x907   :  { %v1847_v31 = vsel %vm223_vm6, %v1835_v23, %v1846_v30  ;;  %v2480_v20 = vrot.slane %v2472_v11, 6  ;;  %v2477_v21 = vunpack.c.l.b16 %v3156_v12 }
 0x908   :  { %v1849_v32 = vsel %vm226_vm7, %v1848_v27, %v1847_v31  ;;  %v2167_v27 = vrot.slane %v2155_v19, 1  ;;  %v2170_v31 = vrot.slane %v2157_v22, 7  ;;  %v2482_v22 = vrot.slane %v2473_v13, 5 }
 0x909   :  { %v1851_v33 = vsel %vm229_vm8, %v1850_v29, %v1849_v32 }
 0x90a   :  { %v1852_v34 = vpack.c.b16 %v1851_v33, %v1851_v33 }
 0x90c   :  { %3039 = vmatmul.mubr.msk.bf16.vlgmr.msra.gmra.mrb[20].mxu1 %vm98_vm1, %v1852_v34 }
 0x90d   :  { %3051 = vmatpush3.bf16.msra.mxu1 %v3727_v35  ;;  %3054 = vmatprep.mubr.msk.bf16.mxu1 %vm3421_vm0, %v3420_v0 }
 0x90e   :  { %3052 = vmatprep.subr.bf16.mxu1 %v3420_v0 }
 0x911   :  { %3053 = vmatpush3.bf16.msra.mxu1 %v3560_v5  ;;  %v3746_v5 = vld [vmem:[#allocation12 + $0x8] sm:$0xff]  }
 0x912   :  { %3066 = vmatprep.subr.bf16.mxu1 %v3420_v0 }
 0x96c   :  { %v1281_v36 = vpop.permute.xlu0 %1280 }
 0x96d   :  { %v1283_v40 = vmul.f32 %v3187_v56, %v1281_v36 }
 0x96f   :  { %v3703_v41 = vpack.c.bf16 %v1283_v40, %v1283_v40 }
 0x971   :  { %1440 = vrot.lane.b32.xlu1 %v3703_v41, %s3422_s4 }
 0x9df   :  { %v1890_v43 = vpop.f32.mrb[20].mxu1 }
 0x9e0   :  { %v3040_v44 = vpop.f32.mrb[21].mxu1 }
 0x9e1   :  { %v1893_v2 = vpop.f32.mrb[22].mxu1 }
 0x9e3   :  { %v1441_v46 = vpop.permute.xlu1 %1440 }
 0x9e4   :  { %3015 = vmatmul.mubr.msk.bf16.vlgmr.msra.gmra.mrb[16].mxu0 %vm98_vm1, %v1441_v46  ;;  %v3041_v46 = vpop.f32.mrb[23].mxu1 }
 0x9e5   :  { %3027 = vmatpush3.bf16.msra.mxu0 %v3549_v1  ;;  %3030 = vmatprep.mubr.msk.bf16.mxu0 %vm3421_vm0, %v3420_v0 }
 0x9e6   :  { %3028 = vmatprep.subr.bf16.mxu0 %v3420_v0 }
 0x9e9   :  { %3029 = vmatpush3.bf16.msra.mxu0 %v3554_v3  ;;  %v1590_v3 = vpop.permute.xlu0 %1589 }
 0x9ea   :  { %3042 = vmatprep.subr.bf16.mxu0 %v3420_v0 }
 0xab7   :  { %v1479_v47 = vpop.f32.mrb[16].mxu0 }
 0xab8   :  { %v1570_v48 = vadd.f32 %v1569_v42, %v1479_v47  ;;  %v3016_v49 = vpop.f32.mrb[17].mxu0 }
 0xab9   :  { %v1482_v50 = vpop.f32.mrb[18].mxu0 }
 0xaba   :  { %v1575_v51 = vadd.f32 %v3592_v45, %v1570_v48  ;;  %v3017_v52 = vpop.f32.mrb[19].mxu0  ;;  %v3740_v48 = vld [vmem:[#allocation12] sm:$0xff]  }
 0xabc   :  { %v2848_v53 = vmul.f32 -1.442695, %v1575_v51  ;;  %3190 = vtanh.f32 %v1575_v51 }
 0xabe   :  { %3192 = vpow2.f32 %v2848_v53 }
 0xac6   :  { %v3191_v1 = vpop.eup %3190 }
 0xac7   :  { %1584 = vrot.lane.b32.xlu1 %v3191_v1, %s3416_s28 }
 0xac8   :  { %v3193_v54 = vpop.eup %3192 }
 0xac9   :  { %v1579_v55 = vadd.f32 1.0, %v3193_v54 }
 0xacb   :  { %3194 = vrcp.f32 %v1579_v55 }
 0xad5   :  { %v3195_v56 = vpop.eup %3194 }
 0xad6   :  { %v1592_v57 = vmul.f32 %v3195_v56, %v1590_v3 }
 0xad8   :  { %1594 = vrot.lane.b32.xlu0 %v1592_v57, %s3423_s22 }
 0xb39   :  { %v1585_v58 = vpop.permute.xlu1 %1584 }
 0xb3a   :  { %v1587_v59 = vmul.f32 %v3195_v56, %v1585_v58 }
 0xb4a   :  { %v1595_v60 = vpop.permute.xlu0 %1594 }
 0xb4b   :  { %v1597_v61 = vadd.f32 %v1595_v60, %v1587_v59 }
 0xb4d   :  { %3196 = vtanh.f32 %v1597_v61 }
 0xb57   :  { %v3197_v15 = vpop.eup %3196 }
 0xb58   :  { %1600 = vrot.lane.b32.xlu1 %v3197_v15, %s3423_s22  ;;  %v2152_v15 = vunpack.c.l.b16 %v3144_v7  ;;  %v3153_v7 = vld [vmem:[#allocation4 + $0xc] ss:$0 sps:$4 sm:$0x88]  }
 0xb59   :  { %v2474_v14 = vunpack.c.l.b16 %v3153_v7 }
 0xb5a   :  { %v2161_v23 = vrot.slane %v2152_v15, 4 }
 0xb5c   :  { %1910 = vrot.lane.b32.xlu1 %v1597_v61, %s3422_s4  ;;  %v2162_v29 = vsel %vm214_vm3, %v2161_v23, %v2160_v25  ;;  %v2484_v23 = vrot.slane %v2474_v14, 4 }
 0xb5d   :  { %v2164_v30 = vsel %vm217_vm4, %v2163_v24, %v2162_v29  ;;  %v2478_v29 = vunpack.c.l.b16 %v3157_v16 }
 0xb5e   :  { %v2166_v32 = vsel %vm220_vm5, %v2165_v26, %v2164_v30  ;;  %v2488_v26 = vrot.slane %v2476_v18, 2 }
 0xb5f   :  { %v2168_v33 = vsel %vm223_vm6, %v2167_v27, %v2166_v32 }
 0xb60   :  { %v2169_v34 = vsel %vm226_vm7, %v2156_v28, %v2168_v33  ;;  %v2490_v28 = vrot.slane %v2477_v21, 1 }
 0xbca   :  { %v1601_v36 = vpop.permute.xlu1 %1600 }
 0xbcb   :  { %v1603_v40 = vmul.f32 %v3195_v56, %v1601_v36  ;;  %v2171_v36 = vsel %vm229_vm8, %v2170_v31, %v2169_v34 }
 0xbcd   :  { %v3735_v42 = vpack.c.bf16 %v1603_v40, %v1603_v40  ;;  %v2172_v40 = vpack.c.b16 %v2171_v36, %v2171_v36 }
 0xbce   :  { %v1911_v58 = vpop.permute.xlu1 %1910 }
 0xbcf   :  { %1761 = vrot.lane.b32.xlu0 %v3735_v42, %s3422_s4  ;;  %3055 = vmatmul.mubr.msk.bf16.vlgmr.msra.gmra.mrb[24].mxu1 %vm98_vm1, %v2172_v40 }
 0xbd0   :  { %3067 = vmatpush3.bf16.msra.mxu1 %v3727_v35  ;;  %3070 = vmatprep.mubr.msk.bf16.mxu1 %vm3421_vm0, %v3420_v0 }
 0xbd1   :  { %3068 = vmatprep.subr.bf16.mxu1 %v3420_v0 }
 0xc41   :  { %v1762_v47 = vpop.permute.xlu0 %1761 }
 0xc42   :  { %3031 = vmatmul.mubr.msk.bf16.vlgmr.msra.gmra.mrb[20].mxu0 %vm98_vm1, %v1762_v47 }
 0xc43   :  { %3043 = vmatpush3.bf16.msra.mxu0 %v3740_v48  ;;  %3046 = vmatprep.mubr.msk.bf16.mxu0 %vm3421_vm0, %v3420_v0 }
 0xc44   :  { %3044 = vmatprep.subr.bf16.mxu0 %v3420_v0 }
 0xc47   :  { %3045 = vmatpush3.bf16.msra.mxu0 %v3746_v5 }
 0xc48   :  { %3058 = vmatprep.subr.bf16.mxu0 %v3420_v0 }
 0xca2   :  { %v2210_v47 = vpop.f32.mrb[24].mxu1 }
 0xd15   :  { %v1800_v49 = vpop.f32.mrb[20].mxu0 }
 0xd16   :  { %v1891_v50 = vadd.f32 %v1890_v43, %v1800_v49  ;;  %v3032_v51 = vpop.f32.mrb[21].mxu0  ;;  %v3225_v43 = vld [vmem:[#allocation10 + $0x8] sm:$0xff]   ;;  %v3056_v49 = vpop.f32.mrb[25].mxu1 }
 0xd17   :  { %v1803_v52 = vpop.f32.mrb[22].mxu0  ;;  %3069 = vmatpush3.bf16.msra.mxu1 %v3225_v43 }
 0xd18   :  { %v1896_v53 = vadd.f32 %v3592_v45, %v1891_v50  ;;  %v3033_v1 = vpop.f32.mrb[23].mxu0  ;;  %v2213_v50 = vpop.f32.mrb[26].mxu1 }
 0xd19   :  { %v3057_v51 = vpop.f32.mrb[27].mxu1 }
 0xd1a   :  { %v2863_v54 = vmul.f32 -1.442695, %v1896_v53  ;;  %3198 = vtanh.f32 %v1896_v53 }
 0xd1c   :  { %3200 = vpow2.f32 %v2863_v54 }
 0xd24   :  { %v3199_v55 = vpop.eup %3198 }
 0xd25   :  { %1905 = vrot.lane.b32.xlu0 %v3199_v55, %s3416_s28 }
 0xd26   :  { %v3201_v56 = vpop.eup %3200 }
 0xd27   :  { %v1900_v3 = vadd.f32 1.0, %v3201_v56 }
 0xd29   :  { %3202 = vrcp.f32 %v1900_v3 }
 0xd33   :  { %v3203_v57 = vpop.eup %3202 }
 0xd34   :  { %v1913_v59 = vmul.f32 %v3203_v57, %v1911_v58 }
 0xd36   :  { %1915 = vrot.lane.b32.xlu1 %v1913_v59, %s3423_s22 }
 0xd97   :  { %v1906_v60 = vpop.permute.xlu0 %1905 }
 0xd98   :  { %v1908_v61 = vmul.f32 %v3203_v57, %v1906_v60 }
 0xda8   :  { %v1916_v62 = vpop.permute.xlu1 %1915 }
 0xda9   :  { %v1918_v63 = vadd.f32 %v1916_v62, %v1908_v61 }
 0xdab   :  { %3204 = vtanh.f32 %v1918_v63 }
 0xdb5   :  { %v3205_v17 = vpop.eup %3204 }
 0xdb6   :  { %1921 = vrot.lane.b32.xlu0 %v3205_v17, %s3423_s22  ;;  %v2475_v17 = vunpack.c.l.b16 %v3154_v8 }
 0xdb8   :  { %v2486_v25 = vrot.slane %v2475_v17, 3 }
 0xdba   :  { %2230 = vrot.lane.b32.xlu0 %v1918_v63, %s3422_s4 }
 0xe28   :  { %v1922_v44 = vpop.permute.xlu0 %1921 }
 0xe29   :  { %v1924_v2 = vmul.f32 %v3203_v57, %v1922_v44 }
 0xe2b   :  { %v3767_v46 = vpack.c.bf16 %v1924_v2, %v1924_v2 }
 0xe2d   :  { %2081 = vrot.lane.b32.xlu1 %v3767_v46, %s3422_s4 }
 0xe9f   :  { %v2082_v52 = vpop.permute.xlu1 %2081 }
 0xea0   :  { %3047 = vmatmul.mubr.msk.bf16.vlgmr.msra.gmra.mrb[24].mxu0 %vm98_vm1, %v2082_v52  ;;  %v3424_v52 = vmov 1966171168  }
 0xea1   :  { %3059 = vmatpush3.bf16.msra.mxu0 %v3740_v48  ;;  %3062 = vmatprep.mubr.msk.bf16.mxu0 %vm3421_vm0, %v3420_v0  ;;  %vm4031_vm0 = vmand %vm1085_vm14, %vm1086_vm15 }
 0xea2   :  { %3060 = vmatprep.subr.bf16.mxu0 %v3420_v0  ;;  %v2231_v0 = vpop.permute.xlu0 %2230 }
 0xea5   :  { %3061 = vmatpush3.bf16.msra.mxu0 %v3746_v5 }
 0xf73   :  { %v2120_v35 = vpop.f32.mrb[24].mxu0 }
 0xf74   :  { %v2211_v53 = vadd.f32 %v2210_v47, %v2120_v35  ;;  %v3048_v1 = vpop.f32.mrb[25].mxu0  ;;  %v325_v35 = vunpack.c.l.s4 %v3424_v52 }
 0xf75   :  { %v2123_v54 = vpop.f32.mrb[26].mxu0 }
 0xf76   :  { %v2216_v55 = vadd.f32 %v3592_v45, %v2211_v53  ;;  %v3049_v56 = vpop.f32.mrb[27].mxu0  ;;  %v3150_v45 = vld [vmem:[#allocation4] ss:$0 sps:$4 sm:$0x88]   ;;  %v327_v53 = vlaneseq  ;;  %v326_v1 = vunpack.c.0.s8 %v325_v35 }
 0xf77   :  { %v2471_v10 = vunpack.c.l.b16 %v3150_v45 }
 0xf78   :  { %v2878_v3 = vmul.f32 -1.442695, %v2216_v55  ;;  %3206 = vtanh.f32 %v2216_v55  ;;  %v328_v54 = vshrl.u32 %v327_v53, 7 }
 0xf79   :  { %v2479_v19 = vrot.slane %v2471_v10, 7 }
 0xf7a   :  { %3208 = vpow2.f32 %v2878_v3  ;;  %v3795_v55 = vsub.s32 %v326_v1, %v328_v54 }
 0xf7b   :  { %v2481_v24 = vsel %vm211_vm2, %v2480_v20, %v2479_v19  ;;  %vm1406_vm2 = vsmask.f32 7942 }
 0xf7c   :  { %v2483_v27 = vsel %vm214_vm3, %v2482_v22, %v2481_v24  ;;  %vm4068_vm3 = vmand %vm1085_vm14, %vm1406_vm2 }
 0xf7d   :  { %v2485_v30 = vsel %vm217_vm4, %v2484_v23, %v2483_v27  ;;  %vm1726_vm4 = vcmask 256002  }
 0xf7e   :  { %v2487_v31 = vsel %vm220_vm5, %v2486_v25, %v2485_v30  ;;  %vm1727_vm5 = vsmask.f32 2304 }
 0xf7f   :  { %v2489_v32 = vsel %vm223_vm6, %v2488_v26, %v2487_v31  ;;  %vm4124_vm6 = vmand %vm1726_vm4, %vm1727_vm5 }
 0xf80   :  { %v2491_v33 = vsel %vm226_vm7, %v2490_v28, %v2489_v32  ;;  %vm2367_vm7 = vcmask 257027  }
 0xf81   :  { %v2492_v34 = vsel %vm229_vm8, %v2478_v29, %v2491_v33  ;;  %vm2368_vm8 = vsmask.f32 3328 }
 0xf82   :  { %v3207_v57 = vpop.eup %3206  ;;  %v2493_v36 = vpack.c.b16 %v2492_v34, %v2492_v34  ;;  %vm4139_vm9 = vmand %vm2367_vm7, %vm2368_vm8 }
 0xf83   :  { %2225 = vrot.lane.b32.xlu1 %v3207_v57, %s3416_s28 }
 0xf84   :  { %v3209_v48 = vpop.eup %3208  ;;  %3071 = vmatmul.mubr.msk.bf16.vlgmr.msra.gmra.mrb[28].mxu1 %vm98_vm1, %v2493_v36 }
 0xf85   :  { %v2220_v58 = vadd.f32 1.0, %v3209_v48  ;;  %v330_v48 = vrot.slane %v3613_v38, %v3795_v55 }
 0xf87   :  { %3210 = vrcp.f32 %v2220_v58 }
 0xf91   :  { %v3211_v59 = vpop.eup %3210 }
 0xf92   :  { %v2233_v60 = vmul.f32 %v3211_v59, %v2231_v0 }
 0xf94   :  { %2235 = vrot.lane.b32.xlu0 %v2233_v60, %s3423_s22 }
 0xff5   :  { %v2226_v5 = vpop.permute.xlu1 %2225 }
 0xff6   :  { %v2228_v61 = vmul.f32 %v3211_v59, %v2226_v5 }
0x1006   :  { %v2236_v62 = vpop.permute.xlu0 %2235 }
0x1007   :  { %v2238_v63 = vadd.f32 %v2236_v62, %v2228_v61  ;;  %v331_v61 = vcombine.high %v330_v48, %v330_v48  ;;  %v338_v62 = vrot.slane %v330_v48, %v3795_v55 }
0x1009   :  { %3212 = vtanh.f32 %v2238_v63  ;;  %v345_v4 = vrot.slane %v331_v61, %v3795_v55  ;;  %v349_v6 = vunpack.i.h.s16 %v338_v62  ;;  %v346_v38 = vcombine.high %v338_v62, %v338_v62 }
0x100a   :  { %v2789_v34 = vpack.i.b16 %v338_v62, %v338_v62 }
0x100b   :  { %v357_v8 = vpack.i.b16 %v349_v6, %v349_v6  ;;  %v351_v9 = vunpack.i.h.s16 %v345_v4  ;;  %v353_v13 = vunpack.i.h.s16 %v346_v38  ;;  %v347_v14 = vcombine.high %v345_v4, %v345_v4 }
0x100d   :  { %v359_v18 = vpack.i.b16 %v351_v9, %v351_v9  ;;  %v361_v19 = vpack.i.b16 %v353_v13, %v353_v13  ;;  %v355_v23 = vunpack.i.h.s16 %v347_v14 }
0x100f   :  { %v363_v25 = vpack.i.b16 %v355_v23, %v355_v23 }
0x1013   :  { %v3213_v15 = vpop.eup %3212 }
0x1014   :  { %2241 = vrot.lane.b32.xlu1 %v3213_v15, %s3423_s22  ;;  %v651_v15 = vrot.slane %v3643_v37, %v3795_v55 }
0x1016   :  { %v652_v20 = vcombine.high %v651_v15, %v651_v15  ;;  %v659_v21 = vrot.slane %v651_v15, %v3795_v55 }
0x1018   :  { %2551 = vrot.lane.b32.xlu1 %v2238_v63, %s3422_s4  ;;  %v3425_v63 = vmov 286326784   ;;  %v3815_v24 = vrot.slane %v652_v20, %v3795_v55  ;;  %v670_v26 = vunpack.i.h.s16 %v659_v21  ;;  %v3819_v27 = vcombine.high %v659_v21, %v659_v21 }
0x1019   :  { %v365_v45 = vunpack.c.l.s4 %v3425_v63  ;;  %v2804_v63 = vpack.i.b16 %v659_v21, %v659_v21 }
0x101a   :  { %v678_v31 = vpack.i.b16 %v670_v26, %v670_v26  ;;  %v672_v32 = vunpack.i.h.s16 %v3815_v24  ;;  %v674_v36 = vunpack.i.h.s16 %v3819_v27  ;;  %v2805_v9 = vpack.i.b16 %v3815_v24, %v3815_v24 }
0x101b   :  { %v366_v7 = vunpack.c.0.s8 %v365_v45  ;;  %v2806_v15 = vpack.i.b16 %v3819_v27, %v3819_v27 }
0x101d   :  { %v3804_v11 = vsub.s32 %v366_v7, %v328_v54  ;;  %v2791_v54 = vpack.i.b16 %v346_v38, %v346_v38 }
0x101f   :  { %v377_v17 = vrot.slane %v357_v8, %v3804_v11  ;;  %v391_v22 = vrot.slane %v359_v18, %v3804_v11  ;;  %v405_v37 = vrot.slane %v361_v19, %v3804_v11  ;;  %v419_v30 = vrot.slane %v363_v25, %v3804_v11 }
0x1020   :  { %v691_v8 = vrot.slane %v2804_v63, %v3804_v11  ;;  %v719_v19 = vrot.slane %v2806_v15, %v3804_v11  ;;  %v1933_v15 = vrot.slane %v3767_v46, %v3795_v55 }
0x1057   :  { %v2531_v2 = vpop.f32.mrb[28].mxu1 }
0x1058   :  { %v3072_v47 = vpop.f32.mrb[29].mxu1 }
0x1059   :  { %v2534_v49 = vpop.f32.mrb[30].mxu1  ;;  %v668_v47 = vcombine.high %v3815_v24, %v3815_v24 }
0x105a   :  { %v3073_v50 = vpop.f32.mrb[31].mxu1  ;;  %v370_v49 = vrot.slane %v2789_v34, %v3804_v11 }
0x105b   :  { %v2790_v50 = vpack.i.b16 %v345_v4, %v345_v4  ;;  %v1292_v4 = vrot.slane %v3703_v41, %v3795_v55  ;;  %v705_v41 = vrot.slane %v2805_v9, %v3804_v11  ;;  %v2807_v20 = vpack.i.b16 %v668_v47, %v668_v47 }
0x105d   :  { %v384_v1 = vrot.slane %v2790_v50, %v3804_v11  ;;  %v733_v23 = vrot.slane %v2807_v20, %v3804_v11  ;;  %v1934_v20 = vcombine.high %v1933_v15, %v1933_v15 }
0x1086   :  { %v2242_v40 = vpop.permute.xlu1 %2241 }
0x1087   :  { %v2244_v43 = vmul.f32 %v3211_v59, %v2242_v40  ;;  %v3226_v59 = vld [vmem:[%s4289_s5] ss:$0 sm:$0xff]  ;;  %v971_v40 = vrot.slane %v3673_v39, %v3795_v55  ;;  %v676_v39 = vunpack.i.h.s16 %v668_v47  ;;  %s3426_s5 = smov [#allocation14]  }
0x1088   :  { %s2745_s25 = sshll.u32 %s3426_s5, 4  ;;  %s2746_s25 = int_to_ptr.vmem [resolvable:$true] %s2745_s25 }
0x1089   :  { %v3790_v44 = vpack.c.bf16 %v2244_v43, %v2244_v43  ;;  %v698_v43 = vrot.slane %v678_v31, %v3804_v11  ;;  %v972_v52 = vcombine.high %v971_v40, %v971_v40  ;;  %v979_v35 = vrot.slane %v971_v40, %v3795_v55  ;;  %s3337_s1 = scalar_lea.vmem %s2746_s25, 128  ;;  %p3342_p13 = scmp.lt.s32.totalorder %s2746_s25, %s2746_s25 }
0x108a   :  { %v2552_v29 = vpop.permute.xlu1 %2551  ;;  %p3338_p12 = scmp.ne.s32.totalorder %s2746_s25, %s3337_s1  ;;  %p3343_p0 = scmp.lt.s32.totalorder %s3337_s1, %s3337_s1 }
0x108b   :  { %2402 = vrot.lane.b32.xlu0 %v3790_v44, %s3422_s4  ;;  %v990_v48 = vunpack.i.h.s16 %v979_v35  ;;  %v2819_v24 = vpack.i.b16 %v979_v35, %v979_v35 }
0x108c   :  { %p3344_p1 = por %p3343_p0, %p3342_p13 }
0x108d   :  { %v1011_v25 = vrot.slane %v2819_v24, %v3804_v11  ;;  %v3963_v24 = vrot.slane %v1934_v20, %v3795_v55 }
0x108e   :  { %p3345_p2 = pnand %p3344_p1, %p3338_p12 }
0x10fd   :  { %v2403_v51 = vpop.permute.xlu0 %2402 }
0x10fe   :  { %3063 = vmatmul.mubr.msk.bf16.vlgmr.msra.gmra.mrb[28].mxu0 %vm98_vm1, %v2403_v51  ;;  %v682_v51 = vpack.i.b16 %v674_v36, %v674_v36 }
0x11d1   :  { %v2441_v56 = vpop.f32.mrb[28].mxu0 }
0x11d2   :  { %v2532_v3 = vadd.f32 %v2531_v2, %v2441_v56  ;;  %v3064_v57 = vpop.f32.mrb[29].mxu0  ;;  %v680_v2 = vpack.i.b16 %v672_v32, %v672_v32  ;;  %v986_v56 = vrot.slane %v972_v52, %v3795_v55 }
0x11d3   :  { %v2444_v58 = vpop.f32.mrb[30].mxu0  ;;  %v684_v57 = vpack.i.b16 %v676_v39, %v676_v39 }
0x11d4   :  { %v2537_v0 = vadd.f32 %v3226_v59, %v2532_v3  ;;  %v3065_v60 = vpop.f32.mrb[31].mxu0  ;;  %v712_v53 = vrot.slane %v680_v2, %v3804_v11  ;;  %v726_v3 = vrot.slane %v682_v51, %v3804_v11  ;;  %v398_v58 = vrot.slane %v2791_v54, %v3804_v11 }
0x11d5   :  { %v2792_v59 = vpack.i.b16 %v347_v14, %v347_v14  ;;  %v740_v60 = vrot.slane %v684_v57, %v3804_v11  ;;  %v992_v61 = vunpack.i.h.s16 %v986_v56  ;;  %v988_v38 = vcombine.high %v986_v56, %v986_v56 }
0x11d6   :  { %v2893_v5 = vmul.f32 -1.442695, %v2537_v0  ;;  %3214 = vtanh.f32 %v2537_v0  ;;  %v987_v0 = vcombine.high %v979_v35, %v979_v35  ;;  %v2820_v26 = vpack.i.b16 %v986_v56, %v986_v56 }
0x11d7   :  { %v412_v62 = vrot.slane %v2792_v59, %v3804_v11  ;;  %v1000_v7 = vpack.i.b16 %v992_v61, %v992_v61  ;;  %v996_v14 = vunpack.i.h.s16 %v988_v38  ;;  %v2822_v32 = vpack.i.b16 %v988_v38, %v988_v38 }
0x11d8   :  { %3216 = vpow2.f32 %v2893_v5  ;;  %v998_v5 = vpack.i.b16 %v990_v48, %v990_v48  ;;  %v994_v45 = vunpack.i.h.s16 %v987_v0  ;;  %v1025_v27 = vrot.slane %v2820_v26, %v3804_v11 }
0x11d9   :  { %v1053_v34 = vrot.slane %v2822_v32, %v3804_v11 }
0x11da   :  { %v1018_v6 = vrot.slane %v998_v5, %v3804_v11  ;;  %v1002_v13 = vpack.i.b16 %v994_v45, %v994_v45 }
0x11e0   :  { %v3215_v10 = vpop.eup %3214 }
0x11e1   :  { %2546 = vrot.lane.b32.xlu0 %v3215_v10, %s3416_s28  ;;  %v1300_v10 = vrot.slane %v1292_v4, %v3795_v55 }
0x11e2   :  { %v3217_v12 = vpop.eup %3216 }
0x11e3   :  { %v2541_v16 = vadd.f32 1.0, %v3217_v12  ;;  %v1032_v12 = vrot.slane %v1000_v7, %v3804_v11  ;;  %v1311_v18 = vunpack.i.h.s16 %v1300_v10  ;;  %v2834_v36 = vpack.i.b16 %v1300_v10, %v1300_v10 }
0x11e4   :  { %v3887_v40 = vcombine.high %v1300_v10, %v1300_v10 }
0x11e5   :  { %3218 = vrcp.f32 %v2541_v16  ;;  %422 = vrot.lane.b32.xlu0 %v377_v17, %s3422_s4  ;;  %v1046_v16 = vrot.slane %v1002_v13, %v3804_v11  ;;  %v1004_v17 = vpack.i.b16 %v996_v14, %v996_v14  ;;  %v1332_v2 = vrot.slane %v2834_v36, %v3804_v11 }
0x11e7   :  { %v1060_v21 = vrot.slane %v1004_v17, %v3804_v11 }
0x11e9   :  { %426 = vrot.lane.b32.xlu0 %v391_v22, %s3422_s4  ;;  %v1319_v22 = vpack.i.b16 %v1311_v18, %v1311_v18 }
0x11ed   :  { %430 = vrot.lane.b32.xlu0 %v405_v37, %s3422_s4  ;;  %v1339_v37 = vrot.slane %v1319_v22, %v3804_v11 }
0x11ef   :  { %v3821_v28 = vpop.eup %3218 }
0x11f0   :  { %v2554_v33 = vmul.f32 %v3821_v28, %v2552_v29  ;;  %v2821_v29 = vpack.i.b16 %v987_v0, %v987_v0 }
0x11f1   :  { %434 = vrot.lane.b32.xlu0 %v419_v30, %s3422_s4  ;;  %v1293_v30 = vcombine.high %v1292_v4, %v1292_v4 }
0x11f2   :  { %2556 = vrot.lane.b32.xlu1 %v2554_v33, %s3423_s22  ;;  %v1039_v31 = vrot.slane %v2821_v29, %v3804_v11 }
0x11f3   :  { %v3883_v33 = vrot.slane %v1293_v30, %v3795_v55 }
0x11f5   :  { %743 = vrot.lane.b32.xlu0 %v698_v43, %s3422_s4  ;;  %v1612_v43 = vrot.slane %v3735_v42, %v3795_v55  ;;  %v2835_v47 = vpack.i.b16 %v3883_v33, %v3883_v33  ;;  %v1309_v35 = vcombine.high %v3883_v33, %v3883_v33  ;;  %v1313_v20 = vunpack.i.h.s16 %v3883_v33 }
0x11f6   :  { %420 = vrot.lane.b32.xlu1 %v370_v49, %s3422_s4  ;;  %v2836_v49 = vpack.i.b16 %v3887_v40, %v3887_v40 }
0x11f7   :  { %v1613_v50 = vcombine.high %v1612_v43, %v1612_v43  ;;  %v3898_v51 = vrot.slane %v1612_v43, %v3795_v55  ;;  %v1346_v52 = vrot.slane %v2835_v47, %v3804_v11  ;;  %v2837_v39 = vpack.i.b16 %v1309_v35, %v1309_v35 }
0x11f9   :  { %747 = vrot.lane.b32.xlu0 %v712_v53, %s3422_s4  ;;  %v3905_v42 = vrot.slane %v1613_v50, %v3795_v55  ;;  %v1360_v53 = vrot.slane %v2836_v49, %v3804_v11  ;;  %v3912_v54 = vcombine.high %v3898_v51, %v3898_v51  ;;  %v1374_v56 = vrot.slane %v2837_v39, %v3804_v11 }
0x11fa   :  { %424 = vrot.lane.b32.xlu1 %v384_v1, %s3422_s4  ;;  %v1631_v1 = vunpack.i.h.s16 %v3898_v51  ;;  %v3986_v50 = vcombine.high %v3963_v24, %v3963_v24  ;;  %v2849_v32 = vpack.i.b16 %v3898_v51, %v3898_v51 }
0x11fb   :  { %v1633_v57 = vunpack.i.h.s16 %v3905_v42  ;;  %v1635_v48 = vunpack.i.h.s16 %v3912_v54 }
0x11fd   :  { %751 = vrot.lane.b32.xlu0 %v726_v3, %s3422_s4  ;;  %v1639_v3 = vpack.i.b16 %v1631_v1, %v1631_v1  ;;  %v1641_v0 = vpack.i.b16 %v1633_v57, %v1633_v57  ;;  %v1643_v5 = vpack.i.b16 %v1635_v48, %v1635_v48 }
0x11fe   :  { %428 = vrot.lane.b32.xlu1 %v398_v58, %s3422_s4  ;;  %v2253_v58 = vrot.slane %v3790_v44, %v3795_v55 }
0x11ff   :  { %v1659_v59 = vrot.slane %v1639_v3, %v3804_v11  ;;  %v1673_v63 = vrot.slane %v1641_v0, %v3804_v11  ;;  %v1687_v4 = vrot.slane %v1643_v5, %v3804_v11  ;;  %v462_v3 = vld [vmem:[#allocation13 + $0x14] sm:$0x1]  ;;  %v468_v0 = vld [vmem:[#allocation13 + $0x1c] sm:$0x1] }
0x1200   :  { %v2254_v61 = vcombine.high %v2253_v58, %v2253_v58 }
0x1201   :  { %755 = vrot.lane.b32.xlu0 %v740_v60, %s3422_s4  ;;  %v3923_v60 = vcombine.high %v3905_v42, %v3905_v42 }
0x1202   :  { %432 = vrot.lane.b32.xlu1 %v412_v62, %s3422_s4  ;;  %v3927_v62 = vrot.slane %v2253_v58, %v3795_v55  ;;  %v3933_v44 = vrot.slane %v2254_v61, %v3795_v55 }
0x1203   :  { %v1637_v45 = vunpack.i.h.s16 %v3923_v60 }
0x1204   :  { %v2272_v7 = vunpack.i.h.s16 %v3927_v62  ;;  %v2274_v9 = vunpack.i.h.s16 %v3933_v44  ;;  %v3942_v10 = vcombine.high %v3927_v62, %v3927_v62 }
0x1205   :  { %1063 = vrot.lane.b32.xlu0 %v1018_v6, %s3422_s4  ;;  %v1645_v6 = vpack.i.b16 %v1637_v45, %v1637_v45 }
0x1206   :  { %741 = vrot.lane.b32.xlu1 %v691_v8, %s3422_s4  ;;  %v2280_v8 = vpack.i.b16 %v2272_v7, %v2272_v7  ;;  %v2282_v13 = vpack.i.b16 %v2274_v9, %v2274_v9  ;;  %v2276_v14 = vunpack.i.h.s16 %v3942_v10  ;;  %v2879_v7 = vpack.i.b16 %v3927_v62, %v3927_v62  ;;  %v1100_v62 = vld [vmem:[#allocation13 + $0x10] sm:$0x2] }
0x1207   :  { %v1701_v38 = vrot.slane %v1645_v6, %v3804_v11 }
0x1208   :  { %v2284_v17 = vpack.i.b16 %v2276_v14, %v2276_v14 }
0x1209   :  { %1067 = vrot.lane.b32.xlu0 %v1032_v12, %s3422_s4  ;;  %v2300_v12 = vrot.slane %v2280_v8, %v3804_v11 }
0x120a   :  { %745 = vrot.lane.b32.xlu1 %v705_v41, %s3422_s4  ;;  %v3949_v41 = vcombine.high %v3933_v44, %v3933_v44  ;;  %v2328_v22 = vrot.slane %v2284_v17, %v3804_v11 }
0x120c   :  { %v2278_v18 = vunpack.i.h.s16 %v3949_v41 }
0x120d   :  { %1071 = vrot.lane.b32.xlu0 %v1046_v16, %s3422_s4  ;;  %v2314_v16 = vrot.slane %v2282_v13, %v3804_v11 }
0x120e   :  { %749 = vrot.lane.b32.xlu1 %v719_v19, %s3422_s4  ;;  %v1317_v19 = vunpack.i.h.s16 %v1309_v35 }
0x1211   :  { %1075 = vrot.lane.b32.xlu0 %v1060_v21, %s3422_s4  ;;  %v3958_v21 = vrot.slane %v1933_v15, %v3795_v55  ;;  %v453_v15 = vld [vmem:[#allocation13 + $0x8] sm:$0x1] }
0x1212   :  { %753 = vrot.lane.b32.xlu1 %v733_v23, %s3422_s4  ;;  %v2286_v23 = vpack.i.b16 %v2278_v18, %v2278_v18 }
0x1214   :  { %v2342_v46 = vrot.slane %v2286_v23, %v3804_v11  ;;  %v459_v23 = vld [vmem:[#allocation13 + $0x10] sm:$0x1] }
0x1215   :  { %1384 = vrot.lane.b32.xlu0 %v1339_v37, %s3422_s4  ;;  %v1325_v37 = vpack.i.b16 %v1317_v19, %v1317_v19 }
0x1216   :  { %1061 = vrot.lane.b32.xlu1 %v1011_v25, %s3422_s4  ;;  %v1952_v25 = vunpack.i.h.s16 %v3958_v21 }
0x1217   :  { %v1381_v29 = vrot.slane %v1325_v37, %v3804_v11 }
0x1218   :  { %v1960_v30 = vpack.i.b16 %v1952_v25, %v1952_v25 }
0x121a   :  { %1065 = vrot.lane.b32.xlu1 %v1025_v27, %s3422_s4  ;;  %v3970_v27 = vcombine.high %v3958_v21, %v3958_v21  ;;  %v1980_v47 = vrot.slane %v1960_v30, %v3804_v11  ;;  %v1321_v30 = vpack.i.b16 %v1313_v20, %v1313_v20 }
0x121c   :  { %v1956_v43 = vunpack.i.h.s16 %v3970_v27 }
0x121e   :  { %1069 = vrot.lane.b32.xlu1 %v1039_v31, %s3422_s4  ;;  %v1954_v31 = vunpack.i.h.s16 %v3963_v24  ;;  %v1964_v1 = vpack.i.b16 %v1956_v43, %v1956_v43 }
0x1220   :  { %v1962_v49 = vpack.i.b16 %v1954_v31, %v1954_v31  ;;  %v2008_v58 = vrot.slane %v1964_v1, %v3804_v11  ;;  %v1315_v31 = vunpack.i.h.s16 %v3887_v40 }
0x1222   :  { %1073 = vrot.lane.b32.xlu1 %v1053_v34, %s3422_s4  ;;  %v450_v34 = vld [vmem:[#allocation13 + $0x4] sm:$0x1]  ;;  %v1994_v39 = vrot.slane %v1962_v49, %v3804_v11  ;;  %v1323_v40 = vpack.i.b16 %v1315_v31, %v1315_v31  ;;  %v1094_v31 = vld [vmem:[#allocation13 + $0x8] sm:$0x2] }
0x1226   :  { %1382 = vrot.lane.b32.xlu1 %v1332_v2, %s3422_s4 }
0x122a   :  { %1386 = vrot.lane.b32.xlu1 %v1346_v52, %s3422_s4  ;;  %v456_v52 = vld [vmem:[#allocation13 + $0xc] sm:$0x1] }
0x122e   :  { %1390 = vrot.lane.b32.xlu1 %v1360_v53, %s3422_s4 }
0x1232   :  { %1394 = vrot.lane.b32.xlu1 %v1374_v56, %s3422_s4  ;;  %v1958_v56 = vunpack.i.h.s16 %v3986_v50 }
0x1236   :  { %1704 = vrot.lane.b32.xlu1 %v1659_v59, %s3422_s4  ;;  %v1966_v59 = vpack.i.b16 %v1958_v56, %v1958_v56 }
0x123a   :  { %1708 = vrot.lane.b32.xlu1 %v1673_v63, %s3422_s4 }
0x123e   :  { %1712 = vrot.lane.b32.xlu1 %v1687_v4, %s3422_s4  ;;  %v2022_v4 = vrot.slane %v1966_v59, %v3804_v11  ;;  %v1097_v59 = vld [vmem:[#allocation13 + $0xc] sm:$0x2] }
0x1242   :  { %1716 = vrot.lane.b32.xlu1 %v1701_v38, %s3422_s4  ;;  %v447_v38 = vld [vmem:[#allocation13] sm:$0x1] }
0x1246   :  { %2345 = vrot.lane.b32.xlu1 %v2300_v12, %s3422_s4 }
0x124a   :  { %2349 = vrot.lane.b32.xlu1 %v2314_v16, %s3422_s4 }
0x124e   :  { %2353 = vrot.lane.b32.xlu1 %v2328_v22, %s3422_s4 }
0x1252   :  { %2357 = vrot.lane.b32.xlu1 %v2342_v46, %s3422_s4 }
0x1253   :  { %v2547_v26 = vpop.permute.xlu0 %2546 }
0x1254   :  { %v2549_v5 = vmul.f32 %v3821_v28, %v2547_v26 }
0x1256   :  { %1396 = vrot.lane.b32.xlu1 %v1381_v29, %s3422_s4 }
0x1257   :  { %v423_v36 = vpop.permute.xlu0 %422 }
0x1258   :  { %v451_v2 = vsel %vm3975_vm11, %v423_v36, %v450_v34  ;;  %v465_v36 = vld [vmem:[#allocation13 + $0x18] sm:$0x1] }
0x1259   :  { %452 = vst [vmem:[#allocation13 + $0x4] sm:$0x1] %v451_v2 }
0x125a   :  { %2025 = vrot.lane.b32.xlu1 %v1980_v47, %s3422_s4 }
0x125b   :  { %v427_v35 = vpop.permute.xlu0 %426 }
0x125c   :  { %v457_v53 = vsel %vm3975_vm11, %v427_v35, %v456_v52  ;;  %v1353_v52 = vrot.slane %v1321_v30, %v3804_v11 }
0x125d   :  { %458 = vst [vmem:[#allocation13 + $0xc] sm:$0x1] %v457_v53 }
0x125e   :  { %2029 = vrot.lane.b32.xlu1 %v1994_v39, %s3422_s4  ;;  %v1091_v39 = vld [vmem:[#allocation13 + $0x4] sm:$0x2] }
0x125f   :  { %v431_v57 = vpop.permute.xlu0 %430 }
0x1260   :  { %v463_v48 = vsel %vm3975_vm11, %v431_v57, %v462_v3  ;;  %v770_v8 = vld [vmem:[#allocation13 + $0x4] sm:$0x1] }
0x1261   :  { %464 = vst [vmem:[#allocation13 + $0x14] sm:$0x1] %v463_v48  ;;  %v1367_v48 = vrot.slane %v1323_v40, %v3804_v11 }
0x1262   :  { %2033 = vrot.lane.b32.xlu1 %v2008_v58, %s3422_s4 }
0x1263   :  { %v435_v61 = vpop.permute.xlu0 %434 }
0x1264   :  { %v469_v63 = vsel %vm3975_vm11, %v435_v61, %v468_v0  ;;  %v2557_v45 = vpop.permute.xlu1 %2556  ;;  %v776_v16 = vld [vmem:[#allocation13 + $0xc] sm:$0x1] }
0x1265   :  { %470 = vst [vmem:[#allocation13 + $0x1c] sm:$0x1] %v469_v63  ;;  %v2559_v6 = vadd.f32 %v2557_v45, %v2549_v5  ;;  %v1652_v45 = vrot.slane %v2849_v32, %v3804_v11 }
0x1266   :  { %2037 = vrot.lane.b32.xlu1 %v2022_v4, %s3422_s4  ;;  %v2850_v4 = vpack.i.b16 %v3905_v42, %v3905_v42 }
0x1267   :  { %3220 = vtanh.f32 %v2559_v6  ;;  %2719 = vst.msk [vmem:[#allocation3] sm:$0xff] %vm98_vm1, %v2559_v6  ;;  %v744_v9 = vpop.permute.xlu0 %743  ;;  %v1103_v6 = vld [vmem:[#allocation13 + $0x14] sm:$0x2] }
0x1268   :  { %v771_v12 = vsel %vm4003_vm13, %v744_v9, %v770_v8  ;;  %v421_v13 = vpop.permute.xlu1 %420  ;;  %v782_v37 = vld [vmem:[#allocation13 + $0x14] sm:$0x1] }
0x1269   :  { %772 = vst [vmem:[#allocation13 + $0x4] sm:$0x1] %v771_v12  ;;  %v448_v14 = vsel %vm3975_vm11, %v421_v13, %v447_v38  ;;  %v1666_v13 = vrot.slane %v2850_v4, %v3804_v11 }
0x126a   :  { %449 = vst [vmem:[#allocation13] sm:$0x1] %v448_v14  ;;  %v2851_v14 = vpack.i.b16 %v3912_v54, %v3912_v54  ;;  %v2852_v54 = vpack.i.b16 %v3923_v60, %v3923_v60 }
0x126b   :  { %v748_v17 = vpop.permute.xlu0 %747 }
0x126c   :  { %v777_v18 = vsel %vm4003_vm13, %v748_v17, %v776_v16  ;;  %v425_v19 = vpop.permute.xlu1 %424  ;;  %v788_v43 = vld [vmem:[#allocation13 + $0x1c] sm:$0x1]  ;;  %v1680_v20 = vrot.slane %v2851_v14, %v3804_v11  ;;  %v1694_v60 = vrot.slane %v2852_v54, %v3804_v11  ;;  %v2373_v54 = vld [vmem:[#allocation13 + $0x4] sm:$0x8] }
0x126d   :  { %778 = vst [vmem:[#allocation13 + $0xc] sm:$0x1] %v777_v18  ;;  %v454_v22 = vsel %vm3975_vm11, %v425_v19, %v453_v15  ;;  %v1109_v15 = vld [vmem:[#allocation13 + $0x1c] sm:$0x2] }
0x126e   :  { %455 = vst [vmem:[#allocation13 + $0x8] sm:$0x1] %v454_v22  ;;  %v2725_v46 = vld [vmem:[#allocation3] sm:$0xff] }
0x126f   :  { %v752_v25 = vpop.permute.xlu0 %751  ;;  %2726 = vst.msk [vmem:[#allocation16] sm:$0xff] %vm98_vm1, %v2725_v46  ;;  %v1088_v46 = vld [vmem:[#allocation13] sm:$0x2] }
0x1270   :  { %v783_v26 = vsel %vm4003_vm13, %v752_v25, %v782_v37  ;;  %v429_v29 = vpop.permute.xlu1 %428 }
0x1271   :  { %v3221_v34 = vpop.eup %3220  ;;  %784 = vst [vmem:[#allocation13 + $0x14] sm:$0x1] %v783_v26  ;;  %v460_v33 = vsel %vm3975_vm11, %v429_v29, %v459_v23  ;;  %v767_v3 = vld [vmem:[#allocation13] sm:$0x1]  ;;  %v1735_v23 = vld [vmem:[#allocation13 + $0x8] sm:$0x4] }
0x1272   :  { %461 = vst [vmem:[#allocation13 + $0x10] sm:$0x1] %v460_v33  ;;  %2562 = vrot.lane.b32.xlu0 %v3221_v34, %s3423_s22  ;;  %v2293_v33 = vrot.slane %v2879_v7, %v3804_v11 }
0x1273   :  { %v756_v2 = vpop.permute.xlu0 %755 }
0x1274   :  { %v789_v47 = vsel %vm4003_vm13, %v756_v2, %v788_v43  ;;  %v433_v49 = vpop.permute.xlu1 %432 }
0x1275   :  { %790 = vst [vmem:[#allocation13 + $0x1c] sm:$0x1] %v789_v47  ;;  %v466_v35 = vsel %vm3975_vm11, %v433_v49, %v465_v36  ;;  %v773_v61 = vld [vmem:[#allocation13 + $0x8] sm:$0x1]  ;;  %v2880_v36 = vpack.i.b16 %v3933_v44, %v3933_v44  ;;  %v2881_v49 = vpack.i.b16 %v3942_v10, %v3942_v10  ;;  %v1106_v44 = vld [vmem:[#allocation13 + $0x18] sm:$0x2]  ;;  %vm4154_vm11 = vmand %vm1726_vm4, %vm2047_vm10 }
0x1276   :  { %467 = vst [vmem:[#allocation13 + $0x18] sm:$0x1] %v466_v35  ;;  %1388 = vrot.lane.b32.xlu0 %v1353_v52, %s3422_s4 }
0x1277   :  { %v1064_v1 = vpop.permute.xlu0 %1063  ;;  %v2307_v47 = vrot.slane %v2880_v36, %v3804_v11  ;;  %v2321_v35 = vrot.slane %v2881_v49, %v3804_v11 }
0x1278   :  { %v1092_v56 = vsel %vm4031_vm0, %v1064_v1, %v1091_v39  ;;  %v742_v57 = vpop.permute.xlu1 %741  ;;  %v2882_v39 = vpack.i.b16 %v3949_v41, %v3949_v41 }
0x1279   :  { %1093 = vst [vmem:[#allocation13 + $0x4] sm:$0x2] %v1092_v56  ;;  %v768_v58 = vsel %vm4003_vm13, %v742_v57, %v767_v3  ;;  %v779_v9 = vld [vmem:[#allocation13 + $0x10] sm:$0x1]  ;;  %v2864_v57 = vpack.i.b16 %v3958_v21, %v3958_v21 }
0x127a   :  { %769 = vst [vmem:[#allocation13] sm:$0x1] %v768_v58  ;;  %1392 = vrot.lane.b32.xlu0 %v1367_v48, %s3422_s4  ;;  %v2335_v3 = vrot.slane %v2882_v39, %v3804_v11  ;;  %v2865_v58 = vpack.i.b16 %v3963_v24, %v3963_v24 }
0x127b   :  { %v1068_v0 = vpop.permute.xlu0 %1067  ;;  %v1973_v53 = vrot.slane %v2864_v57, %v3804_v11 }
0x127c   :  { %v1098_v5 = vsel %vm4031_vm0, %v1068_v0, %v1097_v59  ;;  %v746_v63 = vpop.permute.xlu1 %745 }
0x127d   :  { %1099 = vst [vmem:[#allocation13 + $0xc] sm:$0x2] %v1098_v5  ;;  %v774_v51 = vsel %vm4003_vm13, %v746_v63, %v773_v61  ;;  %v785_v18 = vld [vmem:[#allocation13 + $0x18] sm:$0x1]  ;;  %v1987_v5 = vrot.slane %v2865_v58, %v3804_v11  ;;  %v2866_v61 = vpack.i.b16 %v3970_v27, %v3970_v27  ;;  %v2382_v27 = vld [vmem:[#allocation13 + $0x10] sm:$0x8] }
0x127e   :  { %775 = vst [vmem:[#allocation13 + $0x8] sm:$0x1] %v774_v51  ;;  %1702 = vrot.lane.b32.xlu0 %v1652_v45, %s3422_s4  ;;  %v2867_v51 = vpack.i.b16 %v3986_v50, %v3986_v50  ;;  %v1738_v50 = vld [vmem:[#allocation13 + $0xc] sm:$0x4] }
0x127f   :  { %v1072_v38 = vpop.permute.xlu0 %1071  ;;  %v2001_v4 = vrot.slane %v2866_v61, %v3804_v11 }
0x1280   :  { %v1104_v8 = vsel %vm4031_vm0, %v1072_v38, %v1103_v6  ;;  %v750_v12 = vpop.permute.xlu1 %749  ;;  %v1411_v37 = vld [vmem:[#allocation13 + $0x4] sm:$0x2]  ;;  %v1732_v38 = vld [vmem:[#allocation13 + $0x4] sm:$0x4] }
0x1281   :  { %1105 = vst [vmem:[#allocation13 + $0x14] sm:$0x2] %v1104_v8  ;;  %v780_v42 = vsel %vm4003_vm13, %v750_v12, %v779_v9  ;;  %v2015_v9 = vrot.slane %v2867_v51, %v3804_v11 }
0x1282   :  { %781 = vst [vmem:[#allocation13 + $0x10] sm:$0x1] %v780_v42  ;;  %1706 = vrot.lane.b32.xlu0 %v1666_v13, %s3422_s4  ;;  %v1744_v42 = vld [vmem:[#allocation13 + $0x14] sm:$0x4] }
0x1283   :  { %v1076_v16 = vpop.permute.xlu0 %1075 }
0x1284   :  { %v1110_v17 = vsel %vm4031_vm0, %v1076_v16, %v1109_v15  ;;  %v754_v19 = vpop.permute.xlu1 %753 }
0x1285   :  { %1111 = vst [vmem:[#allocation13 + $0x1c] sm:$0x2] %v1110_v17  ;;  %v786_v22 = vsel %vm4003_vm13, %v754_v19, %v785_v18  ;;  %v1750_v17 = vld [vmem:[#allocation13 + $0x1c] sm:$0x4]  ;;  %vm4217_vm13 = vmand %vm2367_vm7, %vm2688_vm12 }
0x1286   :  { %787 = vst [vmem:[#allocation13 + $0x18] sm:$0x1] %v786_v22  ;;  %1710 = vrot.lane.b32.xlu0 %v1680_v20, %s3422_s4 }
0x1287   :  { %v1385_v25 = vpop.permute.xlu0 %1384 }
0x1288   :  { %v1412_v26 = vsel %vm4068_vm3, %v1385_v25, %v1411_v37  ;;  %v1062_v29 = vpop.permute.xlu1 %1061  ;;  %v2379_v37 = vld [vmem:[#allocation13 + $0xc] sm:$0x8] }
0x1289   :  { %1413 = vst [vmem:[#allocation13 + $0x4] sm:$0x2] %v1412_v26  ;;  %v1089_v30 = vsel %vm4031_vm0, %v1062_v29, %v1088_v46  ;;  %v2385_v29 = vld [vmem:[#allocation13 + $0x14] sm:$0x8] }
0x128a   :  { %1090 = vst [vmem:[#allocation13] sm:$0x2] %v1089_v30  ;;  %1714 = vrot.lane.b32.xlu0 %v1694_v60, %s3422_s4  ;;  %v2391_v30 = vld [vmem:[#allocation13 + $0x1c] sm:$0x8] }
0x128c   :  { %v1066_v34 = vpop.permute.xlu1 %1065 }
0x128d   :  { %v1095_v43 = vsel %vm4031_vm0, %v1066_v34, %v1094_v31 }
0x128e   :  { %1096 = vst [vmem:[#allocation13 + $0x8] sm:$0x2] %v1095_v43  ;;  %2343 = vrot.lane.b32.xlu0 %v2293_v33, %s3422_s4  ;;  %v1429_v33 = vld [vmem:[#allocation13 + $0x1c] sm:$0x2] }
0x1290   :  { %v1070_v2 = vpop.permute.xlu1 %1069 }
0x1291   :  { %v1101_v52 = vsel %vm4031_vm0, %v1070_v2, %v1100_v62  ;;  %v1408_v10 = vld [vmem:[#allocation13] sm:$0x2] }
0x1292   :  { %1102 = vst [vmem:[#allocation13 + $0x10] sm:$0x2] %v1101_v52  ;;  %2347 = vrot.lane.b32.xlu0 %v2307_v47, %s3422_s4 }
0x1294   :  { %v1074_v40 = vpop.permute.xlu1 %1073 }
0x1295   :  { %v1107_v1 = vsel %vm4031_vm0, %v1074_v40, %v1106_v44  ;;  %v1414_v41 = vld [vmem:[#allocation13 + $0x8] sm:$0x2] }
0x1296   :  { %1108 = vst [vmem:[#allocation13 + $0x18] sm:$0x2] %v1107_v1  ;;  %2351 = vrot.lane.b32.xlu0 %v2321_v35, %s3422_s4 }
0x1298   :  { %v1383_v56 = vpop.permute.xlu1 %1382 }
0x1299   :  { %v1409_v48 = vsel %vm4068_vm3, %v1383_v56, %v1408_v10  ;;  %v1420_v21 = vld [vmem:[#allocation13 + $0x10] sm:$0x2] }
0x129a   :  { %1410 = vst [vmem:[#allocation13] sm:$0x2] %v1409_v48  ;;  %2355 = vrot.lane.b32.xlu0 %v2335_v3, %s3422_s4 }
0x129c   :  { %v1387_v32 = vpop.permute.xlu1 %1386 }
0x129d   :  { %v1415_v59 = vsel %vm4068_vm3, %v1387_v32, %v1414_v41  ;;  %v1426_v24 = vld [vmem:[#allocation13 + $0x18] sm:$0x2]  ;;  %v1417_v32 = vld [vmem:[#allocation13 + $0xc] sm:$0x2] }
0x129e   :  { %1416 = vst [vmem:[#allocation13 + $0x8] sm:$0x2] %v1415_v59  ;;  %2023 = vrot.lane.b32.xlu0 %v1973_v53, %s3422_s4 }
0x12a0   :  { %v1391_v0 = vpop.permute.xlu1 %1390 }
0x12a1   :  { %v1421_v63 = vsel %vm4068_vm3, %v1391_v0, %v1420_v21 }
0x12a2   :  { %1422 = vst [vmem:[#allocation13 + $0x10] sm:$0x2] %v1421_v63  ;;  %2027 = vrot.lane.b32.xlu0 %v1987_v5, %s3422_s4  ;;  %v1423_v5 = vld [vmem:[#allocation13 + $0x14] sm:$0x2] }
0x12a4   :  { %v1395_v45 = vpop.permute.xlu1 %1394 }
0x12a5   :  { %v1427_v6 = vsel %vm4068_vm3, %v1395_v45, %v1426_v24 }
0x12a6   :  { %1428 = vst [vmem:[#allocation13 + $0x18] sm:$0x2] %v1427_v6  ;;  %2031 = vrot.lane.b32.xlu0 %v2001_v4, %s3422_s4  ;;  %v1729_v4 = vld [vmem:[#allocation13] sm:$0x4] }
0x12a8   :  { %v1705_v8 = vpop.permute.xlu1 %1704 }
0x12a9   :  { %v1733_v12 = vsel %vm4124_vm6, %v1705_v8, %v1732_v38 }
0x12aa   :  { %1734 = vst [vmem:[#allocation13 + $0x4] sm:$0x4] %v1733_v12  ;;  %2035 = vrot.lane.b32.xlu0 %v2015_v9, %s3422_s4 }
0x12ac   :  { %v1709_v13 = vpop.permute.xlu1 %1708 }
0x12ad   :  { %v1739_v14 = vsel %vm4124_vm6, %v1709_v13, %v1738_v50 }
0x12ae   :  { %1740 = vst [vmem:[#allocation13 + $0xc] sm:$0x4] %v1739_v14 }
0x12b0   :  { %v1713_v15 = vpop.permute.xlu1 %1712 }
0x12b1   :  { %v1745_v16 = vsel %vm4124_vm6, %v1713_v15, %v1744_v42  ;;  %v2052_v2 = vld [vmem:[#allocation13 + $0x4] sm:$0x4] }
0x12b2   :  { %1746 = vst [vmem:[#allocation13 + $0x14] sm:$0x4] %v1745_v16 }
0x12b4   :  { %v1717_v18 = vpop.permute.xlu1 %1716 }
0x12b5   :  { %v1751_v19 = vsel %vm4124_vm6, %v1717_v18, %v1750_v17  ;;  %v2058_v52 = vld [vmem:[#allocation13 + $0xc] sm:$0x4] }
0x12b6   :  { %1752 = vst [vmem:[#allocation13 + $0x1c] sm:$0x4] %v1751_v19 }
0x12b8   :  { %v2346_v22 = vpop.permute.xlu1 %2345 }
0x12b9   :  { %v2374_v46 = vsel %vm4139_vm9, %v2346_v22, %v2373_v54  ;;  %v2064_v35 = vld [vmem:[#allocation13 + $0x14] sm:$0x4]  ;;  %v1741_v54 = vld [vmem:[#allocation13 + $0x10] sm:$0x4] }
0x12ba   :  { %2375 = vst [vmem:[#allocation13 + $0x4] sm:$0x8] %v2374_v46 }
0x12bc   :  { %v2350_v25 = vpop.permute.xlu1 %2349 }
0x12bd   :  { %v2380_v26 = vsel %vm4139_vm9, %v2350_v25, %v2379_v37  ;;  %v2070_v10 = vld [vmem:[#allocation13 + $0x1c] sm:$0x4] }
0x12be   :  { %2381 = vst [vmem:[#allocation13 + $0xc] sm:$0x8] %v2380_v26 }
0x12c0   :  { %v2354_v60 = vpop.permute.xlu1 %2353 }
0x12c1   :  { %v2386_v7 = vsel %vm4139_vm9, %v2354_v60, %v2385_v29 }
0x12c2   :  { %2387 = vst [vmem:[#allocation13 + $0x14] sm:$0x8] %v2386_v7  ;;  %v1747_v7 = vld [vmem:[#allocation13 + $0x18] sm:$0x4] }
0x12c4   :  { %v2358_v31 = vpop.permute.xlu1 %2357 }
0x12c5   :  { %v2392_v34 = vsel %vm4139_vm9, %v2358_v31, %v2391_v30 }
0x12c6   :  { %2393 = vst [vmem:[#allocation13 + $0x1c] sm:$0x8] %v2392_v34 }
0x12c8   :  { %v1397_v36 = vpop.permute.xlu1 %1396 }
0x12c9   :  { %v1430_v43 = vsel %vm4068_vm3, %v1397_v36, %v1429_v33 }
0x12ca   :  { %1431 = vst [vmem:[#allocation13 + $0x1c] sm:$0x2] %v1430_v43  ;;  %v2370_v43 = vld [vmem:[#allocation13] sm:$0x8] }
0x12cc   :  { %v2026_v47 = vpop.permute.xlu1 %2025 }
0x12cd   :  { %v2053_v49 = vsel %vm4154_vm11, %v2026_v47, %v2052_v2 }
0x12ce   :  { %2054 = vst [vmem:[#allocation13 + $0x4] sm:$0x4] %v2053_v49  ;;  %v2376_v49 = vld [vmem:[#allocation13 + $0x8] sm:$0x8] }
0x12d0   :  { %v2030_v44 = vpop.permute.xlu1 %2029 }
0x12d1   :  { %v2059_v40 = vsel %vm4154_vm11, %v2030_v44, %v2058_v52 }
0x12d2   :  { %2060 = vst [vmem:[#allocation13 + $0xc] sm:$0x4] %v2059_v40 }
0x12d4   :  { %v2034_v39 = vpop.permute.xlu1 %2033 }
0x12d5   :  { %v2065_v1 = vsel %vm4154_vm11, %v2034_v39, %v2064_v35 }
0x12d6   :  { %2066 = vst [vmem:[#allocation13 + $0x14] sm:$0x4] %v2065_v1 }
0x12d8   :  { %v2038_v56 = vpop.permute.xlu1 %2037 }
0x12d9   :  { %v2071_v3 = vsel %vm4154_vm11, %v2038_v56, %v2070_v10 }
0x12da   :  { %2072 = vst [vmem:[#allocation13 + $0x1c] sm:$0x4] %v2071_v3 }
0x12e4   :  { %v2563_v57 = vpop.permute.xlu0 %2562 }
0x12e5   :  { %v2565_v48 = vmul.f32 %v3821_v28, %v2563_v57 }
0x12e7   :  { %v2566_v41 = vpack.c.bf16 %v2565_v48, %v2565_v48  ;;  %2715 = vrot.lane.b32.xlu0 %v2565_v48, %s3422_s4 }
0x12e8   :  { %v1389_v53 = vpop.permute.xlu0 %1388 }
0x12e9   :  { %v2574_v58 = vrot.slane %v2566_v41, %v3795_v55  ;;  %v1418_v59 = vsel %vm4068_vm3, %v1389_v53, %v1417_v32 }
0x12ea   :  { %1419 = vst [vmem:[#allocation13 + $0xc] sm:$0x2] %v1418_v59 }
0x12eb   :  { %v2575_v21 = vcombine.high %v2574_v58, %v2574_v58  ;;  %v2582_v0 = vrot.slane %v2574_v58, %v3795_v55 }
0x12ec   :  { %v1393_v61 = vpop.permute.xlu0 %1392 }
0x12ed   :  { %v2589_v63 = vrot.slane %v2575_v21, %v3795_v55  ;;  %v1424_v28 = vsel %vm4068_vm3, %v1393_v61, %v1423_v5  ;;  %v2894_v24 = vpack.i.b16 %v2582_v0, %v2582_v0  ;;  %v2590_v45 = vcombine.high %v2582_v0, %v2582_v0 }
0x12ee   :  { %1425 = vst [vmem:[#allocation13 + $0x14] sm:$0x2] %v1424_v28  ;;  %v2593_v51 = vunpack.i.h.s16 %v2582_v0 }
0x12ef   :  { %v2614_v6 = vrot.slane %v2894_v24, %v3804_v11  ;;  %v2895_v38 = vpack.i.b16 %v2589_v63, %v2589_v63  ;;  %v2595_v8 = vunpack.i.h.s16 %v2589_v63  ;;  %v2597_v14 = vunpack.i.h.s16 %v2590_v45 }
0x12f0   :  { %v1703_v9 = vpop.permute.xlu0 %1702  ;;  %v2601_v12 = vpack.i.b16 %v2593_v51, %v2593_v51  ;;  %v2591_v42 = vcombine.high %v2589_v63, %v2589_v63  ;;  %v2896_v16 = vpack.i.b16 %v2590_v45, %v2590_v45 }
0x12f1   :  { %v1730_v50 = vsel %vm4124_vm6, %v1703_v9, %v1729_v4  ;;  %2664 = vrot.lane.b32.xlu0 %v2614_v6, %s3422_s4  ;;  %v2603_v13 = vpack.i.b16 %v2595_v8, %v2595_v8  ;;  %v2628_v15 = vrot.slane %v2895_v38, %v3804_v11  ;;  %v2605_v22 = vpack.i.b16 %v2597_v14, %v2597_v14 }
0x12f2   :  { %1731 = vst [vmem:[#allocation13] sm:$0x4] %v1730_v50  ;;  %v2621_v55 = vrot.slane %v2601_v12, %v3804_v11  ;;  %v2599_v46 = vunpack.i.h.s16 %v2591_v42  ;;  %v2642_v37 = vrot.slane %v2896_v16, %v3804_v11  ;;  %v2897_v25 = vpack.i.b16 %v2591_v42, %v2591_v42 }
0x12f3   :  { %v2635_v19 = vrot.slane %v2603_v13, %v3804_v11  ;;  %v2649_v60 = vrot.slane %v2605_v22, %v3804_v11 }
0x12f4   :  { %2666 = vrot.lane.b32.xlu1 %v2621_v55, %s3422_s4  ;;  %v1707_v17 = vpop.permute.xlu0 %1706  ;;  %v2607_v30 = vpack.i.b16 %v2599_v46, %v2599_v46  ;;  %v2656_v31 = vrot.slane %v2897_v25, %v3804_v11 }
0x12f5   :  { %v1736_v18 = vsel %vm4124_vm6, %v1707_v17, %v1735_v23  ;;  %2668 = vrot.lane.b32.xlu0 %v2628_v15, %s3422_s4 }
0x12f6   :  { %1737 = vst [vmem:[#allocation13 + $0x8] sm:$0x4] %v1736_v18  ;;  %v2663_v36 = vrot.slane %v2607_v30, %v3804_v11  ;;  %v2388_v11 = vld [vmem:[#allocation13 + $0x18] sm:$0x8] }
0x12f8   :  { %2670 = vrot.lane.b32.xlu1 %v2635_v19, %s3422_s4  ;;  %v1711_v26 = vpop.permute.xlu0 %1710 }
0x12f9   :  { %v1742_v29 = vsel %vm4124_vm6, %v1711_v26, %v1741_v54  ;;  %2672 = vrot.lane.b32.xlu0 %v2642_v37, %s3422_s4  ;;  %v2049_v10 = vld [vmem:[#allocation13] sm:$0x4] }
0x12fa   :  { %1743 = vst [vmem:[#allocation13 + $0x10] sm:$0x4] %v1742_v29 }
0x12fc   :  { %2674 = vrot.lane.b32.xlu1 %v2649_v60, %s3422_s4  ;;  %v1715_v34 = vpop.permute.xlu0 %1714 }
0x12fd   :  { %v1748_v33 = vsel %vm4124_vm6, %v1715_v34, %v1747_v7  ;;  %2676 = vrot.lane.b32.xlu0 %v2656_v31, %s3422_s4  ;;  %v2055_v57 = vld [vmem:[#allocation13 + $0x8] sm:$0x4] }
0x12fe   :  { %1749 = vst [vmem:[#allocation13 + $0x18] sm:$0x4] %v1748_v33 }
0x1300   :  { %2678 = vrot.lane.b32.xlu1 %v2663_v36, %s3422_s4  ;;  %v2344_v2 = vpop.permute.xlu0 %2343 }
0x1301   :  { %v2371_v47 = vsel %vm4139_vm9, %v2344_v2, %v2370_v43  ;;  %v2061_v32 = vld [vmem:[#allocation13 + $0x10] sm:$0x4] }
0x1302   :  { %2372 = vst [vmem:[#allocation13] sm:$0x8] %v2371_v47 }
0x1304   :  { %v2348_v52 = vpop.permute.xlu0 %2347 }
0x1305   :  { %v2377_v44 = vsel %vm4139_vm9, %v2348_v52, %v2376_v49  ;;  %v2067_v20 = vld [vmem:[#allocation13 + $0x18] sm:$0x4] }
0x1306   :  { %2378 = vst [vmem:[#allocation13 + $0x8] sm:$0x8] %v2377_v44 }
0x1308   :  { %v2352_v40 = vpop.permute.xlu0 %2351 }
0x1309   :  { %v2383_v35 = vsel %vm4139_vm9, %v2352_v40, %v2382_v27  ;;  %v2690_v62 = vld [vmem:[#allocation13] sm:$0x8] }
0x130a   :  { %2384 = vst [vmem:[#allocation13 + $0x10] sm:$0x8] %v2383_v35 }
0x130c   :  { %v2356_v39 = vpop.permute.xlu0 %2355 }
0x130d   :  { %v2389_v1 = vsel %vm4139_vm9, %v2356_v39, %v2388_v11 }
0x130e   :  { %2390 = vst [vmem:[#allocation13 + $0x18] sm:$0x8] %v2389_v1 }
0x1310   :  { %v2024_v56 = vpop.permute.xlu0 %2023 }
0x1311   :  { %v2050_v3 = vsel %vm4154_vm11, %v2024_v56, %v2049_v10 }
0x1312   :  { %2051 = vst [vmem:[#allocation13] sm:$0x4] %v2050_v3 }
0x1314   :  { %v2028_v48 = vpop.permute.xlu0 %2027 }
0x1315   :  { %v2056_v41 = vsel %vm4154_vm11, %v2028_v48, %v2055_v57 }
0x1316   :  { %2057 = vst [vmem:[#allocation13 + $0x8] sm:$0x4] %v2056_v41 }
0x1318   :  { %v2032_v53 = vpop.permute.xlu0 %2031 }
0x1319   :  { %v2062_v58 = vsel %vm4154_vm11, %v2032_v53, %v2061_v32 }
0x131a   :  { %2063 = vst [vmem:[#allocation13 + $0x10] sm:$0x4] %v2062_v58 }
0x131c   :  { %v2036_v59 = vpop.permute.xlu0 %2035 }
0x131d   :  { %v2068_v21 = vsel %vm4154_vm11, %v2036_v59, %v2067_v20 }
0x131e   :  { %2069 = vst [vmem:[#allocation13 + $0x18] sm:$0x4] %v2068_v21 }
0x1359   :  { %v2716_v0 = vpop.permute.xlu0 %2715 }
0x135a   :  { %2718 = vst.msk [vmem:[#allocation2] sm:$0xff] %vm98_vm1, %v2716_v0 }
0x1361   :  { %v2723_v61 = vld [vmem:[#allocation2] sm:$0xff] }
0x1362   :  { %2724 = vst.msk [vmem:[#allocation14] sm:$0xff] %vm98_vm1, %v2723_v61 }
0x1363   :  { %v2665_v63 = vpop.permute.xlu0 %2664 }
0x1364   :  { %3348 = shalt.err (!%p3345_p2)
}
0x1365   :  { %s3349_s0 = scalar_lea.hbm %s4291_s7, 128 }
0x1366   :  { %p3350_p3 = scmp.ne.s32.totalorder %s4291_s7, %s3349_s0  ;;  %p3353_p4 = scmp.lt.u32.totalorder %s3349_s0, %s4291_s7 }
0x1368   :  { %p3355_p5 = pnand %p3353_p4, %p3350_p3 }
0x136a   :  { %3358 = shalt.err (!%p3355_p5)
}
0x136b   :  { %2748 = dma.vmem_to_hbm [thread:$0]  %s2746_s25, 128, %s4291_s7, [#allocation15]   ;;  %v2691_v28 = vsel %vm4217_vm13, %v2665_v63, %v2690_v62 }
0x136c   :  { %s3359_s15 = scalar_lea.vmem %s4221_s27, 128  ;;  %p3364_p7 = scmp.lt.s32.totalorder %s4221_s27, %s4221_s27 }
0x136d   :  { %p3360_p6 = scmp.ne.s32.totalorder %s4221_s27, %s3359_s15  ;;  %p3365_p8 = scmp.lt.s32.totalorder %s3359_s15, %s3359_s15 }
0x136f   :  { %p3366_p9 = por %p3365_p8, %p3364_p7 }
0x1371   :  { %p3367_p10 = pnand %p3366_p9, %p3360_p6 }
0x1373   :  { %3370 = shalt.err (!%p3367_p10)
}
0x1374   :  { %s3371_s3 = scalar_lea.hbm %s4292_s8, 128 }
0x1375   :  { %p3372_p11 = scmp.ne.s32.totalorder %s4292_s8, %s3371_s3  ;;  %p3375_p12 = scmp.lt.u32.totalorder %s3371_s3, %s4292_s8 }
0x1377   :  { %p3377_p13 = pnand %p3375_p12, %p3372_p11 }
0x1379   :  { %3380 = shalt.err (!%p3377_p13)
}
0x137a   :  { %2758 = dma.vmem_to_hbm [thread:$0]  %s4221_s27, 128, %s4292_s8, [#allocation15]   ;;  %2692 = vst [vmem:[#allocation13] sm:$0x8] %v2691_v28  ;;  %v2693_v24 = vld [vmem:[#allocation13 + $0x4] sm:$0x8]  ;;  %v2667_v45 = vpop.permute.xlu1 %2666  ;;  %v2669_v6 = vpop.permute.xlu0 %2668 }
0x137b   :  { %v2694_v4 = vsel %vm4217_vm13, %v2667_v45, %v2693_v24  ;;  %v2696_v51 = vld [vmem:[#allocation13 + $0x8] sm:$0x8]  ;;  %v2699_v8 = vld [vmem:[#allocation13 + $0xc] sm:$0x8]  ;;  %v2702_v50 = vld [vmem:[#allocation13 + $0x10] sm:$0x8] }
0x137c   :  { %2695 = vst [vmem:[#allocation13 + $0x4] sm:$0x8] %v2694_v4  ;;  %v2697_v38 = vsel %vm4217_vm13, %v2669_v6, %v2696_v51  ;;  %v2705_v13 = vld [vmem:[#allocation13 + $0x14] sm:$0x8]  ;;  %v2708_v15 = vld [vmem:[#allocation13 + $0x18] sm:$0x8] }
0x137d   :  { %2698 = vst [vmem:[#allocation13 + $0x8] sm:$0x8] %v2697_v38  ;;  %s3428_s8 = smov [#allocation13]   ;;  %v2711_v18 = vld [vmem:[#allocation13 + $0x1c] sm:$0x8] }
0x137e   :  { %v2671_v9 = vpop.permute.xlu1 %2670  ;;  %v2673_v55 = vpop.permute.xlu0 %2672  ;;  %s2732_s22 = sshll.u32 %s3428_s8, 4  ;;  %s2733_s22 = int_to_ptr.vmem [resolvable:$true] %s2732_s22 }
0x137f   :  { %v2700_v12 = vsel %vm4217_vm13, %v2671_v9, %v2699_v8  ;;  %v2703_v23 = vsel %vm4217_vm13, %v2673_v55, %v2702_v50  ;;  %s3381_s23 = scalar_lea.vmem %s2733_s22, 512  ;;  %p3386_p1 = scmp.lt.s32.totalorder %s2733_s22, %s2733_s22 }
0x1380   :  { %2701 = vst [vmem:[#allocation13 + $0xc] sm:$0x8] %v2700_v12  ;;  %2704 = vst [vmem:[#allocation13 + $0x10] sm:$0x8] %v2703_v23  ;;  %p3382_p0 = scmp.ne.s32.totalorder %s2733_s22, %s3381_s23  ;;  %p3387_p2 = scmp.lt.s32.totalorder %s3381_s23, %s3381_s23 }
0x1382   :  { %v2675_v14 = vpop.permute.xlu1 %2674  ;;  %v2677_v16 = vpop.permute.xlu0 %2676  ;;  %p3388_p3 = por %p3387_p2, %p3386_p1 }
0x1383   :  { %v2706_v42 = vsel %vm4217_vm13, %v2675_v14, %v2705_v13  ;;  %v2709_v17 = vsel %vm4217_vm13, %v2677_v16, %v2708_v15 }
0x1384   :  { %2707 = vst [vmem:[#allocation13 + $0x14] sm:$0x8] %v2706_v42  ;;  %2710 = vst [vmem:[#allocation13 + $0x18] sm:$0x8] %v2709_v17  ;;  %p3389_p4 = pnand %p3388_p3, %p3382_p0 }
0x1386   :  { %v2679_v19 = vpop.permute.xlu1 %2678 }
0x1387   :  { %v2712_v54 = vsel %vm4217_vm13, %v2679_v19, %v2711_v18 }
0x1388   :  { %2713 = vst [vmem:[#allocation13 + $0x1c] sm:$0x8] %v2712_v54 }
0x1389   :  { %3392 = shalt.err (!%p3389_p4)
}
0x138a   :  { %s3393_s25 = scalar_lea.hbm %s4290_s6, 512 }
0x138b   :  { %p3394_p5 = scmp.ne.s32.totalorder %s4290_s6, %s3393_s25  ;;  %p3397_p6 = scmp.lt.u32.totalorder %s3393_s25, %s4290_s6 }
0x138d   :  { %p3399_p7 = pnand %p3397_p6, %p3394_p5 }
0x138f   :  { %3402 = shalt.err (!%p3399_p7)
}
0x1390   :  { %2738 = dma.vmem_to_hbm [thread:$0]  %s2733_s22, 512, %s4290_s6, [#allocation6], %s3416_s28, %s3416_s28, %s3417_s29  }
0x1391   :  { %3409 = dma.done.wait [#allocation6], 512  }
0x1392   :  { %3410 = vsyncadd [#allocation6], 4294966784 }
0x1393   :  { %3411 = dma.done.wait [#allocation15], 256  }
0x1394   :  { %3412 = vsyncadd [#allocation15], 4294967040 }
0x1395   :  { %2768 = vsyncpa [#allocation5], 1 }
0x1396   :  { %2769 = vsyncpa [#allocation8], 1 }
0x1397   :  { %2770 = vsyncpa [#allocation11], 1 }
0x1398   :  { %2771 = vsyncpa [#allocation6], 1 }
0x1399   :  { %2772 = vsyncpa [#allocation15], 1 }

</bundles_post_ra>
